<compile_context>
chip_gen: v6e
topology: v6e:2x2x1
jax: 0.10.0
libtpu: 0.0.40
codegen_flags: <defaults>
</compile_context>

<pallas_src>
import functools

import jax
import jax.numpy as jnp
from jax import lax
from jax.experimental import pallas as pl
from jax.experimental.pallas import tpu as pltpu


# ------------------------------- Pallas kernel --------------------------------


def _make_bottleneck_kernel(H, W, planes, cin, cout, compute_dtype):
    """Fused conv1(1x1) -> conv2(3x3,pad=1) -> conv3(1x1) + residual + ReLU, stride=1."""
    del cout  # == cin (asserted by the wrapper)
    Wp = W + 2                # 1 pad column each side
    HpWp = (H + 3) * Wp       # 1 pad row on top, 2 on the bottom: the extra zero row keeps
                              # every shifted flat slice below in-bounds (it only ever feeds
                              # the discarded pad columns of the output).
    HWp = H * Wp

    def kernel(xp_ref, w1_ref, w2_ref, w3_ref, o_ref):
        # xp_ref: (1, HpWp, cin) padded input (compute_dtype); weights are grid-resident.
        xp = xp_ref[0]                                  # (HpWp, cin)
        xpf = xp.astype(jnp.float32)                    # f32 copy for the residual epilogue

        # conv1 (1x1, gate pre-folded). Padding rows/cols stay exactly zero (no bias).
        y1 = jnp.dot(xp, w1_ref[...],
                     preferred_element_type=jnp.float32)          # (HpWp, planes) f32

        # conv2 (3x3, padding baked into the input): 9 shifted flat slices, f32 accumulate.
        # Output index q = h*Wp + w is valid for w < W; columns W, W+1 are junk and are
        # dropped by the wrapper, so their wrapped/zero-row contributions are harmless.
        z = jnp.zeros((HWp, planes), jnp.float32)
        for dy in range(3):
            for dx in range(3):
                off = dy * Wp + dx
                y_tap = lax.slice(y1, (off, 0), (off + HWp, planes))
                z = z + jnp.dot(y_tap.astype(compute_dtype), w2_ref[dy * 3 + dx],
                                preferred_element_type=jnp.float32)

        # conv3 (1x1, gate pre-folded) + residual add + ReLU, all-f32 epilogue.
        out = jnp.dot(z.astype(compute_dtype), w3_ref[...],
                      preferred_element_type=jnp.float32)         # (HWp, cin)
        res = lax.slice(xpf, (Wp + 1, 0), (Wp + 1 + HWp, cin))    # x[h, w] for q = h*Wp + w
        o_ref[0] = jnp.maximum(out + res, 0.0)

    return kernel


# ------------------------------- wrappers --------------------------------------


def bottleneck_forward_nhwc(x_nhwc, params, stride=1, compute_dtype=jnp.float32):
    """x_nhwc: (N, H, W, inplanes). Returns (N, H, W, 4*planes) float32."""
    # downsample is None => the residual add is only well-defined for stride == 1
    # (the PyTorch forward would also fail shape-wise otherwise).
    assert stride == 1, "fused kernel supports stride=1 (downsample is None)"
    w1, g1, w2, g2, w3, g3 = (params["w1"], params["g1"], params["w2"],
                              params["g2"], params["w3"], params["g3"])
    N, H, W, Cin = x_nhwc.shape
    planes = w1.shape[0]
    Cout = w3.shape[0]
    assert Cout == Cin, "downsample is None requires inplanes == 4*planes"

    sig = jax.nn.sigmoid
    # Fold the per-output-channel gates into the weights: (x @ w) * s == x @ (w * s).
    w1_eff = (w1.reshape(planes, Cin).T * sig(g1)[None, :]).astype(compute_dtype)   # (Cin, planes)
    w2_eff = jnp.transpose(w2, (2, 3, 1, 0)) * sig(g2)[None, None, None, :]         # (3,3,Cin,Cout)
    w2_eff = w2_eff.reshape(9, planes, planes).astype(compute_dtype)                # per-tap (Cin,Cout)
    w3_eff = (w3.reshape(Cout, planes).T * sig(g3)[None, :]).astype(compute_dtype)  # (planes, Cout)

    # Bake the 3x3 conv's zero padding into the input once: 1 row top, 2 rows bottom
    # (extra row keeps all 9 shifted slices in-bounds), 1 column each side.
    Wp = W + 2
    HpWp = (H + 3) * Wp
    HWp = H * Wp
    xp = jnp.pad(x_nhwc, ((0, 0), (1, 2), (1, 1), (0, 0)))
    xp = xp.reshape(N, HpWp, Cin).astype(compute_dtype)

    itemsize = jnp.dtype(compute_dtype).itemsize
    cost = pl.CostEstimate(
        flops=2 * N * (HpWp * Cin * planes + 9 * HWp * planes * planes + HWp * planes * Cout),
        transcendentals=0,
        bytes_accessed=(N * HpWp * Cin * itemsize
                        + (Cin * planes + 9 * planes * planes + planes * Cout) * itemsize
                        + N * HWp * Cout * 4),
    )

    kernel = _make_bottleneck_kernel(H, W, planes, Cin, Cout, compute_dtype)
    out = pl.pallas_call(
        kernel,
        out_shape=jax.ShapeDtypeStruct((N, HWp, Cout), jnp.float32),
        grid_spec=pltpu.PrefetchScalarGridSpec(
            num_scalar_prefetch=0,
            grid=(N,),
            in_specs=[
                pl.BlockSpec((1, HpWp, Cin), lambda n: (n, 0, 0)),        # per-sample input
                pl.BlockSpec((Cin, planes), lambda n: (0, 0)),            # resident weights
                pl.BlockSpec((9, planes, planes), lambda n: (0, 0, 0)),
                pl.BlockSpec((planes, Cout), lambda n: (0, 0)),
            ],
            out_specs=pl.BlockSpec((1, HWp, Cout), lambda n: (n, 0, 0)),
        ),
        compiler_params=pltpu.CompilerParams(dimension_semantics=("parallel",)),
        cost_estimate=cost,
    )(xp, w1_eff, w2_eff, w3_eff)

    # Drop the 2 junk pad columns of each row (only columns [0, W) are valid outputs).
    return out.reshape(N, H, Wp, Cout)[:, :, :W, :]


def bottleneck_forward(x_nchw, params, stride=1, compute_dtype=jnp.float32):
    """PyTorch-layout wrapper: (N, inplanes, H, W) -> (N, 4*planes, H, W).

    If this block sits inside a ResNet stack, call bottleneck_forward_nhwc directly and keep
    activations in NHWC; these boundary transposes exist only for PyTorch-layout parity.
    """
    x = jnp.transpose(x_nchw, (0, 2, 3, 1))
    out = bottleneck_forward_nhwc(x, params, stride=stride, compute_dtype=compute_dtype)
    return jnp.transpose(out, (0, 3, 1, 2))


# --------------------------- reference (pure JAX) -------------------------------


def bottleneck_reference(x_nchw, params, stride=1):
    w1, g1, w2, g2, w3, g3 = (params["w1"], params["g1"], params["w2"],
                              params["g2"], params["w3"], params["g3"])

    def conv(x, w, stride, pad):
        return lax.conv_general_dilated(
            x, w, window_strides=(stride, stride), padding=[(pad, pad), (pad, pad)],
            dimension_numbers=("NCHW", "OIHW", "NCHW"))

    out = conv(x_nchw, w1, 1, 0) * jax.nn.sigmoid(g1)[None, :, None, None]
    out = conv(out, w2, stride, 1) * jax.nn.sigmoid(g2)[None, :, None, None]
    out = conv(out, w3, 1, 0) * jax.nn.sigmoid(g3)[None, :, None, None]
    out = out + x_nchw
    return jnp.maximum(out, 0.0)


# ------------------------------------ main --------------------------------------


if __name__ == "__main__":
    key = jax.random.PRNGKey(0)
    # Small Bottleneck: inplanes = planes * expansion so downsample is None, stride = 1.
    N, planes, Hs, Ws = 2, 4, 16, 16
    inplanes = planes * 4  # expansion = 4
    stride = 1

    ks = jax.random.split(key, 7)
    params = {
        "w1": 0.1 * jax.random.normal(ks[0], (planes, inplanes, 1, 1), jnp.float32),
        "g1": 0.5 * jax.random.normal(ks[1], (planes,), jnp.float32),
        "w2": 0.1 * jax.random.normal(ks[2], (planes, planes, 3, 3), jnp.float32),
        "g2": 0.5 * jax.random.normal(ks[3], (planes,), jnp.float32),
        "w3": 0.1 * jax.random.normal(ks[4], (planes * 4, planes, 1, 1), jnp.float32),
        "g3": 0.5 * jax.random.normal(ks[5], (planes * 4,), jnp.float32),
    }
    x = jax.random.normal(ks[6], (N, inplanes, Hs, Ws), jnp.float32)

    ref = jax.block_until_ready(bottleneck_reference(x, params, stride=stride))

    # f32 compute path (tight tolerance).
    fwd_f32 = jax.jit(functools.partial(bottleneck_forward, stride=stride,
                                        compute_dtype=jnp.float32))
    out = jax.block_until_ready(fwd_f32(x, params))
    assert out.shape == (N, planes * 4, Hs, Ws), out.shape
    assert jnp.allclose(out, ref, atol=1e-4, rtol=1e-4), float(jnp.max(jnp.abs(out - ref)))

    # bf16 MXU path (f32 accumulation + epilogue) -- looser tolerance.
    fwd_bf16 = jax.jit(functools.partial(bottleneck_forward, stride=stride,
                                         compute_dtype=jnp.bfloat16))
    out_bf16 = jax.block_until_ready(fwd_bf16(x, params))
    assert jnp.allclose(out_bf16, ref, atol=5e-2, rtol=5e-2), \
        float(jnp.max(jnp.abs(out_bf16 - ref)))

    print("KERNEL_OK")
</pallas_src>

<mosaic_0001>
module attributes {stable_mosaic.version = 11 : i64} {
  func.func @kernel(%arg0: i32, %arg1: memref<1x342x16xf32, #tpu.memory_space<vmem>>, %arg2: memref<16x4xf32, #tpu.memory_space<vmem>>, %arg3: memref<9x4x4xf32, #tpu.memory_space<vmem>>, %arg4: memref<4x16xf32, #tpu.memory_space<vmem>>, %arg5: memref<1x288x16xf32, #tpu.memory_space<vmem>>) attributes {dimension_semantics = [#tpu.dimension_semantics<parallel>], iteration_bounds = array<i64: 2>, scalar_prefetch = 0 : i64, scratch_operands = 0 : i64, tpu.core_type = #tpu.core_type<tc>, window_params = [{transform_indices = @transform_0, window_bounds = array<i64: 1, 342, 16>}, {pipeline_mode = #tpu.pipeline_mode<synchronous>, transform_indices = @transform_1, window_bounds = array<i64: 16, 4>}, {pipeline_mode = #tpu.pipeline_mode<synchronous>, transform_indices = @transform_2, window_bounds = array<i64: 9, 4, 4>}, {pipeline_mode = #tpu.pipeline_mode<synchronous>, transform_indices = @transform_3, window_bounds = array<i64: 4, 16>}, {transform_indices = @transform_4, window_bounds = array<i64: 1, 288, 16>}]} {
    %c0 = arith.constant 0 : index
    %c0_0 = arith.constant 0 : index
    %c0_1 = arith.constant 0 : index
    %0 = vector.load %arg1[%c0, %c0_0, %c0_1] : memref<1x342x16xf32, #tpu.memory_space<vmem>>, vector<1x342x16xf32>
    %1 = vector.shape_cast %0 : vector<1x342x16xf32> to vector<342x16xf32>
    %c0_2 = arith.constant 0 : index
    %c0_3 = arith.constant 0 : index
    %2 = vector.load %arg2[%c0_2, %c0_3] : memref<16x4xf32, #tpu.memory_space<vmem>>, vector<16x4xf32>
    %cst = arith.constant dense<0.000000e+00> : vector<342x4xf32>
    %3 = tpu.matmul %1, %2, %cst {dimension_numbers = #tpu.dot_dimension_numbers<[1], [0], [0], [1], [0, 0, 1, 1], [], []>} : vector<342x16xf32>, vector<16x4xf32>, vector<342x4xf32> -> vector<342x4xf32>
    %cst_4 = arith.constant 0.000000e+00 : f32
    %4 = vector.broadcast %cst_4 : f32 to vector<288x4xf32>
    %5 = vector.extract_strided_slice %3 {offsets = [0, 0], sizes = [288, 4], strides = [1, 1]} : vector<342x4xf32> to vector<288x4xf32>
    %c0_5 = arith.constant 0 : index
    %c0_6 = arith.constant 0 : index
    %c0_7 = arith.constant 0 : index
    %6 = vector.load %arg3[%c0_5, %c0_6, %c0_7] : memref<9x4x4xf32, #tpu.memory_space<vmem>>, vector<1x4x4xf32>
    %7 = vector.shape_cast %6 : vector<1x4x4xf32> to vector<4x4xf32>
    %cst_8 = arith.constant dense<0.000000e+00> : vector<288x4xf32>
    %8 = tpu.matmul %5, %7, %cst_8 {dimension_numbers = #tpu.dot_dimension_numbers<[1], [0], [0], [1], [0, 0, 1, 1], [], []>} : vector<288x4xf32>, vector<4x4xf32>, vector<288x4xf32> -> vector<288x4xf32>
    %9 = arith.addf %4, %8 : vector<288x4xf32>
    %10 = vector.extract_strided_slice %3 {offsets = [1, 0], sizes = [288, 4], strides = [1, 1]} : vector<342x4xf32> to vector<288x4xf32>
    %c1 = arith.constant 1 : index
    %c0_9 = arith.constant 0 : index
    %c0_10 = arith.constant 0 : index
    %11 = vector.load %arg3[%c1, %c0_9, %c0_10] : memref<9x4x4xf32, #tpu.memory_space<vmem>>, vector<1x4x4xf32>
    %12 = vector.shape_cast %11 : vector<1x4x4xf32> to vector<4x4xf32>
    %cst_11 = arith.constant dense<0.000000e+00> : vector<288x4xf32>
    %13 = tpu.matmul %10, %12, %cst_11 {dimension_numbers = #tpu.dot_dimension_numbers<[1], [0], [0], [1], [0, 0, 1, 1], [], []>} : vector<288x4xf32>, vector<4x4xf32>, vector<288x4xf32> -> vector<288x4xf32>
    %14 = arith.addf %9, %13 : vector<288x4xf32>
    %15 = vector.extract_strided_slice %3 {offsets = [2, 0], sizes = [288, 4], strides = [1, 1]} : vector<342x4xf32> to vector<288x4xf32>
    %c2 = arith.constant 2 : index
    %c0_12 = arith.constant 0 : index
    %c0_13 = arith.constant 0 : index
    %16 = vector.load %arg3[%c2, %c0_12, %c0_13] : memref<9x4x4xf32, #tpu.memory_space<vmem>>, vector<1x4x4xf32>
    %17 = vector.shape_cast %16 : vector<1x4x4xf32> to vector<4x4xf32>
    %cst_14 = arith.constant dense<0.000000e+00> : vector<288x4xf32>
    %18 = tpu.matmul %15, %17, %cst_14 {dimension_numbers = #tpu.dot_dimension_numbers<[1], [0], [0], [1], [0, 0, 1, 1], [], []>} : vector<288x4xf32>, vector<4x4xf32>, vector<288x4xf32> -> vector<288x4xf32>
    %19 = arith.addf %14, %18 : vector<288x4xf32>
    %20 = vector.extract_strided_slice %3 {offsets = [18, 0], sizes = [288, 4], strides = [1, 1]} : vector<342x4xf32> to vector<288x4xf32>
    %c3 = arith.constant 3 : index
    %c0_15 = arith.constant 0 : index
    %c0_16 = arith.constant 0 : index
    %21 = vector.load %arg3[%c3, %c0_15, %c0_16] : memref<9x4x4xf32, #tpu.memory_space<vmem>>, vector<1x4x4xf32>
    %22 = vector.shape_cast %21 : vector<1x4x4xf32> to vector<4x4xf32>
    %cst_17 = arith.constant dense<0.000000e+00> : vector<288x4xf32>
    %23 = tpu.matmul %20, %22, %cst_17 {dimension_numbers = #tpu.dot_dimension_numbers<[1], [0], [0], [1], [0, 0, 1, 1], [], []>} : vector<288x4xf32>, vector<4x4xf32>, vector<288x4xf32> -> vector<288x4xf32>
    %24 = arith.addf %19, %23 : vector<288x4xf32>
    %25 = vector.extract_strided_slice %3 {offsets = [19, 0], sizes = [288, 4], strides = [1, 1]} : vector<342x4xf32> to vector<288x4xf32>
    %c4 = arith.constant 4 : index
    %c0_18 = arith.constant 0 : index
    %c0_19 = arith.constant 0 : index
    %26 = vector.load %arg3[%c4, %c0_18, %c0_19] : memref<9x4x4xf32, #tpu.memory_space<vmem>>, vector<1x4x4xf32>
    %27 = vector.shape_cast %26 : vector<1x4x4xf32> to vector<4x4xf32>
    %cst_20 = arith.constant dense<0.000000e+00> : vector<288x4xf32>
    %28 = tpu.matmul %25, %27, %cst_20 {dimension_numbers = #tpu.dot_dimension_numbers<[1], [0], [0], [1], [0, 0, 1, 1], [], []>} : vector<288x4xf32>, vector<4x4xf32>, vector<288x4xf32> -> vector<288x4xf32>
    %29 = arith.addf %24, %28 : vector<288x4xf32>
    %30 = vector.extract_strided_slice %3 {offsets = [20, 0], sizes = [288, 4], strides = [1, 1]} : vector<342x4xf32> to vector<288x4xf32>
    %c5 = arith.constant 5 : index
    %c0_21 = arith.constant 0 : index
    %c0_22 = arith.constant 0 : index
    %31 = vector.load %arg3[%c5, %c0_21, %c0_22] : memref<9x4x4xf32, #tpu.memory_space<vmem>>, vector<1x4x4xf32>
    %32 = vector.shape_cast %31 : vector<1x4x4xf32> to vector<4x4xf32>
    %cst_23 = arith.constant dense<0.000000e+00> : vector<288x4xf32>
    %33 = tpu.matmul %30, %32, %cst_23 {dimension_numbers = #tpu.dot_dimension_numbers<[1], [0], [0], [1], [0, 0, 1, 1], [], []>} : vector<288x4xf32>, vector<4x4xf32>, vector<288x4xf32> -> vector<288x4xf32>
    %34 = arith.addf %29, %33 : vector<288x4xf32>
    %35 = vector.extract_strided_slice %3 {offsets = [36, 0], sizes = [288, 4], strides = [1, 1]} : vector<342x4xf32> to vector<288x4xf32>
    %c6 = arith.constant 6 : index
    %c0_24 = arith.constant 0 : index
    %c0_25 = arith.constant 0 : index
    %36 = vector.load %arg3[%c6, %c0_24, %c0_25] : memref<9x4x4xf32, #tpu.memory_space<vmem>>, vector<1x4x4xf32>
    %37 = vector.shape_cast %36 : vector<1x4x4xf32> to vector<4x4xf32>
    %cst_26 = arith.constant dense<0.000000e+00> : vector<288x4xf32>
    %38 = tpu.matmul %35, %37, %cst_26 {dimension_numbers = #tpu.dot_dimension_numbers<[1], [0], [0], [1], [0, 0, 1, 1], [], []>} : vector<288x4xf32>, vector<4x4xf32>, vector<288x4xf32> -> vector<288x4xf32>
    %39 = arith.addf %34, %38 : vector<288x4xf32>
    %40 = vector.extract_strided_slice %3 {offsets = [37, 0], sizes = [288, 4], strides = [1, 1]} : vector<342x4xf32> to vector<288x4xf32>
    %c7 = arith.constant 7 : index
    %c0_27 = arith.constant 0 : index
    %c0_28 = arith.constant 0 : index
    %41 = vector.load %arg3[%c7, %c0_27, %c0_28] : memref<9x4x4xf32, #tpu.memory_space<vmem>>, vector<1x4x4xf32>
    %42 = vector.shape_cast %41 : vector<1x4x4xf32> to vector<4x4xf32>
    %cst_29 = arith.constant dense<0.000000e+00> : vector<288x4xf32>
    %43 = tpu.matmul %40, %42, %cst_29 {dimension_numbers = #tpu.dot_dimension_numbers<[1], [0], [0], [1], [0, 0, 1, 1], [], []>} : vector<288x4xf32>, vector<4x4xf32>, vector<288x4xf32> -> vector<288x4xf32>
    %44 = arith.addf %39, %43 : vector<288x4xf32>
    %45 = vector.extract_strided_slice %3 {offsets = [38, 0], sizes = [288, 4], strides = [1, 1]} : vector<342x4xf32> to vector<288x4xf32>
    %c8 = arith.constant 8 : index
    %c0_30 = arith.constant 0 : index
    %c0_31 = arith.constant 0 : index
    %46 = vector.load %arg3[%c8, %c0_30, %c0_31] : memref<9x4x4xf32, #tpu.memory_space<vmem>>, vector<1x4x4xf32>
    %47 = vector.shape_cast %46 : vector<1x4x4xf32> to vector<4x4xf32>
    %cst_32 = arith.constant dense<0.000000e+00> : vector<288x4xf32>
    %48 = tpu.matmul %45, %47, %cst_32 {dimension_numbers = #tpu.dot_dimension_numbers<[1], [0], [0], [1], [0, 0, 1, 1], [], []>} : vector<288x4xf32>, vector<4x4xf32>, vector<288x4xf32> -> vector<288x4xf32>
    %49 = arith.addf %44, %48 : vector<288x4xf32>
    %c0_33 = arith.constant 0 : index
    %c0_34 = arith.constant 0 : index
    %50 = vector.load %arg4[%c0_33, %c0_34] : memref<4x16xf32, #tpu.memory_space<vmem>>, vector<4x16xf32>
    %cst_35 = arith.constant dense<0.000000e+00> : vector<288x16xf32>
    %51 = tpu.matmul %49, %50, %cst_35 {dimension_numbers = #tpu.dot_dimension_numbers<[1], [0], [0], [1], [0, 0, 1, 1], [], []>} : vector<288x4xf32>, vector<4x16xf32>, vector<288x16xf32> -> vector<288x16xf32>
    %52 = vector.extract_strided_slice %1 {offsets = [19, 0], sizes = [288, 16], strides = [1, 1]} : vector<342x16xf32> to vector<288x16xf32>
    %53 = arith.addf %51, %52 : vector<288x16xf32>
    %cst_36 = arith.constant 0.000000e+00 : f32
    %54 = vector.broadcast %cst_36 : f32 to vector<288x16xf32>
    %55 = arith.maximumf %53, %54 : vector<288x16xf32>
    %c0_37 = arith.constant 0 : index
    %c0_38 = arith.constant 0 : index
    %c0_39 = arith.constant 0 : index
    %56 = vector.load %arg5[%c0_37, %c0_38, %c0_39] : memref<1x288x16xf32, #tpu.memory_space<vmem>>, vector<1x288x16xf32>
    %57 = vector.shape_cast %56 : vector<1x288x16xf32> to vector<288x16xf32>
    %58 = vector.shape_cast %55 : vector<288x16xf32> to vector<1x288x16xf32>
    tpu.vector_store %arg5[%c0_37, %c0_38, %c0_39], %58 {strides = array<i32>} : memref<1x288x16xf32, #tpu.memory_space<vmem>>, vector<1x288x16xf32>,
    return
  }
  func.func @transform_0(%arg0: i32) -> (i32, i32, i32) {
    %c0_i32 = arith.constant 0 : i32
    %c0_i32_0 = arith.constant 0 : i32
    %c0_i32_1 = arith.constant 0 : i32
    return %arg0, %c0_i32, %c0_i32_0 : i32, i32, i32
  }
  func.func @transform_1(%arg0: i32) -> (i32, i32) {
    %c0_i32 = arith.constant 0 : i32
    %c0_i32_0 = arith.constant 0 : i32
    %c0_i32_1 = arith.constant 0 : i32
    return %c0_i32, %c0_i32_0 : i32, i32
  }
  func.func @transform_2(%arg0: i32) -> (i32, i32, i32) {
    %c0_i32 = arith.constant 0 : i32
    %c0_i32_0 = arith.constant 0 : i32
    %c0_i32_1 = arith.constant 0 : i32
    %c0_i32_2 = arith.constant 0 : i32
    return %c0_i32, %c0_i32_0, %c0_i32_1 : i32, i32, i32
  }
  func.func @transform_3(%arg0: i32) -> (i32, i32) {
    %c0_i32 = arith.constant 0 : i32
    %c0_i32_0 = arith.constant 0 : i32
    %c0_i32_1 = arith.constant 0 : i32
    return %c0_i32, %c0_i32_0 : i32, i32
  }
  func.func @transform_4(%arg0: i32) -> (i32, i32, i32) {
    %c0_i32 = arith.constant 0 : i32
    %c0_i32_0 = arith.constant 0 : i32
    %c0_i32_1 = arith.constant 0 : i32
    return %arg0, %c0_i32, %c0_i32_0 : i32, i32, i32
  }
}

</mosaic_0001>

<bundles_post_ra>
// kernel: bottleneck_forward.1
= control target key start
LH: loop header
LB: loop body
LE: loop exit
PB: predicated region body
PF: predicated region fallthrough
CT: control target
= control target key end

     0   :  { %s6377_s15 = smov 0   ;;  %s8927_s0 = inlined_call_operand.vmem [shape: f32[2,342,16], index: 0, kind: input, shape index: {}]   ;;  %s8928_s1 = inlined_call_operand.vmem [shape: f32[16,4], index: 1, kind: input, shape index: {}]   ;;  %s8929_s2 = inlined_call_operand.vmem [shape: f32[9,4,4], index: 2, kind: input, shape index: {}]   ;;  %s8930_s3 = inlined_call_operand.vmem [shape: f32[4,16], index: 3, kind: input, shape index: {}]   ;;  %s8931_s4 = inlined_call_operand.vmem [shape: f32[2,288,16], index: 4, kind: output, shape index: {}]  }
   0x1 LB: > { %s4751_s16 = sadd.s32 4294967295, %s6348_s15   ;;  %p4755_p0 = scmp.ge.s32.totalorder %s6348_s15, 1  ;;  %s6348_s15 = sphi %s6377_s15, %s14_s15  }
   0x2   : > { %p162_p1 = scmp.lt.s32.totalorder %s6348_s15, 3 }
   0x4   : > { %p163_p2 = pnand %p4755_p0, %p162_p1 }
   0x6   : > { %166 = sbr.rel (%p163_p2) target bundleno = 1116 (0x45c), region = 36 }
   0xb   : > { %v242_v0 = vld [vmem:[%s8928_s1 + $0x8] sm:$0xff]  ;;  %p188_p3 = scmp.lt.s32.totalorder %s4751_s16, 1  ;;  %v6350_v1 = vmov 0.0   ;;  %v241_v2 = vld [vmem:[%s8928_s1] sm:$0xff]  ;;  %vm6351_vm0 = vmmov 0   ;;  %vm243_vm1 = vcmask 130048  }
   0xc   : > { %5596 = vmatprep.subr.mxu0 %v6350_v1  ;;  %5600 = vmatprep.mubr.msk.f32.mxu0 %vm6351_vm0, %v6350_v1  ;;  %v4801_v26 = vld [vmem:[%s8929_s2 + $0x4] sm:$0xf]  ;;  %vm838_vm2 = vcmask 1043456   ;;  %v4914_v29 = vld [vmem:[%s8929_s2 + $0xc] sm:$0xf]  ;;  %vm691_vm3 = vcmask 1046528  }
   0xd   : > { %5597 = vmatpush3.msra.mxu0 %v242_v0  ;;  %s9400_s16 = smov (!%p188_p3, %s4751_s16), 1  ;;  %6289 = vmatprep.subr.mxu1 %v6350_v1  ;;  %v651_v45 = vld [vmem:[%s8929_s2] sm:$0xf]  ;;  %vm765_vm4 = vcmask 31744   ;;  %vm1409_vm5 = vcmask 1045504   ;;  %vm2137_vm6 = vcmask 1044480  }
   0xe   : > { %5598 = vmatprep.subr.mxu0 %v6350_v1  ;;  %6291 = vmatpush3.msra.mxu1 %v242_v0  ;;  %s6293_s21 = smul.u32 344, %s9400_s16  ;;  %vm3296_vm7 = vcmask 1042432   ;;  %vm3728_vm8 = vcmask 1041408  }
   0xf   : > { %5599 = vmatpush3.msra.mxu0 %v241_v2  ;;  %6290 = vmatprep.subr.mxu1 %v6350_v1 }
  0x10   : > { %6292 = vmatpush3.msra.mxu1 %v241_v2  ;;  %5720 = vmatprep.mubr.msk.f32.mxu1 %vm6351_vm0, %v6350_v1  ;;  %s6405_s24 = scalar_lea.vmem %s8927_s0, %s6293_s21  ;;  %s6294_s21 = smul.u32 288, %s9400_s16 }
  0x11   : > { %v198_v3 = vld [vmem:[%s6405_s24] sm:$0xff]  ;;  %v199_v4 = vld [vmem:[%s6405_s24 + $0x8] sm:$0xff]  ;;  %v200_v5 = vld [vmem:[%s6405_s24 + $0x10] sm:$0xff]  ;;  %5729 = vmatprep.subr.msk.mxu1 %vm838_vm2, %v4801_v26  ;;  %5897 = vmatprep.subr.msk.mxu0 %vm838_vm2, %v4914_v29 }
  0x12   : > { %5601 = vmatmul.mubr.msk.f32.vlgmr.msra.gmra.mxu0 %vm243_vm1, %v198_v3  ;;  %v201_v6 = vld [vmem:[%s6405_s24 + $0x18] sm:$0xff]  ;;  %v202_v7 = vld [vmem:[%s6405_s24 + $0x20] sm:$0xff]  ;;  %v203_v8 = vld [vmem:[%s6405_s24 + $0x28] sm:$0xff]  ;;  %s8806_s25 = scalar_lea.vmem %s8931_s4, %s6294_s21 }
  0x13   : > { %5603 = vmatprep.mubr.msk.f32.mxu0 %vm6351_vm0, %v6350_v1  ;;  %v204_v9 = vld [vmem:[%s6405_s24 + $0x30] sm:$0xff]  ;;  %v238_v10 = vld [vmem:[%s6405_s24 + $0x140] sm:$0xff]  ;;  %v205_v11 = vld [vmem:[%s6405_s24 + $0x38] sm:$0xff]  ;;  %5898 = vmatpush3.msk.msra.mxu0 %vm838_vm2, %v4914_v29 }
  0x14   : > { %5721 = vmatmul.mubr.msk.f32.vlgmr.msra.gmra.mxu1 %vm243_vm1, %v238_v10  ;;  %v206_v12 = vld [vmem:[%s6405_s24 + $0x40] sm:$0xff]  ;;  %v207_v13 = vld [vmem:[%s6405_s24 + $0x48] sm:$0xff]  ;;  %v208_v14 = vld [vmem:[%s6405_s24 + $0x50] sm:$0xff] }
  0x15   : > { %5723 = vmatprep.mubr.msk.f32.mxu1 %vm6351_vm0, %v6350_v1  ;;  %v209_v15 = vld [vmem:[%s6405_s24 + $0x58] sm:$0xff]  ;;  %v210_v16 = vld [vmem:[%s6405_s24 + $0x60] sm:$0xff]  ;;  %v211_v17 = vld [vmem:[%s6405_s24 + $0x68] sm:$0xff]  ;;  %5730 = vmatpush3.msk.msra.mxu1 %vm838_vm2, %v4801_v26 }
  0x16   : > { %5604 = vmatmul.mubr.msk.f32.gmra.mxu0 %vm243_vm1, %v199_v4  ;;  %v212_v18 = vld [vmem:[%s6405_s24 + $0x70] sm:$0xff]  ;;  %v213_v19 = vld [vmem:[%s6405_s24 + $0x78] sm:$0xff]  ;;  %v214_v20 = vld [vmem:[%s6405_s24 + $0x80] sm:$0xff]  ;;  %5785 = vmatprep.subr.msk.mxu1 %vm838_vm2, %v651_v45 }
  0x17   : > { %5606 = vmatprep.mubr.msk.f32.mxu0 %vm6351_vm0, %v6350_v1  ;;  %v215_v21 = vld [vmem:[%s6405_s24 + $0x88] sm:$0xff]  ;;  %v216_v23 = vld [vmem:[%s6405_s24 + $0x90] sm:$0xff]  ;;  %v217_v25 = vld [vmem:[%s6405_s24 + $0x98] sm:$0xff] }
  0x18   : > { %v239_v22 = vld [vmem:[%s6405_s24 + $0x148] sm:$0xff]  ;;  %v240_v24 = vld [vmem:[%s6405_s24 + $0x150] sm:$0x3f]  ;;  %v218_v27 = vld [vmem:[%s6405_s24 + $0xa0] sm:$0xff] }
  0x19   : > { %5724 = vmatmul.mubr.msk.f32.gmra.mxu1 %vm243_vm1, %v239_v22  ;;  %v219_v28 = vld [vmem:[%s6405_s24 + $0xa8] sm:$0xff]  ;;  %v220_v30 = vld [vmem:[%s6405_s24 + $0xb0] sm:$0xff]  ;;  %v221_v31 = vld [vmem:[%s6405_s24 + $0xb8] sm:$0xff] }
  0x1a   : > { %5607 = vmatmul.mubr.msk.f32.gmra.mxu0 %vm243_vm1, %v200_v5  ;;  %5726 = vmatprep.mubr.msk.f32.mxu1 %vm6351_vm0, %v6350_v1  ;;  %v222_v32 = vld [vmem:[%s6405_s24 + $0xc0] sm:$0xff]  ;;  %v223_v33 = vld [vmem:[%s6405_s24 + $0xc8] sm:$0xff]  ;;  %v224_v34 = vld [vmem:[%s6405_s24 + $0xd0] sm:$0xff] }
  0x1b   : > { %5609 = vmatprep.mubr.msk.f32.mxu0 %vm6351_vm0, %v6350_v1  ;;  %v225_v35 = vld [vmem:[%s6405_s24 + $0xd8] sm:$0xff]  ;;  %v226_v36 = vld [vmem:[%s6405_s24 + $0xe0] sm:$0xff]  ;;  %v227_v37 = vld [vmem:[%s6405_s24 + $0xe8] sm:$0xff] }
  0x1c   : > { %v228_v38 = vld [vmem:[%s6405_s24 + $0xf0] sm:$0xff]  ;;  %v229_v39 = vld [vmem:[%s6405_s24 + $0xf8] sm:$0xff]  ;;  %v230_v40 = vld [vmem:[%s6405_s24 + $0x100] sm:$0xff] }
  0x1d   : > { %5727 = vmatmul.mubr.msk.f32.gmra.mxu1 %vm243_vm1, %v240_v24  ;;  %v231_v41 = vld [vmem:[%s6405_s24 + $0x108] sm:$0xff]  ;;  %v232_v42 = vld [vmem:[%s6405_s24 + $0x110] sm:$0xff]  ;;  %v233_v43 = vld [vmem:[%s6405_s24 + $0x118] sm:$0xff] }
  0x1e   : > { %5610 = vmatmul.mubr.msk.f32.gmra.mxu0 %vm243_vm1, %v201_v6  ;;  %v234_v44 = vld [vmem:[%s6405_s24 + $0x120] sm:$0xff]  ;;  %v235_v46 = vld [vmem:[%s6405_s24 + $0x128] sm:$0xff]  ;;  %v236_v47 = vld [vmem:[%s6405_s24 + $0x130] sm:$0xff] }
  0x1f   : > { %5612 = vmatprep.mubr.msk.f32.mxu0 %vm6351_vm0, %v6350_v1  ;;  %v237_v48 = vld [vmem:[%s6405_s24 + $0x138] sm:$0xff] }
  0x22   : > { %5613 = vmatmul.mubr.msk.f32.gmra.mxu0 %vm243_vm1, %v202_v7 }
  0x23   : > { %5615 = vmatprep.mubr.msk.f32.mxu0 %vm6351_vm0, %v6350_v1 }
  0x26   : > { %5616 = vmatmul.mubr.msk.f32.gmra.mxu0 %vm243_vm1, %v203_v8 }
  0x27   : > { %5618 = vmatprep.mubr.msk.f32.mxu0 %vm6351_vm0, %v6350_v1 }
  0x2a   : > { %5619 = vmatmul.mubr.msk.f32.gmra.mxu0 %vm243_vm1, %v204_v9 }
  0x2b   : > { %5621 = vmatprep.mubr.msk.f32.mxu0 %vm6351_vm0, %v6350_v1 }
  0x2e   : > { %5622 = vmatmul.mubr.msk.f32.gmra.mxu0 %vm243_vm1, %v205_v11 }
  0x2f   : > { %5624 = vmatprep.mubr.msk.f32.mxu0 %vm6351_vm0, %v6350_v1 }
  0x32   : > { %5625 = vmatmul.mubr.msk.f32.gmra.mxu0 %vm243_vm1, %v206_v12 }
  0x33   : > { %5627 = vmatprep.mubr.msk.f32.mxu0 %vm6351_vm0, %v6350_v1 }
  0x36   : > { %5628 = vmatmul.mubr.msk.f32.gmra.mxu0 %vm243_vm1, %v207_v13  ;;  %v6635_v13 = vld [vmem:[%s8929_s2 + $0x8] sm:$0xf] }
  0x37   : > { %5630 = vmatprep.mubr.msk.f32.mxu0 %vm6351_vm0, %v6350_v1 }
  0x3a   : > { %5631 = vmatmul.mubr.msk.f32.gmra.mxu0 %vm243_vm1, %v208_v14 }
  0x3b   : > { %5633 = vmatprep.mubr.msk.f32.mxu0 %vm6351_vm0, %v6350_v1 }
  0x3e   : > { %5634 = vmatmul.mubr.msk.f32.gmra.mxu0 %vm243_vm1, %v209_v15 }
  0x3f   : > { %5636 = vmatprep.mubr.msk.f32.mxu0 %vm6351_vm0, %v6350_v1 }
  0x42   : > { %5637 = vmatmul.mubr.msk.f32.gmra.mxu0 %vm243_vm1, %v210_v16 }
  0x43   : > { %5639 = vmatprep.mubr.msk.f32.mxu0 %vm6351_vm0, %v6350_v1 }
  0x46   : > { %5640 = vmatmul.mubr.msk.f32.gmra.mxu0 %vm243_vm1, %v211_v17 }
  0x47   : > { %5642 = vmatprep.mubr.msk.f32.mxu0 %vm6351_vm0, %v6350_v1 }
  0x4a   : > { %5643 = vmatmul.mubr.msk.f32.gmra.mxu0 %vm243_vm1, %v212_v18 }
  0x4b   : > { %5645 = vmatprep.mubr.msk.f32.mxu0 %vm6351_vm0, %v6350_v1 }
  0x4e   : > { %5646 = vmatmul.mubr.msk.f32.gmra.mxu0 %vm243_vm1, %v213_v19 }
  0x4f   : > { %5648 = vmatprep.mubr.msk.f32.mxu0 %vm6351_vm0, %v6350_v1 }
  0x52   : > { %5649 = vmatmul.mubr.msk.f32.gmra.mxu0 %vm243_vm1, %v214_v20 }
  0x53   : > { %5651 = vmatprep.mubr.msk.f32.mxu0 %vm6351_vm0, %v6350_v1 }
  0x56   : > { %5652 = vmatmul.mubr.msk.f32.gmra.mxu0 %vm243_vm1, %v215_v21 }
  0x57   : > { %5654 = vmatprep.mubr.msk.f32.mxu0 %vm6351_vm0, %v6350_v1 }
  0x5a   : > { %5655 = vmatmul.mubr.msk.f32.gmra.mxu0 %vm243_vm1, %v216_v23 }
  0x5b   : > { %5657 = vmatprep.mubr.msk.f32.mxu0 %vm6351_vm0, %v6350_v1 }
  0x5e   : > { %5658 = vmatmul.mubr.msk.f32.gmra.mxu0 %vm243_vm1, %v217_v25  ;;  %v4990_v25 = vld [vmem:[%s8929_s2 + $0x14] sm:$0xf] }
  0x5f   : > { %5660 = vmatprep.mubr.msk.f32.mxu0 %vm6351_vm0, %v6350_v1  ;;  %6009 = vmatprep.subr.msk.mxu0 %vm838_vm2, %v4990_v25 }
  0x62   : > { %5661 = vmatmul.mubr.msk.f32.gmra.mxu0 %vm243_vm1, %v218_v27 }
  0x63   : > { %5663 = vmatprep.mubr.msk.f32.mxu0 %vm6351_vm0, %v6350_v1 }
  0x66   : > { %5664 = vmatmul.mubr.msk.f32.gmra.mxu0 %vm243_vm1, %v219_v28 }
  0x67   : > { %5666 = vmatprep.mubr.msk.f32.mxu0 %vm6351_vm0, %v6350_v1 }
  0x6a   : > { %5667 = vmatmul.mubr.msk.f32.gmra.mxu0 %vm243_vm1, %v220_v30 }
  0x6b   : > { %5669 = vmatprep.mubr.msk.f32.mxu0 %vm6351_vm0, %v6350_v1 }
  0x6e   : > { %5670 = vmatmul.mubr.msk.f32.gmra.mxu0 %vm243_vm1, %v221_v31 }
  0x6f   : > { %5672 = vmatprep.mubr.msk.f32.mxu0 %vm6351_vm0, %v6350_v1 }
  0x72   : > { %5673 = vmatmul.mubr.msk.f32.gmra.mxu0 %vm243_vm1, %v222_v32 }
  0x73   : > { %5675 = vmatprep.mubr.msk.f32.mxu0 %vm6351_vm0, %v6350_v1 }
  0x76   : > { %5676 = vmatmul.mubr.msk.f32.gmra.mxu0 %vm243_vm1, %v223_v33 }
  0x77   : > { %5678 = vmatprep.mubr.msk.f32.mxu0 %vm6351_vm0, %v6350_v1 }
  0x7a   : > { %5679 = vmatmul.mubr.msk.f32.gmra.mxu0 %vm243_vm1, %v224_v34 }
  0x7b   : > { %5681 = vmatprep.mubr.msk.f32.mxu0 %vm6351_vm0, %v6350_v1 }
  0x7e   : > { %5682 = vmatmul.mubr.msk.f32.gmra.mxu0 %vm243_vm1, %v225_v35 }
  0x7f   : > { %5684 = vmatprep.mubr.msk.f32.mxu0 %vm6351_vm0, %v6350_v1 }
  0x82   : > { %5685 = vmatmul.mubr.msk.f32.gmra.mxu0 %vm243_vm1, %v226_v36 }
  0x83   : > { %5687 = vmatprep.mubr.msk.f32.mxu0 %vm6351_vm0, %v6350_v1 }
  0x86   : > { %5688 = vmatmul.mubr.msk.f32.gmra.mxu0 %vm243_vm1, %v227_v37 }
  0x87   : > { %5690 = vmatprep.mubr.msk.f32.mxu0 %vm6351_vm0, %v6350_v1 }
  0x8a   : > { %5691 = vmatmul.mubr.msk.f32.gmra.mxu0 %vm243_vm1, %v228_v38 }
  0x8b   : > { %5693 = vmatprep.mubr.msk.f32.mxu0 %vm6351_vm0, %v6350_v1 }
  0x8e   : > { %5694 = vmatmul.mubr.msk.f32.gmra.mxu0 %vm243_vm1, %v229_v39 }
  0x8f   : > { %5696 = vmatprep.mubr.msk.f32.mxu0 %vm6351_vm0, %v6350_v1 }
  0x92   : > { %5697 = vmatmul.mubr.msk.f32.gmra.mxu0 %vm243_vm1, %v230_v40 }
  0x93   : > { %5699 = vmatprep.mubr.msk.f32.mxu0 %vm6351_vm0, %v6350_v1 }
  0x96   : > { %5700 = vmatmul.mubr.msk.f32.gmra.mxu0 %vm243_vm1, %v231_v41 }
  0x97   : > { %5702 = vmatprep.mubr.msk.f32.mxu0 %vm6351_vm0, %v6350_v1 }
  0x9a   : > { %5703 = vmatmul.mubr.msk.f32.gmra.mxu0 %vm243_vm1, %v232_v42 }
  0x9b   : > { %5705 = vmatprep.mubr.msk.f32.mxu0 %vm6351_vm0, %v6350_v1 }
  0x9e   : > { %5706 = vmatmul.mubr.msk.f32.gmra.mxu0 %vm243_vm1, %v233_v43 }
  0x9f   : > { %5708 = vmatprep.mubr.msk.f32.mxu0 %vm6351_vm0, %v6350_v1 }
  0xa2   : > { %5709 = vmatmul.mubr.msk.f32.gmra.mxu0 %vm243_vm1, %v234_v44 }
  0xa3   : > { %5711 = vmatprep.mubr.msk.f32.mxu0 %vm6351_vm0, %v6350_v1 }
  0xa6   : > { %5712 = vmatmul.mubr.msk.f32.gmra.mxu0 %vm243_vm1, %v235_v46 }
  0xa7   : > { %5714 = vmatprep.mubr.msk.f32.mxu0 %vm6351_vm0, %v6350_v1 }
  0xaa   : > { %5715 = vmatmul.mubr.msk.f32.gmra.mxu0 %vm243_vm1, %v236_v47 }
  0xab   : > { %5717 = vmatprep.mubr.msk.f32.mxu0 %vm6351_vm0, %v6350_v1 }
  0xae   : > { %5718 = vmatmul.mubr.msk.f32.gmra.mxu0 %vm243_vm1, %v237_v48 }
  0xd2   : > { %v6589_v49 = vpop.f32.mrf.mxu0 }
  0xd3   : > { %v692_v52 = vrot.slane %v6589_v49, 1 }
  0xd4   : > { %v5602_v50 = vpop.f32.mrf.mxu0 }
  0xd6   : > { %v6591_v51 = vpop.f32.mrf.mxu0 }
  0xd7   : > { %v693_v53 = vrot.slane %v6591_v51, 1 }
  0xd8   : > { %v5605_v54 = vpop.f32.mrf.mxu0 }
  0xd9   : > { %v694_v55 = vsel %vm691_vm3, %v692_v52, %v693_v53 }
  0xda   : > { %v6596_v56 = vpop.f32.mrf.mxu0  ;;  %5731 = vmatprep.mubr.msk.f32.mxu1 %vm765_vm4, %v694_v55 }
  0xdb   : > { %v695_v57 = vrot.slane %v6596_v56, 1  ;;  %v8932_v62 = vrot.slane %v6596_v56, 2 }
  0xdc   : > { %v5608_v58 = vpop.f32.mrf.mxu0 }
  0xdd   : > { %v696_v59 = vsel %vm691_vm3, %v693_v53, %v695_v57 }
  0xde   : > { %v6601_v60 = vpop.f32.mrf.mxu0  ;;  %5732 = vmatmul.mubr.msk.f32.vlgmr.msra.gmra.mxu1 %vm765_vm4, %v696_v59 }
  0xdf   : > { %9016 = vst [vmem:[#allocation2_spill] sm:$0xff] %v6601_v60  ;;  %v697_v61 = vrot.slane %v6601_v60, 1  ;;  %v1415_v63 = vrot.slane %v6601_v60, 2  ;;  %5786 = vmatpush3.msk.msra.mxu1 %vm838_vm2, %v651_v45 }
  0xe0   : > { %v5611_v0 = vpop.f32.mrf.mxu0  ;;  %5841 = vmatprep.subr.msk.mxu1 %vm838_vm2, %v6635_v13 }
  0xe1   : > { %v698_v1 = vsel %vm691_vm3, %v695_v57, %v697_v61  ;;  %v6612_v2 = vsel %vm1409_vm5, %v8932_v62, %v1415_v63 }
  0xe2   : > { %v6614_v3 = vpop.f32.mrf.mxu0  ;;  %5734 = vmatprep.mubr.msk.f32.mxu1 %vm765_vm4, %v698_v1  ;;  %5899 = vmatprep.mubr.msk.f32.mxu0 %vm765_vm4, %v6612_v2 }
  0xe3   : > { %v699_v4 = vrot.slane %v6614_v3, 1  ;;  %v1417_v5 = vrot.slane %v6614_v3, 2 }
  0xe4   : > { %v5614_v6 = vpop.f32.mrf.mxu0 }
  0xe5   : > { %v700_v7 = vsel %vm691_vm3, %v697_v61, %v699_v4  ;;  %v6623_v8 = vsel %vm1409_vm5, %v1415_v63, %v1417_v5 }
  0xe6   : > { %v6625_v9 = vpop.f32.mrf.mxu0  ;;  %5735 = vmatmul.mubr.msk.f32.gmra.mxu1 %vm765_vm4, %v700_v7  ;;  %5900 = vmatmul.mubr.msk.f32.vlgmr.msra.gmra.mxu0 %vm765_vm4, %v6623_v8 }
  0xe7   : > { %v701_v10 = vrot.slane %v6625_v9, 1  ;;  %v1419_v11 = vrot.slane %v6625_v9, 2  ;;  %6010 = vmatpush3.msk.msra.mxu0 %vm838_vm2, %v4990_v25 }
  0xe8   : > { %v5617_v12 = vpop.f32.mrf.mxu0 }
  0xe9   : > { %v702_v14 = vsel %vm691_vm3, %v699_v4, %v701_v10  ;;  %v6639_v15 = vsel %vm1409_vm5, %v1417_v5, %v1419_v11 }
  0xea   : > { %v6643_v16 = vpop.f32.mrf.mxu0  ;;  %5737 = vmatprep.mubr.msk.f32.mxu1 %vm765_vm4, %v702_v14  ;;  %5902 = vmatprep.mubr.msk.f32.mxu0 %vm765_vm4, %v6639_v15 }
  0xeb   : > { %v703_v17 = vrot.slane %v6643_v16, 1  ;;  %v1421_v18 = vrot.slane %v6643_v16, 2 }
  0xec   : > { %v5620_v19 = vpop.f32.mrf.mxu0 }
  0xed   : > { %v704_v20 = vsel %vm691_vm3, %v701_v10, %v703_v17  ;;  %v6652_v21 = vsel %vm1409_vm5, %v1419_v11, %v1421_v18 }
  0xee   : > { %v6654_v22 = vpop.f32.mrf.mxu0  ;;  %5738 = vmatmul.mubr.msk.f32.gmra.mxu1 %vm765_vm4, %v704_v20  ;;  %5903 = vmatmul.mubr.msk.f32.gmra.mxu0 %vm765_vm4, %v6652_v21 }
  0xef   : > { %v705_v23 = vrot.slane %v6654_v22, 1  ;;  %v1423_v24 = vrot.slane %v6654_v22, 2 }
  0xf0   : > { %v5623_v26 = vpop.f32.mrf.mxu0 }
  0xf1   : > { %v706_v27 = vsel %vm691_vm3, %v703_v17, %v705_v23  ;;  %v6667_v28 = vsel %vm1409_vm5, %v1421_v18, %v1423_v24 }
  0xf2   : > { %v6670_v29 = vpop.f32.mrf.mxu0  ;;  %5740 = vmatprep.mubr.msk.f32.mxu1 %vm765_vm4, %v706_v27  ;;  %5905 = vmatprep.mubr.msk.f32.mxu0 %vm765_vm4, %v6667_v28 }
  0xf3   : > { %v707_v30 = vrot.slane %v6670_v29, 1  ;;  %v1425_v31 = vrot.slane %v6670_v29, 2 }
  0xf4   : > { %v5626_v32 = vpop.f32.mrf.mxu0 }
  0xf5   : > { %v708_v33 = vsel %vm691_vm3, %v705_v23, %v707_v30  ;;  %v6679_v34 = vsel %vm1409_vm5, %v1423_v24, %v1425_v31  ;;  %v6754_v24 = vpop.f32.mrf.mxu1 }
  0xf6   : > { %v6681_v35 = vpop.f32.mrf.mxu0  ;;  %5741 = vmatmul.mubr.msk.f32.gmra.mxu1 %vm765_vm4, %v708_v33  ;;  %5906 = vmatmul.mubr.msk.f32.gmra.mxu0 %vm765_vm4, %v6679_v34 }
  0xf7   : > { %v709_v36 = vrot.slane %v6681_v35, 1  ;;  %v1427_v37 = vrot.slane %v6681_v35, 2 }
  0xf8   : > { %v5629_v38 = vpop.f32.mrf.mxu0 }
  0xf9   : > { %v710_v39 = vsel %vm691_vm3, %v707_v30, %v709_v36  ;;  %v6690_v40 = vsel %vm1409_vm5, %v1425_v31, %v1427_v37  ;;  %v5722_v30 = vpop.f32.mrf.mxu1 }
  0xfa   : > { %v6692_v41 = vpop.f32.mrf.mxu0  ;;  %5743 = vmatprep.mubr.msk.f32.mxu1 %vm765_vm4, %v710_v39  ;;  %5908 = vmatprep.mubr.msk.f32.mxu0 %vm765_vm4, %v6690_v40 }
  0xfb   : > { %v711_v42 = vrot.slane %v6692_v41, 1  ;;  %v1429_v43 = vrot.slane %v6692_v41, 2  ;;  %v644_v39 = vpop.f32.mrf.mxu1 }
  0xfc   : > { %v5632_v44 = vpop.f32.mrf.mxu0 }
  0xfd   : > { %v712_v45 = vsel %vm691_vm3, %v709_v36, %v711_v42  ;;  %v6701_v46 = vsel %vm1409_vm5, %v1427_v37, %v1429_v43 }
  0xfe   : > { %9017 = vst [vmem:[#allocation3_spill] sm:$0xff] %v6701_v46  ;;  %v6703_v47 = vpop.f32.mrf.mxu0  ;;  %5744 = vmatmul.mubr.msk.f32.gmra.mxu1 %vm765_vm4, %v712_v45  ;;  %5909 = vmatmul.mubr.msk.f32.gmra.mxu0 %vm765_vm4, %v6701_v46  ;;  %v5725_v45 = vpop.f32.mrf.mxu1 }
  0xff   : > { %v713_v48 = vrot.slane %v6703_v47, 1  ;;  %v1431_v50 = vrot.slane %v6703_v47, 2 }
 0x100   : > { %v5635_v52 = vpop.f32.mrf.mxu0 }
 0x101   : > { %v714_v53 = vsel %vm691_vm3, %v711_v42, %v713_v48  ;;  %v6712_v54 = vsel %vm1409_vm5, %v1429_v43, %v1431_v50 }
 0x102   : > { %9018 = vst [vmem:[#allocation4_spill] sm:$0xff] %v6712_v54  ;;  %v6714_v55 = vpop.f32.mrf.mxu0  ;;  %5746 = vmatprep.mubr.msk.f32.mxu1 %vm765_vm4, %v714_v53  ;;  %5911 = vmatprep.mubr.msk.f32.mxu0 %vm765_vm4, %v6712_v54  ;;  %v648_v53 = vpop.f32.mrf.mxu1 }
 0x103   : > { %v715_v57 = vrot.slane %v6714_v55, 1  ;;  %v1433_v58 = vrot.slane %v6714_v55, 2 }
 0x104   : > { %v5638_v59 = vpop.f32.mrf.mxu0 }
 0x105   : > { %v716_v61 = vsel %vm691_vm3, %v713_v48, %v715_v57  ;;  %v6723_v63 = vsel %vm1409_vm5, %v1431_v50, %v1433_v58 }
 0x106   : > { %9019 = vst [vmem:[#allocation5_spill] sm:$0xff] %v6723_v63  ;;  %v6725_v0 = vpop.f32.mrf.mxu0  ;;  %5747 = vmatmul.mubr.msk.f32.gmra.mxu1 %vm765_vm4, %v716_v61  ;;  %5912 = vmatmul.mubr.msk.f32.gmra.mxu0 %vm765_vm4, %v6723_v63  ;;  %v5728_v61 = vpop.f32.mrf.mxu1 }
 0x107   : > { %v717_v1 = vrot.slane %v6725_v0, 1  ;;  %v1435_v4 = vrot.slane %v6725_v0, 2 }
 0x108   : > { %v5641_v5 = vpop.f32.mrf.mxu0 }
 0x109   : > { %v718_v6 = vsel %vm691_vm3, %v715_v57, %v717_v1  ;;  %v6734_v7 = vsel %vm1409_vm5, %v1433_v58, %v1435_v4 }
 0x10a   : > { %9020 = vst [vmem:[#allocation6_spill] sm:$0xff] %v6734_v7  ;;  %v6736_v10 = vpop.f32.mrf.mxu0  ;;  %5749 = vmatprep.mubr.msk.f32.mxu1 %vm765_vm4, %v718_v6  ;;  %5914 = vmatprep.mubr.msk.f32.mxu0 %vm765_vm4, %v6734_v7 }
 0x10b   : > { %v719_v11 = vrot.slane %v6736_v10, 1  ;;  %v1437_v12 = vrot.slane %v6736_v10, 2 }
 0x10c   : > { %v5644_v14 = vpop.f32.mrf.mxu0 }
 0x10d   : > { %v720_v17 = vsel %vm691_vm3, %v717_v1, %v719_v11  ;;  %v6745_v18 = vsel %vm1409_vm5, %v1435_v4, %v1437_v12 }
 0x10e   : > { %9021 = vst [vmem:[#allocation7_spill] sm:$0xff] %v6745_v18  ;;  %v6747_v19 = vpop.f32.mrf.mxu0  ;;  %5750 = vmatmul.mubr.msk.f32.gmra.mxu1 %vm765_vm4, %v720_v17  ;;  %5915 = vmatmul.mubr.msk.f32.gmra.mxu0 %vm765_vm4, %v6745_v18 }
 0x10f   : > { %v721_v20 = vrot.slane %v6747_v19, 1  ;;  %v1439_v23 = vrot.slane %v6747_v19, 2 }
 0x110   : > { %v5647_v25 = vpop.f32.mrf.mxu0 }
 0x111   : > { %v722_v26 = vsel %vm691_vm3, %v719_v11, %v721_v20  ;;  %v6758_v27 = vsel %vm1409_vm5, %v1437_v12, %v1439_v23 }
 0x112   : > { %9022 = vst [vmem:[#allocation8_spill] sm:$0xff] %v6758_v27  ;;  %v6760_v31 = vpop.f32.mrf.mxu0  ;;  %5752 = vmatprep.mubr.msk.f32.mxu1 %vm765_vm4, %v722_v26  ;;  %5917 = vmatprep.mubr.msk.f32.mxu0 %vm765_vm4, %v6758_v27 }
 0x113   : > { %v723_v32 = vrot.slane %v6760_v31, 1  ;;  %v1441_v33 = vrot.slane %v6760_v31, 2 }
 0x114   : > { %v5650_v36 = vpop.f32.mrf.mxu0 }
 0x115   : > { %v724_v37 = vsel %vm691_vm3, %v721_v20, %v723_v32  ;;  %v6769_v38 = vsel %vm1409_vm5, %v1439_v23, %v1441_v33 }
 0x116   : > { %9023 = vst [vmem:[#allocation9_spill] sm:$0xff] %v6769_v38  ;;  %v6771_v42 = vpop.f32.mrf.mxu0  ;;  %5753 = vmatmul.mubr.msk.f32.gmra.mxu1 %vm765_vm4, %v724_v37  ;;  %5918 = vmatmul.mubr.msk.f32.gmra.mxu0 %vm765_vm4, %v6769_v38 }
 0x117   : > { %v725_v43 = vrot.slane %v6771_v42, 1  ;;  %v1443_v44 = vrot.slane %v6771_v42, 2 }
 0x118   : > { %v5653_v48 = vpop.f32.mrf.mxu0 }
 0x119   : > { %v726_v50 = vsel %vm691_vm3, %v723_v32, %v725_v43  ;;  %v6780_v52 = vsel %vm1409_vm5, %v1441_v33, %v1443_v44 }
 0x11a   : > { %9024 = vst [vmem:[#allocation10_spill] sm:$0xff] %v6780_v52  ;;  %v6782_v57 = vpop.f32.mrf.mxu0  ;;  %5755 = vmatprep.mubr.msk.f32.mxu1 %vm765_vm4, %v726_v50  ;;  %5920 = vmatprep.mubr.msk.f32.mxu0 %vm765_vm4, %v6780_v52 }
 0x11b   : > { %v727_v58 = vrot.slane %v6782_v57, 1  ;;  %v1445_v59 = vrot.slane %v6782_v57, 2 }
 0x11c   : > { %v5656_v1 = vpop.f32.mrf.mxu0 }
 0x11d   : > { %v728_v4 = vsel %vm691_vm3, %v725_v43, %v727_v58  ;;  %v6791_v5 = vsel %vm1409_vm5, %v1443_v44, %v1445_v59 }
 0x11e   : > { %9025 = vst [vmem:[#allocation11_spill] sm:$0xff] %v6791_v5  ;;  %v6793_v6 = vpop.f32.mrf.mxu0  ;;  %5756 = vmatmul.mubr.msk.f32.gmra.mxu1 %vm765_vm4, %v728_v4  ;;  %5921 = vmatmul.mubr.msk.f32.gmra.mxu0 %vm765_vm4, %v6791_v5 }
 0x11f   : > { %v729_v11 = vrot.slane %v6793_v6, 1  ;;  %v1447_v12 = vrot.slane %v6793_v6, 2 }
 0x120   : > { %v5659_v14 = vpop.f32.mrf.mxu0 }
 0x121   : > { %v730_v17 = vsel %vm691_vm3, %v727_v58, %v729_v11  ;;  %v6802_v20 = vsel %vm1409_vm5, %v1445_v59, %v1447_v12 }
 0x122   : > { %9026 = vst [vmem:[#allocation12_spill] sm:$0xff] %v6802_v20  ;;  %v6804_v23 = vpop.f32.mrf.mxu0  ;;  %5758 = vmatprep.mubr.msk.f32.mxu1 %vm765_vm4, %v730_v17  ;;  %5923 = vmatprep.mubr.msk.f32.mxu0 %vm765_vm4, %v6802_v20 }
 0x123   : > { %9027 = vst [vmem:[#allocation13_spill] sm:$0xff] %v6804_v23  ;;  %v731_v25 = vrot.slane %v6804_v23, 1  ;;  %v1449_v26 = vrot.slane %v6804_v23, 2 }
 0x124   : > { %v5662_v30 = vpop.f32.mrf.mxu0 }
 0x125   : > { %v732_v32 = vsel %vm691_vm3, %v729_v11, %v731_v25  ;;  %v6813_v33 = vsel %vm1409_vm5, %v1447_v12, %v1449_v26 }
 0x126   : > { %9028 = vst [vmem:[#allocation14_spill] sm:$0xff] %v6813_v33  ;;  %v6815_v36 = vpop.f32.mrf.mxu0  ;;  %5759 = vmatmul.mubr.msk.f32.gmra.mxu1 %vm765_vm4, %v732_v32  ;;  %5924 = vmatmul.mubr.msk.f32.gmra.mxu0 %vm765_vm4, %v6813_v33 }
 0x127   : > { %9029 = vst [vmem:[#allocation15_spill] sm:$0xff] %v6815_v36  ;;  %v733_v37 = vrot.slane %v6815_v36, 1  ;;  %v1451_v39 = vrot.slane %v6815_v36, 2 }
 0x128   : > { %v5665_v43 = vpop.f32.mrf.mxu0 }
 0x129   : > { %v734_v44 = vsel %vm691_vm3, %v731_v25, %v733_v37  ;;  %v6824_v45 = vsel %vm1409_vm5, %v1449_v26, %v1451_v39 }
 0x12a   : > { %9030 = vst [vmem:[#allocation16_spill] sm:$0xff] %v6824_v45  ;;  %v6826_v48 = vpop.f32.mrf.mxu0  ;;  %5761 = vmatprep.mubr.msk.f32.mxu1 %vm765_vm4, %v734_v44  ;;  %5926 = vmatprep.mubr.msk.f32.mxu0 %vm765_vm4, %v6824_v45 }
 0x12b   : > { %9031 = vst [vmem:[#allocation17_spill] sm:$0xff] %v6826_v48  ;;  %v735_v50 = vrot.slane %v6826_v48, 1  ;;  %v1453_v53 = vrot.slane %v6826_v48, 2 }
 0x12c   : > { %v5668_v58 = vpop.f32.mrf.mxu0 }
 0x12d   : > { %v736_v59 = vsel %vm691_vm3, %v733_v37, %v735_v50  ;;  %v6835_v61 = vsel %vm1409_vm5, %v1451_v39, %v1453_v53  ;;  %v6869_v58 = vld [vmem:[%s8929_s2 + $0x1c] sm:$0xf] }
 0x12e   : > { %9032 = vst [vmem:[#allocation18_spill] sm:$0xff] %v6835_v61  ;;  %v6837_v1 = vpop.f32.mrf.mxu0  ;;  %5762 = vmatmul.mubr.msk.f32.gmra.mxu1 %vm765_vm4, %v736_v59  ;;  %5927 = vmatmul.mubr.msk.f32.gmra.mxu0 %vm765_vm4, %v6835_v61 }
 0x12f   : > { %9033 = vst [vmem:[#allocation19_spill] sm:$0xff] %v6837_v1  ;;  %v737_v4 = vrot.slane %v6837_v1, 1  ;;  %v1455_v11 = vrot.slane %v6837_v1, 2  ;;  %6121 = vmatprep.subr.msk.mxu0 %vm838_vm2, %v6869_v58 }
 0x130   : > { %v5671_v12 = vpop.f32.mrf.mxu0 }
 0x131   : > { %v738_v14 = vsel %vm691_vm3, %v735_v50, %v737_v4  ;;  %v6846_v17 = vsel %vm1409_vm5, %v1453_v53, %v1455_v11 }
 0x132   : > { %9034 = vst [vmem:[#allocation20_spill] sm:$0xff] %v6846_v17  ;;  %v6848_v25 = vpop.f32.mrf.mxu0  ;;  %5764 = vmatprep.mubr.msk.f32.mxu1 %vm765_vm4, %v738_v14  ;;  %5929 = vmatprep.mubr.msk.f32.mxu0 %vm765_vm4, %v6846_v17 }
 0x133   : > { %9035 = vst [vmem:[#allocation21_spill] sm:$0xff] %v6848_v25  ;;  %v739_v26 = vrot.slane %v6848_v25, 1  ;;  %v1457_v30 = vrot.slane %v6848_v25, 2 }
 0x134   : > { %v5674_v32 = vpop.f32.mrf.mxu0 }
 0x135   : > { %v740_v37 = vsel %vm691_vm3, %v737_v4, %v739_v26  ;;  %v6857_v39 = vsel %vm1409_vm5, %v1455_v11, %v1457_v30 }
 0x136   : > { %9036 = vst [vmem:[#allocation22_spill] sm:$0xff] %v6857_v39  ;;  %v6859_v43 = vpop.f32.mrf.mxu0  ;;  %5765 = vmatmul.mubr.msk.f32.gmra.mxu1 %vm765_vm4, %v740_v37  ;;  %5930 = vmatmul.mubr.msk.f32.gmra.mxu0 %vm765_vm4, %v6857_v39 }
 0x137   : > { %9037 = vst [vmem:[#allocation23_spill] sm:$0xff] %v6859_v43  ;;  %v741_v44 = vrot.slane %v6859_v43, 1  ;;  %v1459_v50 = vrot.slane %v6859_v43, 2 }
 0x138   : > { %v5677_v53 = vpop.f32.mrf.mxu0 }
 0x139   : > { %v742_v59 = vsel %vm691_vm3, %v739_v26, %v741_v44  ;;  %v6873_v4 = vsel %vm1409_vm5, %v1457_v30, %v1459_v50 }
 0x13a   : > { %9038 = vst [vmem:[#allocation24_spill] sm:$0xff] %v6873_v4  ;;  %v6877_v11 = vpop.f32.mrf.mxu0  ;;  %5767 = vmatprep.mubr.msk.f32.mxu1 %vm765_vm4, %v742_v59  ;;  %5932 = vmatprep.mubr.msk.f32.mxu0 %vm765_vm4, %v6873_v4 }
 0x13b   : > { %9039 = vst [vmem:[#allocation25_spill] sm:$0xff] %v6877_v11  ;;  %v743_v12 = vrot.slane %v6877_v11, 1  ;;  %v1461_v14 = vrot.slane %v6877_v11, 2 }
 0x13c   : > { %v5680_v32 = vpop.f32.mrf.mxu0 }
 0x13d   : > { %v744_v26 = vsel %vm691_vm3, %v741_v44, %v743_v12  ;;  %v6886_v30 = vsel %vm1409_vm5, %v1459_v50, %v1461_v14 }
 0x13e   : > { %9040 = vst [vmem:[#allocation26_spill] sm:$0xff] %v6886_v30  ;;  %v6888_v37 = vpop.f32.mrf.mxu0  ;;  %5768 = vmatmul.mubr.msk.f32.gmra.mxu1 %vm765_vm4, %v744_v26  ;;  %5933 = vmatmul.mubr.msk.f32.gmra.mxu0 %vm765_vm4, %v6886_v30 }
 0x13f   : > { %9041 = vst [vmem:[#allocation27_spill] sm:$0xff] %v6888_v37  ;;  %v745_v53 = vrot.slane %v6888_v37, 1  ;;  %v1463_v59 = vrot.slane %v6888_v37, 2 }
 0x140   : > { %v5683_v62 = vpop.f32.mrf.mxu0 }
 0x141   : > { %v746_v4 = vsel %vm691_vm3, %v743_v12, %v745_v53  ;;  %v6897_v32 = vsel %vm1409_vm5, %v1461_v14, %v1463_v59 }
 0x142   : > { %9042 = vst [vmem:[#allocation28_spill] sm:$0xff] %v6897_v32  ;;  %v6899_v44 = vpop.f32.mrf.mxu0  ;;  %5770 = vmatprep.mubr.msk.f32.mxu1 %vm765_vm4, %v746_v4  ;;  %5935 = vmatprep.mubr.msk.f32.mxu0 %vm765_vm4, %v6897_v32 }
 0x143   : > { %9043 = vst [vmem:[#allocation29_spill] sm:$0xff] %v6899_v44  ;;  %v747_v50 = vrot.slane %v6899_v44, 1  ;;  %v1465_v26 = vrot.slane %v6899_v44, 2 }
 0x144   : > { %v5686_v30 = vpop.f32.mrf.mxu0 }
 0x145   : > { %v748_v39 = vsel %vm691_vm3, %v745_v53, %v747_v50  ;;  %v6908_v62 = vsel %vm1409_vm5, %v1463_v59, %v1465_v26 }
 0x146   : > { %9044 = vst [vmem:[#allocation30_spill] sm:$0xff] %v6908_v62  ;;  %v6910_v12 = vpop.f32.mrf.mxu0  ;;  %5771 = vmatmul.mubr.msk.f32.gmra.mxu1 %vm765_vm4, %v748_v39  ;;  %5936 = vmatmul.mubr.msk.f32.gmra.mxu0 %vm765_vm4, %v6908_v62 }
 0x147   : > { %9045 = vst [vmem:[#allocation31_spill] sm:$0xff] %v6910_v12  ;;  %v749_v4 = vrot.slane %v6910_v12, 1  ;;  %v1467_v14 = vrot.slane %v6910_v12, 2 }
 0x148   : > { %v5689_v32 = vpop.f32.mrf.mxu0 }
 0x149   : > { %v750_v17 = vsel %vm691_vm3, %v747_v50, %v749_v4  ;;  %v6919_v30 = vsel %vm1409_vm5, %v1465_v26, %v1467_v14 }
 0x14a   : > { %9046 = vst [vmem:[#allocation32_spill] sm:$0xff] %v6919_v30  ;;  %v6921_v53 = vpop.f32.mrf.mxu0  ;;  %5773 = vmatprep.mubr.msk.f32.mxu1 %vm765_vm4, %v750_v17  ;;  %5938 = vmatprep.mubr.msk.f32.mxu0 %vm765_vm4, %v6919_v30 }
 0x14b   : > { %9047 = vst [vmem:[#allocation33_spill] sm:$0xff] %v6921_v53  ;;  %v751_v39 = vrot.slane %v6921_v53, 1  ;;  %v1469_v59 = vrot.slane %v6921_v53, 2 }
 0x14c   : > { %v5692_v62 = vpop.f32.mrf.mxu0 }
 0x14d   : > { %v752_v61 = vsel %vm691_vm3, %v749_v4, %v751_v39  ;;  %v6930_v32 = vsel %vm1409_vm5, %v1467_v14, %v1469_v59 }
 0x14e   : > { %9048 = vst [vmem:[#allocation34_spill] sm:$0xff] %v6930_v32  ;;  %v6932_v50 = vpop.f32.mrf.mxu0  ;;  %5774 = vmatmul.mubr.msk.f32.gmra.mxu1 %vm765_vm4, %v752_v61  ;;  %5939 = vmatmul.mubr.msk.f32.gmra.mxu0 %vm765_vm4, %v6930_v32 }
 0x14f   : > { %9049 = vst [vmem:[#allocation35_spill] sm:$0xff] %v6932_v50  ;;  %v753_v17 = vrot.slane %v6932_v50, 1  ;;  %v1471_v26 = vrot.slane %v6932_v50, 2 }
 0x150   : > { %v5695_v30 = vpop.f32.mrf.mxu0 }
 0x151   : > { %v754_v45 = vsel %vm691_vm3, %v751_v39, %v753_v17  ;;  %v6941_v62 = vsel %vm1409_vm5, %v1469_v59, %v1471_v26 }
 0x152   : > { %9050 = vst [vmem:[#allocation36_spill] sm:$0xff] %v6941_v62  ;;  %v6943_v4 = vpop.f32.mrf.mxu0  ;;  %5776 = vmatprep.mubr.msk.f32.mxu1 %vm765_vm4, %v754_v45  ;;  %5941 = vmatprep.mubr.msk.f32.mxu0 %vm765_vm4, %v6941_v62 }
 0x153   : > { %9051 = vst [vmem:[#allocation37_spill] sm:$0xff] %v6943_v4  ;;  %v755_v61 = vrot.slane %v6943_v4, 1  ;;  %v1473_v14 = vrot.slane %v6943_v4, 2 }
 0x154   : > { %v5698_v32 = vpop.f32.mrf.mxu0 }
 0x155   : > { %v756_v33 = vsel %vm691_vm3, %v753_v17, %v755_v61  ;;  %v6952_v30 = vsel %vm1409_vm5, %v1471_v26, %v1473_v14 }
 0x156   : > { %9052 = vst [vmem:[#allocation38_spill] sm:$0xff] %v6952_v30  ;;  %v6954_v39 = vpop.f32.mrf.mxu0  ;;  %5777 = vmatmul.mubr.msk.f32.gmra.mxu1 %vm765_vm4, %v756_v33  ;;  %5942 = vmatmul.mubr.msk.f32.gmra.mxu0 %vm765_vm4, %v6952_v30 }
 0x157   : > { %9053 = vst [vmem:[#allocation39_spill] sm:$0xff] %v6954_v39  ;;  %v757_v45 = vrot.slane %v6954_v39, 1  ;;  %v1475_v59 = vrot.slane %v6954_v39, 2 }
 0x158   : > { %v5701_v62 = vpop.f32.mrf.mxu0 }
 0x159   : > { %v758_v20 = vsel %vm691_vm3, %v755_v61, %v757_v45  ;;  %v6963_v32 = vsel %vm1409_vm5, %v1473_v14, %v1475_v59 }
 0x15a   : > { %9054 = vst [vmem:[#allocation40_spill] sm:$0xff] %v6963_v32  ;;  %v6965_v17 = vpop.f32.mrf.mxu0  ;;  %5779 = vmatprep.mubr.msk.f32.mxu1 %vm765_vm4, %v758_v20  ;;  %5944 = vmatprep.mubr.msk.f32.mxu0 %vm765_vm4, %v6963_v32 }
 0x15b   : > { %9055 = vst [vmem:[#allocation41_spill] sm:$0xff] %v6965_v17  ;;  %v759_v33 = vrot.slane %v6965_v17, 1  ;;  %v1477_v26 = vrot.slane %v6965_v17, 2 }
 0x15c   : > { %v5704_v30 = vpop.f32.mrf.mxu0 }
 0x15d   : > { %v760_v5 = vsel %vm691_vm3, %v757_v45, %v759_v33  ;;  %v6974_v62 = vsel %vm1409_vm5, %v1475_v59, %v1477_v26 }
 0x15e   : > { %9056 = vst [vmem:[#allocation42_spill] sm:$0xff] %v6974_v62  ;;  %v6976_v61 = vpop.f32.mrf.mxu0  ;;  %5780 = vmatmul.mubr.msk.f32.gmra.mxu1 %vm765_vm4, %v760_v5  ;;  %5945 = vmatmul.mubr.msk.f32.gmra.mxu0 %vm765_vm4, %v6974_v62 }
 0x15f   : > { %9057 = vst [vmem:[#allocation43_spill] sm:$0xff] %v6976_v61  ;;  %v761_v20 = vrot.slane %v6976_v61, 1  ;;  %v1479_v14 = vrot.slane %v6976_v61, 2 }
 0x160   : > { %v5707_v32 = vpop.f32.mrf.mxu0 }
 0x161   : > { %v762_v52 = vsel %vm691_vm3, %v759_v33, %v761_v20  ;;  %v6985_v30 = vsel %vm1409_vm5, %v1477_v26, %v1479_v14 }
 0x162   : > { %9058 = vst [vmem:[#allocation44_spill] sm:$0xff] %v6985_v30  ;;  %v6987_v45 = vpop.f32.mrf.mxu0  ;;  %5782 = vmatprep.mubr.msk.f32.mxu1 %vm765_vm4, %v762_v52  ;;  %5947 = vmatprep.mubr.msk.f32.mxu0 %vm765_vm4, %v6985_v30 }
 0x163   : > { %9059 = vst [vmem:[#allocation45_spill] sm:$0xff] %v6987_v45  ;;  %v763_v5 = vrot.slane %v6987_v45, 1  ;;  %v1481_v59 = vrot.slane %v6987_v45, 2  ;;  %v9064_v52 = vrot.slane %v6987_v45, 5  ;;  %v9067_v27 = vrot.slane %v6987_v45, 3 }
 0x164   : > { %v5710_v62 = vpop.f32.mrf.mxu0 }
 0x165   : > { %v764_v38 = vsel %vm691_vm3, %v761_v20, %v763_v5  ;;  %v6996_v32 = vsel %vm1409_vm5, %v1479_v14, %v1481_v59  ;;  %v9061_v14 = vrot.slane %v6987_v45, 4 }
 0x166   : > { %9060 = vst [vmem:[#allocation46_spill] sm:$0xff] %v6996_v32  ;;  %v6998_v33 = vpop.f32.mrf.mxu0  ;;  %5783 = vmatmul.mubr.msk.f32.gmra.mxu1 %vm765_vm4, %v764_v38  ;;  %5948 = vmatmul.mubr.msk.f32.gmra.mxu0 %vm765_vm4, %v6996_v32  ;;  %v7018_v32 = vld [vmem:[%s8929_s2 + $0x10] sm:$0xf] }
 0x167   : > { %5787 = vmatprep.mubr.msk.f32.mxu1 %vm765_vm4, %v6589_v49  ;;  %v1843_v62 = vrot.slane %v6998_v33, 2  ;;  %v8957_v20 = vrot.slane %v6998_v33, 4 }
 0x168   : > { %v5713_v5 = vpop.f32.mrf.mxu0 }
 0x169   : > { %v1844_v30 = vsel %vm1409_vm5, %v1481_v59, %v1843_v62  ;;  %v7025_v38 = vsel %vm838_vm2, %v9061_v14, %v8957_v20  ;;  %v9063_v5 = vrot.slane %v6998_v33, 5  ;;  %v9066_v59 = vrot.slane %v6998_v33, 3 }
 0x16a   : > { %9062 = vst [vmem:[#allocation47_spill] sm:$0xff] %v7025_v38  ;;  %v7041_v7 = vpop.f32.mrf.mxu0  ;;  %5788 = vmatmul.mubr.msk.f32.vlgmr.msra.gmra.mxu1 %vm765_vm4, %v6591_v51  ;;  %5950 = vmatprep.mubr.msk.f32.mxu0 %vm765_vm4, %v1844_v30  ;;  %v2570_v14 = vrot.slane %v6601_v60, 4  ;;  %v9070_v20 = vrot.slane %v6998_v33, 6  ;;  %v2569_v30 = vrot.slane %v6596_v56, 4 }
 0x16b   : > { %v7032_v26 = vsel %vm3296_vm7, %v9064_v52, %v9063_v5  ;;  %v7039_v18 = vsel %vm2137_vm6, %v9067_v27, %v9066_v59  ;;  %9069 = vst [vmem:[#allocation50_spill] sm:$0xff] %v7041_v7  ;;  %v9071_v52 = vrot.slane %v6987_v45, 6  ;;  %5842 = vmatpush3.msk.msra.mxu1 %vm838_vm2, %v6635_v13  ;;  %5790 = vmatprep.mubr.msk.f32.mxu1 %vm765_vm4, %v6596_v56  ;;  %v2572_v27 = vrot.slane %v6614_v3, 4 }
 0x16c   : > { %9065 = vst [vmem:[#allocation48_spill] sm:$0xff] %v7032_v26  ;;  %9068 = vst [vmem:[#allocation49_spill] sm:$0xff] %v7039_v18  ;;  %v1845_v26 = vrot.slane %v7041_v7, 2  ;;  %v5716_v59 = vpop.f32.mrf.mxu0  ;;  %5953 = vmatprep.subr.msk.mxu1 %vm838_vm2, %v7018_v32  ;;  %v2571_v13 = vsel %vm838_vm2, %v2569_v30, %v2570_v14  ;;  %v2576_v30 = vrot.slane %v6643_v16, 4 }
 0x16d   : > { %v7052_v5 = vsel %vm3728_vm8, %v9071_v52, %v9070_v20  ;;  %v3004_v20 = vrot.slane %v6754_v24, 4  ;;  %v3368_v52 = vrot.slane %v6754_v24, 5  ;;  %v2574_v59 = vrot.slane %v6625_v9, 4 }
 0x16e   : > { %9072 = vst [vmem:[#allocation51_spill] sm:$0xff] %v7052_v5  ;;  %v1846_v18 = vsel %vm1409_vm5, %v1843_v62, %v1845_v26  ;;  %v3800_v5 = vrot.slane %v6754_v24, 6  ;;  %5791 = vmatmul.mubr.msk.f32.gmra.mxu1 %vm765_vm4, %v6601_v60  ;;  %v7072_v63 = vpop.f32.mrf.mxu0  ;;  %v2573_v60 = vsel %vm838_vm2, %v2570_v14, %v2572_v27 }
 0x16f   : > { %5951 = vmatmul.mubr.msk.f32.gmra.mxu0 %vm765_vm4, %v1846_v18  ;;  %9073 = vst [vmem:[#allocation52_spill] sm:$0xff] %v7072_v63  ;;  %5793 = vmatprep.mubr.msk.f32.mxu1 %vm765_vm4, %v6614_v3  ;;  %v8962_v26 = vrot.slane %v7072_v63, 4  ;;  %v3366_v24 = vrot.slane %v7072_v63, 5  ;;  %v8963_v62 = vrot.slane %v7072_v63, 6  ;;  %v7099_v14 = vsel %vm838_vm2, %v2572_v27, %v2574_v59 }
 0x170   : > { %6011 = vmatprep.mubr.msk.f32.mxu0 %vm765_vm4, %v2571_v13  ;;  %v5719_v18 = vpop.f32.mrf.mxu0 }
 0x171   : > { %v7083_v54 = vsel %vm3296_vm7, %v3366_v24, %v3368_v52  ;;  %v7088_v46 = vsel %vm838_vm2, %v8962_v26, %v3004_v20  ;;  %v7093_v13 = vsel %vm3728_vm8, %v8963_v62, %v3800_v5  ;;  %v2578_v52 = vrot.slane %v6654_v22, 4 }
 0x172   : > { %9074 = vst [vmem:[#allocation53_spill] sm:$0xff] %v7088_v46  ;;  %9075 = vst [vmem:[#allocation54_spill] sm:$0xff] %v7093_v13  ;;  %5794 = vmatmul.mubr.msk.f32.gmra.mxu1 %vm765_vm4, %v6625_v9  ;;  %v7109_v5 = vsel %vm838_vm2, %v2574_v59, %v2576_v30  ;;  %v2580_v20 = vrot.slane %v6670_v29, 4  ;;  %v2582_v18 = vrot.slane %v6681_v35, 4  ;;  %v2584_v59 = vrot.slane %v6692_v41, 4 }
 0x173   : > { %6012 = vmatmul.mubr.msk.f32.vlgmr.msra.gmra.mxu0 %vm765_vm4, %v2573_v60  ;;  %5796 = vmatprep.mubr.msk.f32.mxu1 %vm765_vm4, %v6643_v16  ;;  %v3364_v60 = vrot.slane %v7041_v7, 5  ;;  %v7118_v27 = vsel %vm838_vm2, %v2576_v30, %v2578_v52  ;;  %v2586_v26 = vrot.slane %v6703_v47, 4  ;;  %v9077_v62 = vrot.slane %v6998_v33, 5 }
 0x174   : > { %6014 = vmatprep.mubr.msk.f32.mxu0 %vm765_vm4, %v7099_v14  ;;  %6122 = vmatpush3.msk.msra.mxu0 %vm838_vm2, %v6869_v58  ;;  %v7126_v58 = vsel %vm838_vm2, %v2578_v52, %v2580_v20  ;;  %v7134_v30 = vsel %vm838_vm2, %v2580_v20, %v2582_v18  ;;  %v7150_v46 = vsel %vm838_vm2, %v2582_v18, %v2584_v59  ;;  %v2588_v20 = vrot.slane %v6714_v55, 4 }
 0x175   : > { %9076 = vst [vmem:[#allocation55_spill] sm:$0xff] %v7126_v58  ;;  %v7140_v13 = vsel %vm3296_vm7, %v9077_v62, %v3364_v60  ;;  %v7147_v52 = vsel %vm3296_vm7, %v3364_v60, %v3366_v24  ;;  %9078 = vst [vmem:[#allocation56_spill] sm:$0xff] %v7150_v46  ;;  %v7158_v62 = vsel %vm838_vm2, %v2584_v59, %v2586_v26  ;;  %v2592_v60 = vrot.slane %v6736_v10, 4 }
 0x176   : > { %5797 = vmatmul.mubr.msk.f32.gmra.mxu1 %vm765_vm4, %v6654_v22  ;;  %9079 = vst [vmem:[#allocation57_spill] sm:$0xff] %v7158_v62  ;;  %v7166_v24 = vsel %vm838_vm2, %v2586_v26, %v2588_v20  ;;  %v2594_v59 = vrot.slane %v6747_v19, 4 }
 0x177   : > { %6015 = vmatmul.mubr.msk.f32.gmra.mxu0 %vm765_vm4, %v7109_v5  ;;  %5799 = vmatprep.mubr.msk.f32.mxu1 %vm765_vm4, %v6670_v29  ;;  %9080 = vst [vmem:[#allocation58_spill] sm:$0xff] %v7166_v24 }
 0x178   : > { %6017 = vmatprep.mubr.msk.f32.mxu0 %vm765_vm4, %v7118_v27 }
 0x17a   : > { %5800 = vmatmul.mubr.msk.f32.gmra.mxu1 %vm765_vm4, %v6681_v35 }
 0x17b   : > { %6018 = vmatmul.mubr.msk.f32.gmra.mxu0 %vm765_vm4, %v7126_v58  ;;  %5802 = vmatprep.mubr.msk.f32.mxu1 %vm765_vm4, %v6692_v41  ;;  %v2590_v58 = vrot.slane %v6725_v0, 4 }
 0x17c   : > { %6020 = vmatprep.mubr.msk.f32.mxu0 %vm765_vm4, %v7134_v30 }
 0x17d   : > { %v7174_v18 = vsel %vm838_vm2, %v2588_v20, %v2590_v58  ;;  %v7182_v26 = vsel %vm838_vm2, %v2590_v58, %v2592_v60  ;;  %v7190_v20 = vsel %vm838_vm2, %v2592_v60, %v2594_v59 }
 0x17e   : > { %5803 = vmatmul.mubr.msk.f32.gmra.mxu1 %vm765_vm4, %v6703_v47  ;;  %9081 = vst [vmem:[#allocation59_spill] sm:$0xff] %v7174_v18  ;;  %9082 = vst [vmem:[#allocation60_spill] sm:$0xff] %v7182_v26 }
 0x17f   : > { %6021 = vmatmul.mubr.msk.f32.gmra.mxu0 %vm765_vm4, %v7150_v46  ;;  %5805 = vmatprep.mubr.msk.f32.mxu1 %vm765_vm4, %v6714_v55  ;;  %9083 = vst [vmem:[#allocation61_spill] sm:$0xff] %v7190_v20  ;;  %v1411_v46 = vrot.slane %v6591_v51, 2 }
 0x180   : > { %6023 = vmatprep.mubr.msk.f32.mxu0 %vm765_vm4, %v7158_v62  ;;  %v2596_v62 = vrot.slane %v6760_v31, 4 }
 0x182   : > { %5806 = vmatmul.mubr.msk.f32.gmra.mxu1 %vm765_vm4, %v6725_v0  ;;  %v7198_v58 = vsel %vm838_vm2, %v2594_v59, %v2596_v62 }
 0x183   : > { %6024 = vmatmul.mubr.msk.f32.gmra.mxu0 %vm765_vm4, %v7166_v24  ;;  %5808 = vmatprep.mubr.msk.f32.mxu1 %vm765_vm4, %v6736_v10  ;;  %v2598_v24 = vrot.slane %v6771_v42, 4  ;;  %9084 = vst [vmem:[#allocation62_spill] sm:$0xff] %v7198_v58 }
 0x184   : > { %6026 = vmatprep.mubr.msk.f32.mxu0 %vm765_vm4, %v7174_v18  ;;  %v2600_v18 = vrot.slane %v6782_v57, 4 }
 0x185   : > { %v7206_v60 = vsel %vm838_vm2, %v2596_v62, %v2598_v24 }
 0x186   : > { %5809 = vmatmul.mubr.msk.f32.gmra.mxu1 %vm765_vm4, %v6747_v19  ;;  %9085 = vst [vmem:[#allocation63_spill] sm:$0xff] %v7206_v60  ;;  %v7214_v59 = vsel %vm838_vm2, %v2598_v24, %v2600_v18 }
 0x187   : > { %6027 = vmatmul.mubr.msk.f32.gmra.mxu0 %vm765_vm4, %v7182_v26  ;;  %5811 = vmatprep.mubr.msk.f32.mxu1 %vm765_vm4, %v6760_v31  ;;  %v2602_v26 = vrot.slane %v6793_v6, 4  ;;  %9086 = vst [vmem:[#allocation64_spill] sm:$0xff] %v7214_v59 }
 0x188   : > { %6029 = vmatprep.mubr.msk.f32.mxu0 %vm765_vm4, %v7190_v20  ;;  %v2604_v20 = vrot.slane %v6804_v23, 4 }
 0x189   : > { %v7222_v62 = vsel %vm838_vm2, %v2600_v18, %v2602_v26 }
 0x18a   : > { %5812 = vmatmul.mubr.msk.f32.gmra.mxu1 %vm765_vm4, %v6771_v42  ;;  %9087 = vst [vmem:[#allocation65_spill] sm:$0xff] %v7222_v62  ;;  %v7230_v24 = vsel %vm838_vm2, %v2602_v26, %v2604_v20 }
 0x18b   : > { %6030 = vmatmul.mubr.msk.f32.gmra.mxu0 %vm765_vm4, %v7198_v58  ;;  %5814 = vmatprep.mubr.msk.f32.mxu1 %vm765_vm4, %v6782_v57  ;;  %v2606_v58 = vrot.slane %v6815_v36, 4  ;;  %9088 = vst [vmem:[#allocation66_spill] sm:$0xff] %v7230_v24 }
 0x18c   : > { %6032 = vmatprep.mubr.msk.f32.mxu0 %vm765_vm4, %v7206_v60  ;;  %v2608_v60 = vrot.slane %v6826_v48, 4 }
 0x18d   : > { %v7238_v18 = vsel %vm838_vm2, %v2604_v20, %v2606_v58 }
 0x18e   : > { %5815 = vmatmul.mubr.msk.f32.gmra.mxu1 %vm765_vm4, %v6793_v6  ;;  %9089 = vst [vmem:[#allocation67_spill] sm:$0xff] %v7238_v18  ;;  %v7246_v26 = vsel %vm838_vm2, %v2606_v58, %v2608_v60 }
 0x18f   : > { %6033 = vmatmul.mubr.msk.f32.gmra.mxu0 %vm765_vm4, %v7214_v59  ;;  %5817 = vmatprep.mubr.msk.f32.mxu1 %vm765_vm4, %v6804_v23  ;;  %v2610_v59 = vrot.slane %v6837_v1, 4  ;;  %9090 = vst [vmem:[#allocation68_spill] sm:$0xff] %v7246_v26 }
 0x190   : > { %6035 = vmatprep.mubr.msk.f32.mxu0 %vm765_vm4, %v7222_v62  ;;  %v2612_v62 = vrot.slane %v6848_v25, 4 }
 0x191   : > { %v7254_v20 = vsel %vm838_vm2, %v2608_v60, %v2610_v59 }
 0x192   : > { %5818 = vmatmul.mubr.msk.f32.gmra.mxu1 %vm765_vm4, %v6815_v36  ;;  %9091 = vst [vmem:[#allocation69_spill] sm:$0xff] %v7254_v20  ;;  %v7262_v58 = vsel %vm838_vm2, %v2610_v59, %v2612_v62 }
 0x193   : > { %6036 = vmatmul.mubr.msk.f32.gmra.mxu0 %vm765_vm4, %v7230_v24  ;;  %5820 = vmatprep.mubr.msk.f32.mxu1 %vm765_vm4, %v6826_v48  ;;  %v2614_v24 = vrot.slane %v6859_v43, 4  ;;  %9092 = vst [vmem:[#allocation70_spill] sm:$0xff] %v7262_v58 }
 0x194   : > { %6038 = vmatprep.mubr.msk.f32.mxu0 %vm765_vm4, %v7238_v18  ;;  %v2616_v18 = vrot.slane %v6877_v11, 4 }
 0x195   : > { %v7270_v60 = vsel %vm838_vm2, %v2612_v62, %v2614_v24 }
 0x196   : > { %5821 = vmatmul.mubr.msk.f32.gmra.mxu1 %vm765_vm4, %v6837_v1  ;;  %9093 = vst [vmem:[#allocation71_spill] sm:$0xff] %v7270_v60  ;;  %v7278_v59 = vsel %vm838_vm2, %v2614_v24, %v2616_v18 }
 0x197   : > { %6039 = vmatmul.mubr.msk.f32.gmra.mxu0 %vm765_vm4, %v7246_v26  ;;  %5823 = vmatprep.mubr.msk.f32.mxu1 %vm765_vm4, %v6848_v25  ;;  %v2618_v26 = vrot.slane %v6888_v37, 4  ;;  %9094 = vst [vmem:[#allocation72_spill] sm:$0xff] %v7278_v59 }
 0x198   : > { %6041 = vmatprep.mubr.msk.f32.mxu0 %vm765_vm4, %v7254_v20  ;;  %v2620_v20 = vrot.slane %v6899_v44, 4 }
 0x199   : > { %v7286_v62 = vsel %vm838_vm2, %v2616_v18, %v2618_v26 }
 0x19a   : > { %5824 = vmatmul.mubr.msk.f32.gmra.mxu1 %vm765_vm4, %v6859_v43  ;;  %9095 = vst [vmem:[#allocation73_spill] sm:$0xff] %v7286_v62  ;;  %v7294_v24 = vsel %vm838_vm2, %v2618_v26, %v2620_v20 }
 0x19b   : > { %6042 = vmatmul.mubr.msk.f32.gmra.mxu0 %vm765_vm4, %v7262_v58  ;;  %5826 = vmatprep.mubr.msk.f32.mxu1 %vm765_vm4, %v6877_v11  ;;  %v2622_v58 = vrot.slane %v6910_v12, 4  ;;  %9096 = vst [vmem:[#allocation74_spill] sm:$0xff] %v7294_v24 }
 0x19c   : > { %6044 = vmatprep.mubr.msk.f32.mxu0 %vm765_vm4, %v7270_v60  ;;  %v2624_v60 = vrot.slane %v6921_v53, 4 }
 0x19d   : > { %v7302_v18 = vsel %vm838_vm2, %v2620_v20, %v2622_v58 }
 0x19e   : > { %5827 = vmatmul.mubr.msk.f32.gmra.mxu1 %vm765_vm4, %v6888_v37  ;;  %9097 = vst [vmem:[#allocation75_spill] sm:$0xff] %v7302_v18  ;;  %v7310_v26 = vsel %vm838_vm2, %v2622_v58, %v2624_v60 }
 0x19f   : > { %6045 = vmatmul.mubr.msk.f32.gmra.mxu0 %vm765_vm4, %v7278_v59  ;;  %5829 = vmatprep.mubr.msk.f32.mxu1 %vm765_vm4, %v6899_v44  ;;  %v2626_v59 = vrot.slane %v6932_v50, 4  ;;  %9098 = vst [vmem:[#allocation76_spill] sm:$0xff] %v7310_v26 }
 0x1a0   : > { %6047 = vmatprep.mubr.msk.f32.mxu0 %vm765_vm4, %v7286_v62  ;;  %v2628_v62 = vrot.slane %v6943_v4, 4 }
 0x1a1   : > { %v7318_v20 = vsel %vm838_vm2, %v2624_v60, %v2626_v59 }
 0x1a2   : > { %5830 = vmatmul.mubr.msk.f32.gmra.mxu1 %vm765_vm4, %v6910_v12  ;;  %9099 = vst [vmem:[#allocation77_spill] sm:$0xff] %v7318_v20  ;;  %v7326_v58 = vsel %vm838_vm2, %v2626_v59, %v2628_v62  ;;  %v1410_v59 = vrot.slane %v6589_v49, 2  ;;  %v9103_v49 = vrot.slane %v6596_v56, 2 }
 0x1a3   : > { %6048 = vmatmul.mubr.msk.f32.gmra.mxu0 %vm765_vm4, %v7294_v24  ;;  %5832 = vmatprep.mubr.msk.f32.mxu1 %vm765_vm4, %v6921_v53  ;;  %v2630_v24 = vrot.slane %v6954_v39, 4  ;;  %9100 = vst [vmem:[#allocation78_spill] sm:$0xff] %v7326_v58 }
 0x1a4   : > { %6050 = vmatprep.mubr.msk.f32.mxu0 %vm765_vm4, %v7302_v18  ;;  %v2632_v18 = vrot.slane %v6965_v17, 4 }
 0x1a5   : > { %v7335_v60 = vsel %vm838_vm2, %v2628_v62, %v2630_v24  ;;  %v1412_v62 = vsel %vm1409_vm5, %v1410_v59, %v1411_v46  ;;  %v3298_v59 = vrot.slane %v6625_v9, 5 }
 0x1a6   : > { %5833 = vmatmul.mubr.msk.f32.gmra.mxu1 %vm765_vm4, %v6932_v50  ;;  %9101 = vst [vmem:[#allocation79_spill] sm:$0xff] %v7335_v60  ;;  %v7344_v51 = vsel %vm838_vm2, %v2630_v24, %v2632_v18  ;;  %v1414_v24 = vsel %vm1409_vm5, %v1411_v46, %v9103_v49  ;;  %v9105_v46 = vrot.slane %v6998_v33, 4 }
 0x1a7   : > { %6051 = vmatmul.mubr.msk.f32.gmra.mxu0 %vm765_vm4, %v7310_v26  ;;  %5835 = vmatprep.mubr.msk.f32.mxu1 %vm765_vm4, %v6943_v4  ;;  %v2634_v26 = vrot.slane %v6976_v61, 4  ;;  %9102 = vst [vmem:[#allocation80_spill] sm:$0xff] %v7344_v51 }
 0x1a8   : > { %6053 = vmatprep.mubr.msk.f32.mxu0 %vm765_vm4, %v7318_v20  ;;  %v8990_v20 = vrot.slane %v7041_v7, 4 }
 0x1aa   : > { %5836 = vmatmul.mubr.msk.f32.gmra.mxu1 %vm765_vm4, %v6954_v39 }
 0x1ab   : > { %6054 = vmatmul.mubr.msk.f32.gmra.mxu0 %vm765_vm4, %v7326_v58  ;;  %5838 = vmatprep.mubr.msk.f32.mxu1 %vm765_vm4, %v6965_v17  ;;  %v7352_v58 = vsel %vm838_vm2, %v2632_v18, %v2634_v26  ;;  %v7369_v18 = vld [vmem:[%s8929_s2 + $0x18] sm:$0xf] }
 0x1ac   : > { %6056 = vmatprep.mubr.msk.f32.mxu0 %vm765_vm4, %v7335_v60  ;;  %v9104_v60 = vrot.slane %v6987_v45, 4 }
 0x1ae   : > { %5839 = vmatmul.mubr.msk.f32.gmra.mxu1 %vm765_vm4, %v6976_v61 }
 0x1af   : > { %6057 = vmatmul.mubr.msk.f32.gmra.mxu0 %vm765_vm4, %v7344_v51  ;;  %5843 = vmatprep.mubr.msk.f32.mxu1 %vm765_vm4, %v1412_v62  ;;  %v7364_v51 = vsel %vm838_vm2, %v2634_v26, %v9104_v60  ;;  %v7384_v26 = vsel %vm838_vm2, %v9105_v46, %v8990_v20  ;;  %v2209_v60 = vrot.slane %v7041_v7, 3  ;;  %v3297_v62 = vrot.slane %v6614_v3, 5 }
 0x1b0   : > { %6059 = vmatprep.mubr.msk.f32.mxu0 %vm765_vm4, %v7352_v58  ;;  %9106 = vst [vmem:[#allocation81_spill] sm:$0xff] %v7384_v26  ;;  %v9107_v46 = vrot.slane %v6998_v33, 3 }
 0x1b1   : > { %v3299_v49 = vsel %vm3296_vm7, %v3297_v62, %v3298_v59 }
 0x1b2   : > { %5844 = vmatmul.mubr.msk.f32.vlgmr.msra.gmra.mxu1 %vm765_vm4, %v1414_v24  ;;  %v3302_v24 = vrot.slane %v6654_v22, 5  ;;  %v7406_v20 = vsel %vm2137_vm6, %v9107_v46, %v2209_v60  ;;  %v9110_v60 = vrot.slane %v7072_v63, 6  ;;  %v9112_v46 = vld [vmem:[#allocation3_spill] sm:$0xff] }
 0x1b3   : > { %6060 = vmatmul.mubr.msk.f32.gmra.mxu0 %vm765_vm4, %v7364_v51  ;;  %5954 = vmatpush3.msk.msra.mxu1 %vm838_vm2, %v7018_v32  ;;  %v3300_v32 = vrot.slane %v6643_v16, 5 }
 0x1b4   : > { %5846 = vmatprep.mubr.msk.f32.mxu1 %vm765_vm4, %v6612_v2  ;;  %6062 = vmatprep.mubr.msk.f32.mxu0 %vm765_vm4, %v7025_v38  ;;  %v3796_v2 = vrot.slane %v7041_v7, 6  ;;  %v9123_v38 = vld [vmem:[#allocation14_spill] sm:$0xff] }
 0x1b5   : > { %6065 = vmatprep.subr.msk.mxu1 %vm838_vm2, %v7369_v18  ;;  %v3301_v7 = vsel %vm3296_vm7, %v3298_v59, %v3300_v32  ;;  %v3303_v62 = vsel %vm3296_vm7, %v3300_v32, %v3302_v24 }
 0x1b6   : > { %5847 = vmatmul.mubr.msk.f32.gmra.mxu1 %vm765_vm4, %v6623_v8  ;;  %v3304_v8 = vrot.slane %v6670_v29, 5  ;;  %v7433_v32 = vsel %vm3728_vm8, %v3796_v2, %v9110_v60  ;;  %v3318_v60 = vrot.slane %v6747_v19, 5 }
 0x1b7   : > { %6063 = vmatmul.mubr.msk.f32.gmra.mxu0 %vm765_vm4, %v7384_v26  ;;  %5849 = vmatprep.mubr.msk.f32.mxu1 %vm765_vm4, %v6639_v15  ;;  %v3306_v15 = vrot.slane %v6681_v35, 5  ;;  %9111 = vst [vmem:[#allocation83_spill] sm:$0xff] %v7433_v32  ;;  %v9118_v32 = vld [vmem:[#allocation9_spill] sm:$0xff] }
 0x1b8   : > { %6123 = vmatprep.mubr.msk.f32.mxu0 %vm765_vm4, %v3299_v49  ;;  %v9108_v49 = vrot.slane %v6998_v33, 6  ;;  %v3305_v59 = vsel %vm3296_vm7, %v3302_v24, %v3304_v8  ;;  %v3310_v33 = vrot.slane %v6703_v47, 5  ;;  %v3312_v24 = vrot.slane %v6714_v55, 5 }
 0x1ba   : > { %5850 = vmatmul.mubr.msk.f32.gmra.mxu1 %vm765_vm4, %v6652_v21  ;;  %v7418_v26 = vsel %vm3728_vm8, %v9108_v49, %v3796_v2  ;;  %v3308_v21 = vrot.slane %v6692_v41, 5  ;;  %v3314_v2 = vrot.slane %v6725_v0, 5  ;;  %v3316_v49 = vrot.slane %v6736_v10, 5 }
 0x1bb   : > { %6124 = vmatmul.mubr.msk.f32.vlgmr.msra.gmra.mxu0 %vm765_vm4, %v3301_v7  ;;  %9109 = vst [vmem:[#allocation82_spill] sm:$0xff] %v7418_v26  ;;  %5852 = vmatprep.mubr.msk.f32.mxu1 %vm765_vm4, %v6667_v28  ;;  %v3307_v7 = vsel %vm3296_vm7, %v3304_v8, %v3306_v15  ;;  %v7438_v28 = vpop.f32.mrf.mxu1 }
 0x1bc   : > { %6126 = vmatprep.mubr.msk.f32.mxu0 %vm765_vm4, %v3303_v62  ;;  %v3311_v8 = vsel %vm3296_vm7, %v3308_v21, %v3310_v33  ;;  %v9113_v62 = vld [vmem:[#allocation4_spill] sm:$0xff] }
 0x1be   : > { %5853 = vmatmul.mubr.msk.f32.gmra.mxu1 %vm765_vm4, %v6679_v34  ;;  %v3309_v34 = vsel %vm3296_vm7, %v3306_v15, %v3308_v21  ;;  %v3313_v15 = vsel %vm3296_vm7, %v3310_v33, %v3312_v24  ;;  %v3315_v21 = vsel %vm3296_vm7, %v3312_v24, %v3314_v2  ;;  %v3317_v33 = vsel %vm3296_vm7, %v3314_v2, %v3316_v49 }
 0x1bf   : > { %6127 = vmatmul.mubr.msk.f32.gmra.mxu0 %vm765_vm4, %v3305_v59  ;;  %5855 = vmatprep.mubr.msk.f32.mxu1 %vm765_vm4, %v6690_v40  ;;  %v7450_v40 = vpop.f32.mrf.mxu1  ;;  %v3319_v24 = vsel %vm3296_vm7, %v3316_v49, %v3318_v60 }
 0x1c0   : > { %6129 = vmatprep.mubr.msk.f32.mxu0 %vm765_vm4, %v3307_v7  ;;  %v9114_v7 = vld [vmem:[#allocation5_spill] sm:$0xff] }
 0x1c1   : > { %v7454_v59 = vpop.f32.mrf.mxu1 }
 0x1c2   : > { %5856 = vmatmul.mubr.msk.f32.gmra.mxu1 %vm765_vm4, %v9112_v46  ;;  %v3320_v46 = vrot.slane %v6760_v31, 5 }
 0x1c3   : > { %6130 = vmatmul.mubr.msk.f32.gmra.mxu0 %vm765_vm4, %v3309_v34  ;;  %5858 = vmatprep.mubr.msk.f32.mxu1 %vm765_vm4, %v9113_v62  ;;  %v9115_v34 = vld [vmem:[#allocation6_spill] sm:$0xff]  ;;  %v9116_v62 = vld [vmem:[#allocation7_spill] sm:$0xff] }
 0x1c4   : > { %6132 = vmatprep.mubr.msk.f32.mxu0 %vm765_vm4, %v3311_v8  ;;  %v7466_v8 = vpop.f32.mrf.mxu1  ;;  %v3321_v2 = vsel %vm3296_vm7, %v3318_v60, %v3320_v46 }
 0x1c6   : > { %5859 = vmatmul.mubr.msk.f32.gmra.mxu1 %vm765_vm4, %v9114_v7  ;;  %v9117_v7 = vld [vmem:[#allocation8_spill] sm:$0xff] }
 0x1c7   : > { %6133 = vmatmul.mubr.msk.f32.gmra.mxu0 %vm765_vm4, %v3313_v15  ;;  %5861 = vmatprep.mubr.msk.f32.mxu1 %vm765_vm4, %v9115_v34  ;;  %v3322_v15 = vrot.slane %v6771_v42, 5  ;;  %v3324_v34 = vrot.slane %v6782_v57, 5 }
 0x1c8   : > { %6135 = vmatprep.mubr.msk.f32.mxu0 %vm765_vm4, %v3315_v21  ;;  %v7476_v21 = vpop.f32.mrf.mxu1 }
 0x1c9   : > { %v3323_v49 = vsel %vm3296_vm7, %v3320_v46, %v3322_v15  ;;  %v3325_v60 = vsel %vm3296_vm7, %v3322_v15, %v3324_v34 }
 0x1ca   : > { %5862 = vmatmul.mubr.msk.f32.gmra.mxu1 %vm765_vm4, %v9116_v62  ;;  %v9119_v62 = vld [vmem:[#allocation10_spill] sm:$0xff] }
 0x1cb   : > { %6136 = vmatmul.mubr.msk.f32.gmra.mxu0 %vm765_vm4, %v3317_v33  ;;  %5864 = vmatprep.mubr.msk.f32.mxu1 %vm765_vm4, %v9117_v7  ;;  %v3326_v33 = vrot.slane %v6793_v6, 5  ;;  %v3328_v7 = vrot.slane %v6804_v23, 5 }
 0x1cc   : > { %6138 = vmatprep.mubr.msk.f32.mxu0 %vm765_vm4, %v3319_v24  ;;  %v7488_v24 = vpop.f32.mrf.mxu1 }
 0x1cd   : > { %v3327_v46 = vsel %vm3296_vm7, %v3324_v34, %v3326_v33  ;;  %v3329_v15 = vsel %vm3296_vm7, %v3326_v33, %v3328_v7 }
 0x1ce   : > { %5865 = vmatmul.mubr.msk.f32.gmra.mxu1 %vm765_vm4, %v9118_v32  ;;  %v7492_v26 = vpop.f32.mrf.mxu1  ;;  %v9120_v32 = vld [vmem:[#allocation11_spill] sm:$0xff] }
 0x1cf   : > { %6139 = vmatmul.mubr.msk.f32.gmra.mxu0 %vm765_vm4, %v3321_v2  ;;  %5867 = vmatprep.mubr.msk.f32.mxu1 %vm765_vm4, %v9119_v62  ;;  %v3330_v2 = vrot.slane %v6815_v36, 5  ;;  %v9121_v62 = vld [vmem:[#allocation12_spill] sm:$0xff] }
 0x1d0   : > { %6141 = vmatprep.mubr.msk.f32.mxu0 %vm765_vm4, %v3323_v49  ;;  %v3332_v49 = vrot.slane %v6826_v48, 5  ;;  %v7504_v63 = vpop.f32.mrf.mxu1 }
 0x1d1   : > { %9122 = vst [vmem:[#allocation3_spill] sm:$0xff] %v7504_v63  ;;  %v3331_v34 = vsel %vm3296_vm7, %v3328_v7, %v3330_v2  ;;  %v9126_v63 = vld [vmem:[#allocation18_spill] sm:$0xff]  ;;  %v3338_v7 = vrot.slane %v6859_v43, 5 }
 0x1d2   : > { %5868 = vmatmul.mubr.msk.f32.gmra.mxu1 %vm765_vm4, %v9120_v32  ;;  %v9124_v32 = vld [vmem:[#allocation16_spill] sm:$0xff]  ;;  %v3333_v33 = vsel %vm3296_vm7, %v3330_v2, %v3332_v49 }
 0x1d3   : > { %6142 = vmatmul.mubr.msk.f32.gmra.mxu0 %vm765_vm4, %v3325_v60  ;;  %5870 = vmatprep.mubr.msk.f32.mxu1 %vm765_vm4, %v9121_v62  ;;  %v3334_v60 = vrot.slane %v6837_v1, 5  ;;  %v3336_v62 = vrot.slane %v6848_v25, 5 }
 0x1d4   : > { %6144 = vmatprep.mubr.msk.f32.mxu0 %vm765_vm4, %v3327_v46  ;;  %v7514_v46 = vpop.f32.mrf.mxu1 }
 0x1d5   : > { %9125 = vst [vmem:[#allocation4_spill] sm:$0xff] %v7514_v46  ;;  %v3337_v2 = vsel %vm3296_vm7, %v3334_v60, %v3336_v62 }
 0x1d6   : > { %5871 = vmatmul.mubr.msk.f32.gmra.mxu1 %vm765_vm4, %v9123_v38  ;;  %v3335_v38 = vsel %vm3296_vm7, %v3332_v49, %v3334_v60  ;;  %v3339_v49 = vsel %vm3296_vm7, %v3336_v62, %v3338_v7 }
 0x1d7   : > { %6145 = vmatmul.mubr.msk.f32.gmra.mxu0 %vm765_vm4, %v3329_v15  ;;  %5873 = vmatprep.mubr.msk.f32.mxu1 %vm765_vm4, %v9124_v32  ;;  %v9127_v15 = vld [vmem:[#allocation20_spill] sm:$0xff]  ;;  %v3340_v32 = vrot.slane %v6877_v11, 5 }
 0x1d8   : > { %6147 = vmatprep.mubr.msk.f32.mxu0 %vm765_vm4, %v3331_v34  ;;  %v7526_v34 = vpop.f32.mrf.mxu1 }
 0x1d9   : > { %9128 = vst [vmem:[#allocation5_spill] sm:$0xff] %v7526_v34  ;;  %v3341_v60 = vsel %vm3296_vm7, %v3338_v7, %v3340_v32 }
 0x1da   : > { %5874 = vmatmul.mubr.msk.f32.gmra.mxu1 %vm765_vm4, %v9126_v63  ;;  %v7530_v46 = vpop.f32.mrf.mxu1  ;;  %v9130_v63 = vld [vmem:[#allocation22_spill] sm:$0xff] }
 0x1db   : > { %6148 = vmatmul.mubr.msk.f32.gmra.mxu0 %vm765_vm4, %v3333_v33  ;;  %5876 = vmatprep.mubr.msk.f32.mxu1 %vm765_vm4, %v9127_v15  ;;  %9129 = vst [vmem:[#allocation6_spill] sm:$0xff] %v7530_v46  ;;  %v3342_v33 = vrot.slane %v6888_v37, 5  ;;  %v9131_v15 = vld [vmem:[#allocation24_spill] sm:$0xff]  ;;  %v9133_v46 = vld [vmem:[#allocation26_spill] sm:$0xff] }
 0x1dc   : > { %6150 = vmatprep.mubr.msk.f32.mxu0 %vm765_vm4, %v3335_v38  ;;  %v3344_v38 = vrot.slane %v6899_v44, 5  ;;  %v7542_v34 = vpop.f32.mrf.mxu1 }
 0x1dd   : > { %9132 = vst [vmem:[#allocation7_spill] sm:$0xff] %v7542_v34  ;;  %v3343_v62 = vsel %vm3296_vm7, %v3340_v32, %v3342_v33  ;;  %v9136_v34 = vld [vmem:[#allocation30_spill] sm:$0xff]  ;;  %v3350_v32 = vrot.slane %v6932_v50, 5 }
 0x1de   : > { %5877 = vmatmul.mubr.msk.f32.gmra.mxu1 %vm765_vm4, %v9130_v63  ;;  %v9134_v63 = vld [vmem:[#allocation28_spill] sm:$0xff]  ;;  %v3345_v7 = vsel %vm3296_vm7, %v3342_v33, %v3344_v38 }
 0x1df   : > { %6151 = vmatmul.mubr.msk.f32.gmra.mxu0 %vm765_vm4, %v3337_v2  ;;  %5879 = vmatprep.mubr.msk.f32.mxu1 %vm765_vm4, %v9131_v15  ;;  %v3346_v2 = vrot.slane %v6910_v12, 5  ;;  %v3348_v15 = vrot.slane %v6921_v53, 5 }
 0x1e0   : > { %6153 = vmatprep.mubr.msk.f32.mxu0 %vm765_vm4, %v3339_v49  ;;  %v7552_v49 = vpop.f32.mrf.mxu1 }
 0x1e1   : > { %9135 = vst [vmem:[#allocation8_spill] sm:$0xff] %v7552_v49  ;;  %v3349_v33 = vsel %vm3296_vm7, %v3346_v2, %v3348_v15 }
 0x1e2   : > { %5880 = vmatmul.mubr.msk.f32.gmra.mxu1 %vm765_vm4, %v9133_v46  ;;  %v3347_v46 = vsel %vm3296_vm7, %v3344_v38, %v3346_v2  ;;  %v3351_v38 = vsel %vm3296_vm7, %v3348_v15, %v3350_v32 }
 0x1e3   : > { %6154 = vmatmul.mubr.msk.f32.gmra.mxu0 %vm765_vm4, %v3341_v60  ;;  %5882 = vmatprep.mubr.msk.f32.mxu1 %vm765_vm4, %v9134_v63  ;;  %v9137_v60 = vld [vmem:[#allocation32_spill] sm:$0xff]  ;;  %v3352_v63 = vrot.slane %v6943_v4, 5 }
 0x1e4   : > { %6156 = vmatprep.mubr.msk.f32.mxu0 %vm765_vm4, %v3343_v62  ;;  %v7564_v62 = vpop.f32.mrf.mxu1 }
 0x1e5   : > { %9138 = vst [vmem:[#allocation9_spill] sm:$0xff] %v7564_v62  ;;  %v3353_v2 = vsel %vm3296_vm7, %v3350_v32, %v3352_v63 }
 0x1e6   : > { %5883 = vmatmul.mubr.msk.f32.gmra.mxu1 %vm765_vm4, %v9136_v34  ;;  %v7568_v49 = vpop.f32.mrf.mxu1  ;;  %v9140_v34 = vld [vmem:[#allocation34_spill] sm:$0xff] }
 0x1e7   : > { %6157 = vmatmul.mubr.msk.f32.gmra.mxu0 %vm765_vm4, %v3345_v7  ;;  %5885 = vmatprep.mubr.msk.f32.mxu1 %vm765_vm4, %v9137_v60  ;;  %9139 = vst [vmem:[#allocation10_spill] sm:$0xff] %v7568_v49  ;;  %v3354_v7 = vrot.slane %v6954_v39, 5  ;;  %v9141_v60 = vld [vmem:[#allocation36_spill] sm:$0xff]  ;;  %v9143_v49 = vld [vmem:[#allocation38_spill] sm:$0xff] }
 0x1e8   : > { %6159 = vmatprep.mubr.msk.f32.mxu0 %vm765_vm4, %v3347_v46  ;;  %v3356_v46 = vrot.slane %v6965_v17, 5  ;;  %v7580_v62 = vpop.f32.mrf.mxu1 }
 0x1e9   : > { %9142 = vst [vmem:[#allocation11_spill] sm:$0xff] %v7580_v62  ;;  %v3355_v15 = vsel %vm3296_vm7, %v3352_v63, %v3354_v7  ;;  %v9148_v62 = vld [vmem:[#allocation44_spill] sm:$0xff] }
 0x1ea   : > { %5886 = vmatmul.mubr.msk.f32.gmra.mxu1 %vm765_vm4, %v9140_v34  ;;  %v9144_v34 = vld [vmem:[#allocation40_spill] sm:$0xff]  ;;  %v3357_v32 = vsel %vm3296_vm7, %v3354_v7, %v3356_v46  ;;  %v2141_v7 = vrot.slane %v6614_v3, 3 }
 0x1eb   : > { %6160 = vmatmul.mubr.msk.f32.gmra.mxu0 %vm765_vm4, %v3349_v33  ;;  %5888 = vmatprep.mubr.msk.f32.mxu1 %vm765_vm4, %v9141_v60  ;;  %v3358_v33 = vrot.slane %v6976_v61, 5  ;;  %v9146_v60 = vld [vmem:[#allocation42_spill] sm:$0xff] }
 0x1ec   : > { %6162 = vmatprep.mubr.msk.f32.mxu0 %vm765_vm4, %v3351_v38  ;;  %v7590_v38 = vpop.f32.mrf.mxu1 }
 0x1ed   : > { %9145 = vst [vmem:[#allocation12_spill] sm:$0xff] %v7590_v38  ;;  %v9149_v38 = vrot.slane %v6987_v45, 5 }
 0x1ee   : > { %5889 = vmatmul.mubr.msk.f32.gmra.mxu1 %vm765_vm4, %v9143_v49  ;;  %v3359_v49 = vsel %vm3296_vm7, %v3356_v46, %v3358_v33  ;;  %v9150_v46 = vld [vmem:[#allocation46_spill] sm:$0xff] }
 0x1ef   : > { %6163 = vmatmul.mubr.msk.f32.gmra.mxu0 %vm765_vm4, %v3353_v2  ;;  %5891 = vmatprep.mubr.msk.f32.mxu1 %vm765_vm4, %v9144_v34  ;;  %v9147_v2 = vld [vmem:[#allocation2_spill] sm:$0xff]  ;;  %v7601_v34 = vpop.f32.mrf.mxu1 }
 0x1f0   : > { %6165 = vmatprep.mubr.msk.f32.mxu0 %vm765_vm4, %v3355_v15  ;;  %v2139_v63 = vrot.slane %v9147_v2, 3  ;;  %v2138_v15 = vrot.slane %v6596_v56, 3  ;;  %v9151_v56 = vld [vmem:[#allocation48_spill] sm:$0xff] }
 0x1f2   : > { %5892 = vmatmul.mubr.msk.f32.gmra.mxu1 %vm765_vm4, %v9146_v60  ;;  %v3361_v60 = vsel %vm3296_vm7, %v3358_v33, %v9149_v38  ;;  %v2142_v2 = vsel %vm2137_vm6, %v2139_v63, %v2141_v7  ;;  %v2145_v33 = vrot.slane %v6643_v16, 3  ;;  %v7623_v38 = vld [vmem:[%s8929_s2 + $0x20] sm:$0xf] }
 0x1f3   : > { %6166 = vmatmul.mubr.msk.f32.gmra.mxu0 %vm765_vm4, %v3357_v32  ;;  %5894 = vmatprep.mubr.msk.f32.mxu1 %vm765_vm4, %v9148_v62  ;;  %v7608_v32 = vpop.f32.mrf.mxu1  ;;  %v2140_v62 = vsel %vm2137_vm6, %v2138_v15, %v2139_v63 }
 0x1f4   : > { %6168 = vmatprep.mubr.msk.f32.mxu0 %vm765_vm4, %v3359_v49  ;;  %v2143_v49 = vrot.slane %v6625_v9, 3 }
 0x1f6   : > { %5895 = vmatmul.mubr.msk.f32.gmra.mxu1 %vm765_vm4, %v9150_v46  ;;  %v7625_v46 = vpop.f32.mrf.mxu1  ;;  %v2144_v15 = vsel %vm2137_vm6, %v2141_v7, %v2143_v49  ;;  %v2151_v7 = vrot.slane %v6681_v35, 3 }
 0x1f7   : > { %6169 = vmatmul.mubr.msk.f32.gmra.mxu0 %vm765_vm4, %v3361_v60  ;;  %5955 = vmatprep.mubr.msk.f32.mxu1 %vm765_vm4, %v2140_v62  ;;  %v2147_v60 = vrot.slane %v6654_v22, 3  ;;  %v2146_v62 = vsel %vm2137_vm6, %v2143_v49, %v2145_v33 }
 0x1f8   : > { %6171 = vmatprep.mubr.msk.f32.mxu0 %vm765_vm4, %v9151_v56  ;;  %v7635_v63 = vpop.f32.mrf.mxu1 }
 0x1fa   : > { %5956 = vmatmul.mubr.msk.f32.vlgmr.msra.gmra.mxu1 %vm765_vm4, %v2142_v2  ;;  %v7649_v56 = vpop.f32.mrf.mxu1  ;;  %v2153_v2 = vrot.slane %v6692_v41, 3 }
 0x1fb   : > { %6172 = vmatmul.mubr.msk.f32.gmra.mxu0 %vm765_vm4, %v7140_v13  ;;  %6066 = vmatpush3.msk.msra.mxu1 %vm838_vm2, %v7369_v18  ;;  %v2149_v13 = vrot.slane %v6670_v29, 3  ;;  %v2148_v18 = vsel %vm2137_vm6, %v2145_v33, %v2147_v60  ;;  %9152 = vst [vmem:[#allocation14_spill] sm:$0xff] %v7649_v56  ;;  %v7659_v33 = vpop.f32.mrf.mxu0 }
 0x1fc   : > { %5958 = vmatprep.mubr.msk.f32.mxu1 %vm765_vm4, %v2144_v15  ;;  %6174 = vmatprep.mubr.msk.f32.mxu0 %vm765_vm4, %v7147_v52  ;;  %v7653_v49 = vpop.f32.mrf.mxu1  ;;  %9154 = vst [vmem:[#allocation18_spill] sm:$0xff] %v7659_v33 }
 0x1fd   : > { %6177 = vmatprep.subr.msk.mxu1 %vm838_vm2, %v7623_v38  ;;  %v2150_v52 = vsel %vm2137_vm6, %v2147_v60, %v2149_v13  ;;  %9153 = vst [vmem:[#allocation16_spill] sm:$0xff] %v7653_v49  ;;  %v2152_v15 = vsel %vm2137_vm6, %v2149_v13, %v2151_v7  ;;  %v7669_v13 = vpop.f32.mrf.mxu0 }
 0x1fe   : > { %5959 = vmatmul.mubr.msk.f32.gmra.mxu1 %vm765_vm4, %v2146_v62  ;;  %v2154_v62 = vsel %vm2137_vm6, %v2151_v7, %v2153_v2  ;;  %v7663_v56 = vpop.f32.mrf.mxu1  ;;  %9156 = vst [vmem:[#allocation22_spill] sm:$0xff] %v7669_v13  ;;  %v2161_v7 = vrot.slane %v6736_v10, 3  ;;  %v2165_v13 = vrot.slane %v6760_v31, 3 }
 0x1ff   : > { %6175 = vmatmul.mubr.msk.f32.gmra.mxu0 %vm765_vm4, %v7083_v54  ;;  %5961 = vmatprep.mubr.msk.f32.mxu1 %vm765_vm4, %v2148_v18  ;;  %v2155_v54 = vrot.slane %v6703_v47, 3  ;;  %v2157_v18 = vrot.slane %v6714_v55, 3  ;;  %9155 = vst [vmem:[#allocation20_spill] sm:$0xff] %v7663_v56  ;;  %v7675_v33 = vpop.f32.mrf.mxu0 }
 0x200   : > { %v7671_v49 = vpop.f32.mrf.mxu1  ;;  %9158 = vst [vmem:[#allocation26_spill] sm:$0xff] %v7675_v33 }
 0x201   : > { %v2156_v60 = vsel %vm2137_vm6, %v2153_v2, %v2155_v54  ;;  %9157 = vst [vmem:[#allocation24_spill] sm:$0xff] %v7671_v49  ;;  %v2163_v2 = vrot.slane %v6747_v19, 3  ;;  %v7685_v49 = vpop.f32.mrf.mxu0 }
 0x202   : > { %5962 = vmatmul.mubr.msk.f32.gmra.mxu1 %vm765_vm4, %v2150_v52  ;;  %v2159_v52 = vrot.slane %v6725_v0, 3  ;;  %v7681_v56 = vpop.f32.mrf.mxu1  ;;  %9160 = vst [vmem:[#allocation30_spill] sm:$0xff] %v7685_v49 }
 0x203   : > { %5964 = vmatprep.mubr.msk.f32.mxu1 %vm765_vm4, %v2152_v15  ;;  %v2158_v15 = vsel %vm2137_vm6, %v2155_v54, %v2157_v18  ;;  %9159 = vst [vmem:[#allocation28_spill] sm:$0xff] %v7681_v56  ;;  %v7693_v33 = vpop.f32.mrf.mxu0 }
 0x204   : > { %9162 = vst [vmem:[#allocation34_spill] sm:$0xff] %v7693_v33 }
 0x206   : > { %5965 = vmatmul.mubr.msk.f32.gmra.mxu1 %vm765_vm4, %v2154_v62  ;;  %v2160_v62 = vsel %vm2137_vm6, %v2157_v18, %v2159_v52  ;;  %v7687_v54 = vpop.f32.mrf.mxu1  ;;  %v2167_v18 = vrot.slane %v6771_v42, 3 }
 0x207   : > { %5967 = vmatprep.mubr.msk.f32.mxu1 %vm765_vm4, %v2156_v60  ;;  %v2162_v60 = vsel %vm2137_vm6, %v2159_v52, %v2161_v7  ;;  %9161 = vst [vmem:[#allocation32_spill] sm:$0xff] %v7687_v54  ;;  %v2169_v52 = vrot.slane %v6782_v57, 3 }
 0x208   : > { %v7697_v56 = vpop.f32.mrf.mxu1  ;;  %v2168_v49 = vsel %vm2137_vm6, %v2165_v13, %v2167_v18 }
 0x209   : > { %9163 = vst [vmem:[#allocation36_spill] sm:$0xff] %v7697_v56 }
 0x20a   : > { %5968 = vmatmul.mubr.msk.f32.gmra.mxu1 %vm765_vm4, %v2158_v15  ;;  %v2164_v15 = vsel %vm2137_vm6, %v2161_v7, %v2163_v2  ;;  %v7703_v7 = vpop.f32.mrf.mxu0 }
 0x20b   : > { %5970 = vmatprep.mubr.msk.f32.mxu1 %vm765_vm4, %v2160_v62  ;;  %v2166_v62 = vsel %vm2137_vm6, %v2163_v2, %v2165_v13  ;;  %9164 = vst [vmem:[#allocation38_spill] sm:$0xff] %v7703_v7  ;;  %v2173_v2 = vrot.slane %v6804_v23, 3  ;;  %v2175_v13 = vrot.slane %v6815_v36, 3  ;;  %v2177_v7 = vrot.slane %v6826_v48, 3 }
 0x20c   : > { %v7709_v33 = vpop.f32.mrf.mxu0 }
 0x20d   : > { %9166 = vst [vmem:[#allocation42_spill] sm:$0xff] %v7709_v33 }
 0x20e   : > { %5971 = vmatmul.mubr.msk.f32.gmra.mxu1 %vm765_vm4, %v2162_v60  ;;  %v2171_v60 = vrot.slane %v6793_v6, 3  ;;  %v7705_v54 = vpop.f32.mrf.mxu1 }
 0x20f   : > { %5973 = vmatprep.mubr.msk.f32.mxu1 %vm765_vm4, %v2164_v15  ;;  %9165 = vst [vmem:[#allocation40_spill] sm:$0xff] %v7705_v54  ;;  %v2170_v15 = vsel %vm2137_vm6, %v2167_v18, %v2169_v52  ;;  %v7719_v54 = vpop.f32.mrf.mxu0 }
 0x210   : > { %v7715_v56 = vpop.f32.mrf.mxu1  ;;  %9168 = vst [vmem:[#allocation44_spill] sm:$0xff] %v7719_v54 }
 0x211   : > { %9167 = vst [vmem:[#allocation2_spill] sm:$0xff] %v7715_v56  ;;  %v7727_v33 = vpop.f32.mrf.mxu0 }
 0x212   : > { %5974 = vmatmul.mubr.msk.f32.gmra.mxu1 %vm765_vm4, %v2166_v62  ;;  %v2172_v62 = vsel %vm2137_vm6, %v2169_v52, %v2171_v60  ;;  %v2179_v52 = vrot.slane %v6837_v1, 3  ;;  %9170 = vst [vmem:[#allocation48_spill] sm:$0xff] %v7727_v33 }
 0x213   : > { %5976 = vmatprep.mubr.msk.f32.mxu1 %vm765_vm4, %v2168_v49  ;;  %v2174_v49 = vsel %vm2137_vm6, %v2171_v60, %v2173_v2  ;;  %v2181_v60 = vrot.slane %v6848_v25, 3  ;;  %v9207_v25 = vld [vmem:[#allocation64_spill] sm:$0xff] }
 0x214   : > { %v2180_v54 = vsel %vm2137_vm6, %v2177_v7, %v2179_v52 }
 0x216   : > { %5977 = vmatmul.mubr.msk.f32.gmra.mxu1 %vm765_vm4, %v2170_v15  ;;  %v7721_v18 = vpop.f32.mrf.mxu1  ;;  %v2176_v15 = vsel %vm2137_vm6, %v2173_v2, %v2175_v13  ;;  %v7737_v2 = vpop.f32.mrf.mxu0 }
 0x217   : > { %5979 = vmatprep.mubr.msk.f32.mxu1 %vm765_vm4, %v2172_v62  ;;  %9169 = vst [vmem:[#allocation46_spill] sm:$0xff] %v7721_v18  ;;  %v2178_v62 = vsel %vm2137_vm6, %v2175_v13, %v2177_v7  ;;  %9172 = vst [vmem:[#allocation85_spill] sm:$0xff] %v7737_v2  ;;  %v2185_v13 = vrot.slane %v6877_v11, 3  ;;  %v2187_v7 = vrot.slane %v6888_v37, 3  ;;  %v2189_v2 = vrot.slane %v6899_v44, 3 }
 0x218   : > { %v7731_v56 = vpop.f32.mrf.mxu1  ;;  %v7743_v33 = vpop.f32.mrf.mxu0 }
 0x219   : > { %9171 = vst [vmem:[#allocation84_spill] sm:$0xff] %v7731_v56  ;;  %9174 = vst [vmem:[#allocation87_spill] sm:$0xff] %v7743_v33 }
 0x21a   : > { %5980 = vmatmul.mubr.msk.f32.gmra.mxu1 %vm765_vm4, %v2174_v49  ;;  %v2183_v49 = vrot.slane %v6859_v43, 3 }
 0x21b   : > { %5982 = vmatprep.mubr.msk.f32.mxu1 %vm765_vm4, %v2176_v15  ;;  %v2182_v15 = vsel %vm2137_vm6, %v2179_v52, %v2181_v60 }
 0x21e   : > { %5983 = vmatmul.mubr.msk.f32.gmra.mxu1 %vm765_vm4, %v2178_v62  ;;  %v7739_v18 = vpop.f32.mrf.mxu1  ;;  %v2184_v62 = vsel %vm2137_vm6, %v2181_v60, %v2183_v49  ;;  %v2191_v60 = vrot.slane %v6910_v12, 3 }
 0x21f   : > { %5985 = vmatprep.mubr.msk.f32.mxu1 %vm765_vm4, %v2180_v54  ;;  %9173 = vst [vmem:[#allocation86_spill] sm:$0xff] %v7739_v18  ;;  %v2186_v54 = vsel %vm2137_vm6, %v2183_v49, %v2185_v13  ;;  %v7753_v18 = vpop.f32.mrf.mxu0  ;;  %v2190_v49 = vsel %vm2137_vm6, %v2187_v7, %v2189_v2 }
 0x220   : > { %v7749_v56 = vpop.f32.mrf.mxu1  ;;  %9176 = vst [vmem:[#allocation89_spill] sm:$0xff] %v7753_v18 }
 0x221   : > { %9175 = vst [vmem:[#allocation88_spill] sm:$0xff] %v7749_v56  ;;  %v7761_v33 = vpop.f32.mrf.mxu0  ;;  %v2193_v56 = vrot.slane %v6921_v53, 3 }
 0x222   : > { %5986 = vmatmul.mubr.msk.f32.gmra.mxu1 %vm765_vm4, %v2182_v15  ;;  %v2188_v15 = vsel %vm2137_vm6, %v2185_v13, %v2187_v7  ;;  %9178 = vst [vmem:[#allocation91_spill] sm:$0xff] %v7761_v33  ;;  %v2195_v13 = vrot.slane %v6932_v50, 3  ;;  %v2197_v7 = vrot.slane %v6943_v4, 3 }
 0x223   : > { %5988 = vmatprep.mubr.msk.f32.mxu1 %vm765_vm4, %v2184_v62  ;;  %v7773_v18 = vpop.f32.mrf.mxu0  ;;  %v2194_v33 = vsel %vm2137_vm6, %v2191_v60, %v2193_v56 }
 0x224   : > { %9180 = vst [vmem:[#allocation93_spill] sm:$0xff] %v7773_v18  ;;  %v2198_v18 = vsel %vm2137_vm6, %v2195_v13, %v2197_v7 }
 0x226   : > { %v7755_v52 = vpop.f32.mrf.mxu1  ;;  %5989 = vmatmul.mubr.msk.f32.gmra.mxu1 %vm765_vm4, %v2186_v54  ;;  %v2192_v54 = vsel %vm2137_vm6, %v2189_v2, %v2191_v60  ;;  %v2196_v2 = vsel %vm2137_vm6, %v2193_v56, %v2195_v13  ;;  %v2201_v60 = vrot.slane %v6965_v17, 3  ;;  %v2203_v56 = vrot.slane %v6976_v61, 3 }
 0x227   : > { %9177 = vst [vmem:[#allocation90_spill] sm:$0xff] %v7755_v52  ;;  %5991 = vmatprep.mubr.msk.f32.mxu1 %vm765_vm4, %v2188_v15 }
 0x228   : > { %v7763_v62 = vpop.f32.mrf.mxu1 }
 0x229   : > { %9179 = vst [vmem:[#allocation92_spill] sm:$0xff] %v7763_v62  ;;  %v7779_v62 = vpop.f32.mrf.mxu0 }
 0x22a   : > { %v7767_v44 = vpop.f32.mrf.mxu1  ;;  %5992 = vmatmul.mubr.msk.f32.gmra.mxu1 %vm765_vm4, %v2190_v49  ;;  %9181 = vst [vmem:[#allocation94_spill] sm:$0xff] %v7779_v62  ;;  %v2199_v49 = vrot.slane %v6954_v39, 3 }
 0x22b   : > { %5994 = vmatprep.mubr.msk.f32.mxu1 %vm765_vm4, %v2192_v54  ;;  %v7791_v50 = vpop.f32.mrf.mxu0 }
 0x22c   : > { %v7775_v15 = vpop.f32.mrf.mxu1  ;;  %9182 = vst [vmem:[#allocation95_spill] sm:$0xff] %v7791_v50  ;;  %v2202_v13 = vsel %vm2137_vm6, %v2199_v49, %v2201_v60  ;;  %v2204_v50 = vsel %vm2137_vm6, %v2201_v60, %v2203_v56 }
 0x22d   : > { %v7799_v62 = vpop.f32.mrf.mxu0 }
 0x22e   : > { %v7781_v53 = vpop.f32.mrf.mxu1  ;;  %5995 = vmatmul.mubr.msk.f32.gmra.mxu1 %vm765_vm4, %v2194_v33  ;;  %v2200_v33 = vsel %vm2137_vm6, %v2197_v7, %v2199_v49  ;;  %9183 = vst [vmem:[#allocation96_spill] sm:$0xff] %v7799_v62  ;;  %v9187_v49 = vld [vmem:[#allocation49_spill] sm:$0xff] }
 0x22f   : > { %5997 = vmatprep.mubr.msk.f32.mxu1 %vm765_vm4, %v2196_v2 }
 0x230   : > { %v7787_v54 = vpop.f32.mrf.mxu1 }
 0x232   : > { %v7793_v4 = vpop.f32.mrf.mxu1  ;;  %5998 = vmatmul.mubr.msk.f32.gmra.mxu1 %vm765_vm4, %v2198_v18  ;;  %v7809_v18 = vpop.f32.mrf.mxu0 }
 0x233   : > { %6000 = vmatprep.mubr.msk.f32.mxu1 %vm765_vm4, %v2200_v33  ;;  %9184 = vst [vmem:[#allocation97_spill] sm:$0xff] %v7809_v18  ;;  %v9185_v33 = vrot.slane %v6987_v45, 3  ;;  %v9197_v45 = vld [vmem:[#allocation58_spill] sm:$0xff] }
 0x234   : > { %v7801_v2 = vpop.f32.mrf.mxu1  ;;  %v7816_v61 = vpop.f32.mrf.mxu0 }
 0x235   : > { %v2206_v62 = vsel %vm2137_vm6, %v2203_v56, %v9185_v33  ;;  %9186 = vst [vmem:[#allocation98_spill] sm:$0xff] %v7816_v61 }
 0x236   : > { %v7804_v39 = vpop.f32.mrf.mxu1  ;;  %6001 = vmatmul.mubr.msk.f32.gmra.mxu1 %vm765_vm4, %v2202_v13 }
 0x237   : > { %6003 = vmatprep.mubr.msk.f32.mxu1 %vm765_vm4, %v2204_v50  ;;  %v7825_v50 = vpop.f32.mrf.mxu0 }
 0x238   : > { %v7811_v7 = vpop.f32.mrf.mxu1  ;;  %9188 = vst [vmem:[#allocation49_spill] sm:$0xff] %v7825_v50  ;;  %v9192_v50 = vld [vmem:[#allocation55_spill] sm:$0xff] }
 0x239   : > { %v7833_v56 = vpop.f32.mrf.mxu0 }
 0x23a   : > { %v7818_v17 = vpop.f32.mrf.mxu1  ;;  %6004 = vmatmul.mubr.msk.f32.gmra.mxu1 %vm765_vm4, %v2206_v62  ;;  %9189 = vst [vmem:[#allocation99_spill] sm:$0xff] %v7833_v56 }
 0x23b   : > { %6006 = vmatprep.mubr.msk.f32.mxu1 %vm765_vm4, %v9187_v49  ;;  %v7845_v49 = vpop.f32.mrf.mxu0 }
 0x23c   : > { %v7823_v60 = vpop.f32.mrf.mxu1  ;;  %9190 = vst [vmem:[#allocation100_spill] sm:$0xff] %v7845_v49  ;;  %v9195_v49 = vld [vmem:[#allocation57_spill] sm:$0xff] }
 0x23e   : > { %v7827_v13 = vpop.f32.mrf.mxu1  ;;  %6007 = vmatmul.mubr.msk.f32.gmra.mxu1 %vm765_vm4, %v7406_v20 }
 0x23f   : > { %6067 = vmatprep.mubr.msk.f32.mxu1 %vm765_vm4, %v7099_v14  ;;  %v7849_v14 = vpop.f32.mrf.mxu0 }
 0x240   : > { %v7835_v33 = vpop.f32.mrf.mxu1  ;;  %9191 = vst [vmem:[#allocation101_spill] sm:$0xff] %v7849_v14 }
 0x242   : > { %v7837_v62 = vpop.f32.mrf.mxu1  ;;  %6068 = vmatmul.mubr.msk.f32.vlgmr.msra.gmra.mxu1 %vm765_vm4, %v7109_v5 }
 0x243   : > { %6178 = vmatpush3.msk.msra.mxu1 %vm838_vm2, %v7623_v38  ;;  %6070 = vmatprep.mubr.msk.f32.mxu1 %vm765_vm4, %v7118_v27  ;;  %v7859_v38 = vpop.f32.mrf.mxu0  ;;  %v9194_v27 = vld [vmem:[#allocation56_spill] sm:$0xff] }
 0x244   : > { %v7847_v20 = vpop.f32.mrf.mxu1  ;;  %9193 = vst [vmem:[#allocation55_spill] sm:$0xff] %v7859_v38 }
 0x245   : > { %v7867_v14 = vpop.f32.mrf.mxu0 }
 0x246   : > { %v7851_v56 = vpop.f32.mrf.mxu1  ;;  %6071 = vmatmul.mubr.msk.f32.gmra.mxu1 %vm765_vm4, %v9192_v50  ;;  %9196 = vst [vmem:[#allocation56_spill] sm:$0xff] %v7867_v14  ;;  %v9202_v14 = vld [vmem:[#allocation61_spill] sm:$0xff] }
 0x247   : > { %6073 = vmatprep.mubr.msk.f32.mxu1 %vm765_vm4, %v7134_v30  ;;  %v9198_v30 = vld [vmem:[#allocation59_spill] sm:$0xff]  ;;  %v7877_v38 = vpop.f32.mrf.mxu0 }
 0x248   : > { %v7857_v5 = vpop.f32.mrf.mxu1  ;;  %9199 = vst [vmem:[#allocation57_spill] sm:$0xff] %v7877_v38  ;;  %v9205_v38 = vld [vmem:[#allocation63_spill] sm:$0xff] }
 0x24a   : > { %v7861_v61 = vpop.f32.mrf.mxu1  ;;  %6074 = vmatmul.mubr.msk.f32.gmra.mxu1 %vm765_vm4, %v9194_v27  ;;  %v7881_v27 = vpop.f32.mrf.mxu0 }
 0x24b   : > { %6076 = vmatprep.mubr.msk.f32.mxu1 %vm765_vm4, %v9195_v49  ;;  %9200 = vst [vmem:[#allocation58_spill] sm:$0xff] %v7881_v27  ;;  %v9201_v49 = vld [vmem:[#allocation60_spill] sm:$0xff] }
 0x24c   : > { %v7869_v18 = vpop.f32.mrf.mxu1 }
 0x24e   : > { %v7871_v50 = vpop.f32.mrf.mxu1  ;;  %6077 = vmatmul.mubr.msk.f32.gmra.mxu1 %vm765_vm4, %v9197_v45  ;;  %v7891_v45 = vpop.f32.mrf.mxu0 }
 0x24f   : > { %6079 = vmatprep.mubr.msk.f32.mxu1 %vm765_vm4, %v9198_v30  ;;  %9203 = vst [vmem:[#allocation59_spill] sm:$0xff] %v7891_v45  ;;  %v9204_v30 = vld [vmem:[#allocation62_spill] sm:$0xff] }
 0x250   : > { %v7879_v52 = vpop.f32.mrf.mxu1  ;;  %v7899_v27 = vpop.f32.mrf.mxu0 }
 0x251   : > { %9206 = vst [vmem:[#allocation60_spill] sm:$0xff] %v7899_v27  ;;  %v9214_v27 = vld [vmem:[#allocation67_spill] sm:$0xff] }
 0x252   : > { %v7883_v12 = vpop.f32.mrf.mxu1  ;;  %6080 = vmatmul.mubr.msk.f32.gmra.mxu1 %vm765_vm4, %v9201_v49  ;;  %v7909_v45 = vpop.f32.mrf.mxu0 }
 0x253   : > { %6082 = vmatprep.mubr.msk.f32.mxu1 %vm765_vm4, %v9202_v14  ;;  %v9208_v14 = vld [vmem:[#allocation65_spill] sm:$0xff]  ;;  %9209 = vst [vmem:[#allocation61_spill] sm:$0xff] %v7909_v45 }
 0x254   : > { %v7889_v37 = vpop.f32.mrf.mxu1  ;;  %v9219_v45 = vld [vmem:[#allocation69_spill] sm:$0xff] }
 0x256   : > { %v7893_v11 = vpop.f32.mrf.mxu1  ;;  %6083 = vmatmul.mubr.msk.f32.gmra.mxu1 %vm765_vm4, %v9204_v30  ;;  %v7913_v30 = vpop.f32.mrf.mxu0 }
 0x257   : > { %6085 = vmatprep.mubr.msk.f32.mxu1 %vm765_vm4, %v9205_v38  ;;  %9211 = vst [vmem:[#allocation63_spill] sm:$0xff] %v7913_v30  ;;  %v9213_v38 = vld [vmem:[#allocation66_spill] sm:$0xff] }
 0x258   : > { %v7901_v43 = vpop.f32.mrf.mxu1 }
 0x25a   : > { %v7903_v49 = vpop.f32.mrf.mxu1  ;;  %6086 = vmatmul.mubr.msk.f32.gmra.mxu1 %vm765_vm4, %v9207_v25  ;;  %v7923_v25 = vpop.f32.mrf.mxu0 }
 0x25b   : > { %6088 = vmatprep.mubr.msk.f32.mxu1 %vm765_vm4, %v9208_v14  ;;  %9216 = vst [vmem:[#allocation66_spill] sm:$0xff] %v7923_v25  ;;  %v9218_v14 = vld [vmem:[#allocation68_spill] sm:$0xff] }
 0x25c   : > { %v7911_v1 = vpop.f32.mrf.mxu1  ;;  %v7931_v30 = vpop.f32.mrf.mxu0 }
 0x25d   : > { %9210 = vst [vmem:[#allocation62_spill] sm:$0xff] %v7911_v1  ;;  %9220 = vst [vmem:[#allocation68_spill] sm:$0xff] %v7931_v30  ;;  %v9223_v1 = vld [vmem:[#allocation70_spill] sm:$0xff]  ;;  %v9230_v30 = vld [vmem:[#allocation73_spill] sm:$0xff] }
 0x25e   : > { %v7915_v48 = vpop.f32.mrf.mxu1  ;;  %6089 = vmatmul.mubr.msk.f32.gmra.mxu1 %vm765_vm4, %v9213_v38  ;;  %v7941_v25 = vpop.f32.mrf.mxu0 }
 0x25f   : > { %9212 = vst [vmem:[#allocation64_spill] sm:$0xff] %v7915_v48  ;;  %6091 = vmatprep.mubr.msk.f32.mxu1 %vm765_vm4, %v9214_v27  ;;  %v9224_v27 = vld [vmem:[#allocation71_spill] sm:$0xff]  ;;  %9225 = vst [vmem:[#allocation70_spill] sm:$0xff] %v7941_v25 }
 0x260   : > { %v7921_v36 = vpop.f32.mrf.mxu1  ;;  %v9235_v25 = vld [vmem:[#allocation75_spill] sm:$0xff] }
 0x261   : > { %9215 = vst [vmem:[#allocation65_spill] sm:$0xff] %v7921_v36 }
 0x262   : > { %v7925_v23 = vpop.f32.mrf.mxu1  ;;  %6092 = vmatmul.mubr.msk.f32.gmra.mxu1 %vm765_vm4, %v9218_v14  ;;  %v7945_v14 = vpop.f32.mrf.mxu0 }
 0x263   : > { %9217 = vst [vmem:[#allocation67_spill] sm:$0xff] %v7925_v23  ;;  %6094 = vmatprep.mubr.msk.f32.mxu1 %vm765_vm4, %v9219_v45  ;;  %9227 = vst [vmem:[#allocation103_spill] sm:$0xff] %v7945_v14  ;;  %v9229_v45 = vld [vmem:[#allocation72_spill] sm:$0xff] }
 0x264   : > { %v7933_v48 = vpop.f32.mrf.mxu1 }
 0x265   : > { %9221 = vst [vmem:[#allocation69_spill] sm:$0xff] %v7933_v48 }
 0x266   : > { %v7935_v38 = vpop.f32.mrf.mxu1  ;;  %6095 = vmatmul.mubr.msk.f32.gmra.mxu1 %vm765_vm4, %v9223_v1  ;;  %v7955_v1 = vpop.f32.mrf.mxu0 }
 0x267   : > { %9222 = vst [vmem:[#allocation102_spill] sm:$0xff] %v7935_v38  ;;  %6097 = vmatprep.mubr.msk.f32.mxu1 %vm765_vm4, %v9224_v27  ;;  %9232 = vst [vmem:[#allocation73_spill] sm:$0xff] %v7955_v1  ;;  %v9234_v27 = vld [vmem:[#allocation74_spill] sm:$0xff]  ;;  %v1229_v1 = vadd.f32 %v7775_v15, %v7450_v40  ;;  %v9241_v15 = vld [vmem:[#allocation79_spill] sm:$0xff] }
 0x268   : > { %v7943_v23 = vpop.f32.mrf.mxu1 }
 0x269   : > { %9226 = vst [vmem:[#allocation71_spill] sm:$0xff] %v7943_v23  ;;  %v9238_v23 = vld [vmem:[#allocation76_spill] sm:$0xff] }
 0x26a   : > { %v7947_v36 = vpop.f32.mrf.mxu1  ;;  %6098 = vmatmul.mubr.msk.f32.gmra.mxu1 %vm765_vm4, %v9229_v45  ;;  %v1234_v45 = vadd.f32 %v7767_v44, %v7438_v28 }
 0x26b   : > { %9228 = vst [vmem:[#allocation104_spill] sm:$0xff] %v7947_v36  ;;  %6100 = vmatprep.mubr.msk.f32.mxu1 %vm765_vm4, %v9230_v30  ;;  %v7967_v36 = vpop.f32.mrf.mxu0 }
 0x26c   : > { %v7953_v38 = vpop.f32.mrf.mxu1  ;;  %9237 = vst [vmem:[#allocation75_spill] sm:$0xff] %v7967_v36  ;;  %v9240_v36 = vld [vmem:[#allocation78_spill] sm:$0xff] }
 0x26d   : > { %9231 = vst [vmem:[#allocation72_spill] sm:$0xff] %v7953_v38  ;;  %v7981_v44 = vpop.f32.mrf.mxu0 }
 0x26e   : > { %v7957_v48 = vpop.f32.mrf.mxu1  ;;  %6101 = vmatmul.mubr.msk.f32.gmra.mxu1 %vm765_vm4, %v9234_v27  ;;  %v9239_v27 = vld [vmem:[#allocation77_spill] sm:$0xff] }
 0x26f   : > { %9233 = vst [vmem:[#allocation105_spill] sm:$0xff] %v7957_v48  ;;  %6103 = vmatprep.mubr.msk.f32.mxu1 %vm765_vm4, %v9235_v25 }
 0x270   : > { %v7963_v14 = vpop.f32.mrf.mxu1 }
 0x271   : > { %9236 = vst [vmem:[#allocation74_spill] sm:$0xff] %v7963_v14  ;;  %v1244_v14 = vadd.f32 %v7781_v53, %v7454_v59  ;;  %v1254_v53 = vadd.f32 %v7793_v4, %v7476_v21  ;;  %v1264_v4 = vadd.f32 %v7804_v39, %v7492_v26 }
 0x272   : > { %v5845_v30 = vpop.f32.mrf.mxu1  ;;  %6104 = vmatmul.mubr.msk.f32.gmra.mxu1 %vm765_vm4, %v9238_v23  ;;  %v1239_v23 = vadd.f32 %v7787_v54, %v7466_v8 }
 0x273   : > { %v7973_v48 = vadd.f32 %v5845_v30, %v1234_v45  ;;  %6106 = vmatprep.mubr.msk.f32.mxu1 %vm765_vm4, %v9239_v27  ;;  %v9242_v27 = vld [vmem:[#allocation80_spill] sm:$0xff] }
 0x274   : > { %v1624_v25 = vpop.f32.mrf.mxu1 }
 0x275   : > { %v7979_v38 = vadd.f32 %v1624_v25, %v1229_v1  ;;  %v7995_v1 = vpop.f32.mrf.mxu0 }
 0x276   : > { %v5848_v28 = vpop.f32.mrf.mxu1  ;;  %6107 = vmatmul.mubr.msk.f32.gmra.mxu1 %vm765_vm4, %v9240_v36  ;;  %v1249_v36 = vadd.f32 %v7801_v2, %v7488_v24 }
 0x277   : > { %v7987_v40 = vadd.f32 %v5848_v28, %v1244_v14  ;;  %6109 = vmatprep.mubr.msk.f32.mxu1 %vm765_vm4, %v9241_v15  ;;  %v8009_v14 = vpop.f32.mrf.mxu0  ;;  %v9243_v28 = vld [vmem:[#allocation3_spill] sm:$0xff]  ;;  %v9245_v15 = vld [vmem:[#allocation4_spill] sm:$0xff] }
 0x278   : > { %v1634_v45 = vpop.f32.mrf.mxu1  ;;  %v1259_v24 = vadd.f32 %v7811_v7, %v9243_v28  ;;  %v1274_v39 = vadd.f32 %v7818_v17, %v9245_v15  ;;  %v9249_v7 = vld [vmem:[#allocation50_spill] sm:$0xff] }
 0x279   : > { %v7993_v59 = vadd.f32 %v1634_v45, %v1239_v23  ;;  %v9244_v23 = vld [vmem:[#allocation47_spill] sm:$0xff]  ;;  %v8023_v45 = vpop.f32.mrf.mxu0  ;;  %v9252_v15 = vld [vmem:[#allocation6_spill] sm:$0xff] }
 0x27a   : > { %v5851_v30 = vpop.f32.mrf.mxu1  ;;  %6110 = vmatmul.mubr.msk.f32.gmra.mxu1 %vm765_vm4, %v9242_v27 }
 0x27b   : > { %v8001_v8 = vadd.f32 %v5851_v30, %v1254_v53  ;;  %6112 = vmatprep.mubr.msk.f32.mxu1 %vm765_vm4, %v7352_v58  ;;  %v9246_v30 = vld [vmem:[#allocation81_spill] sm:$0xff] }
 0x27c   : > { %v1644_v54 = vpop.f32.mrf.mxu1 }
 0x27d   : > { %v8007_v21 = vadd.f32 %v1644_v54, %v1249_v36  ;;  %v9250_v36 = vrot.slane %v9249_v7, 4  ;;  %v9253_v7 = vld [vmem:[#allocation53_spill] sm:$0xff] }
 0x27e   : > { %v5854_v25 = vpop.f32.mrf.mxu1  ;;  %6113 = vmatmul.mubr.msk.f32.gmra.mxu1 %vm765_vm4, %v7364_v51  ;;  %v9247_v51 = vld [vmem:[#allocation52_spill] sm:$0xff] }
 0x27f   : > { %v8015_v2 = vadd.f32 %v5854_v25, %v1264_v4  ;;  %6115 = vmatprep.mubr.msk.f32.mxu1 %vm765_vm4, %v9244_v23  ;;  %v9248_v27 = vrot.slane %v9247_v51, 4  ;;  %v3730_v4 = vrot.slane %v6625_v9, 6  ;;  %v9251_v25 = vld [vmem:[#allocation5_spill] sm:$0xff]  ;;  %v3729_v23 = vrot.slane %v6614_v3, 6 }
 0x280   : > { %v1654_v58 = vpop.f32.mrf.mxu1  ;;  %v1269_v28 = vadd.f32 %v7823_v60, %v9251_v25 }
 0x281   : > { %v8021_v26 = vadd.f32 %v1654_v58, %v1259_v24  ;;  %v3003_v54 = vsel %vm838_vm2, %v9250_v36, %v9248_v27  ;;  %v3732_v58 = vrot.slane %v6643_v16, 6  ;;  %v8044_v27 = vpop.f32.mrf.mxu0  ;;  %v3731_v60 = vsel %vm3728_vm8, %v3729_v23, %v3730_v4  ;;  %v4158_v16 = vld [vmem:[%s8930_s3] sm:$0xf] }
 0x282   : > { %v5857_v53 = vpop.f32.mrf.mxu1  ;;  %6116 = vmatmul.mubr.msk.f32.gmra.mxu1 %vm765_vm4, %v9246_v30  ;;  %v1284_v30 = vadd.f32 %v7827_v13, %v9252_v15  ;;  %6233 = vmatprep.subr.msk.mxu0 %vm838_vm2, %v4158_v16 }
 0x283   : > { %v8035_v17 = vadd.f32 %v5857_v53, %v1274_v39  ;;  %6118 = vmatprep.mubr.msk.f32.mxu1 %vm765_vm4, %v3003_v54  ;;  %v3734_v39 = vrot.slane %v6654_v22, 6  ;;  %v9254_v53 = vld [vmem:[#allocation7_spill] sm:$0xff]  ;;  %v9255_v54 = vld [vmem:[#allocation8_spill] sm:$0xff]  ;;  %v3733_v22 = vsel %vm3728_vm8, %v3730_v4, %v3732_v58  ;;  %6234 = vmatpush3.msk.msra.mxu0 %vm838_vm2, %v4158_v16  ;;  %v3740_v16 = vrot.slane %v6692_v41, 6 }
 0x284   : > { %v1664_v24 = vpop.f32.mrf.mxu1  ;;  %v1279_v3 = vadd.f32 %v7835_v33, %v9254_v53  ;;  %v1294_v25 = vadd.f32 %v7837_v62, %v9255_v54  ;;  %v3736_v33 = vrot.slane %v6670_v29, 6  ;;  %v9257_v29 = vld [vmem:[#allocation10_spill] sm:$0xff]  ;;  %v9258_v54 = vld [vmem:[#allocation11_spill] sm:$0xff] }
 0x285   : > { %v8042_v51 = vadd.f32 %v1664_v24, %v1269_v28  ;;  %v8066_v24 = vpop.f32.mrf.mxu0  ;;  %v3735_v15 = vsel %vm3728_vm8, %v3732_v58, %v3734_v39 }
 0x286   : > { %v5860_v9 = vpop.f32.mrf.mxu1  ;;  %6119 = vmatmul.mubr.msk.f32.gmra.mxu1 %vm765_vm4, %v9253_v7 }
 0x287   : > { %v8052_v36 = vadd.f32 %v5860_v9, %v1284_v30  ;;  %6179 = vmatprep.mubr.msk.f32.mxu1 %vm765_vm4, %v3731_v60  ;;  %v3738_v30 = vrot.slane %v6681_v35, 6  ;;  %v9256_v9 = vld [vmem:[#allocation9_spill] sm:$0xff]  ;;  %v1304_v60 = vadd.f32 %v7851_v56, %v9257_v29  ;;  %v8082_v58 = vpop.f32.mrf.mxu0 }
 0x288   : > { %v1674_v13 = vpop.f32.mrf.mxu1  ;;  %v1289_v62 = vadd.f32 %v7847_v20, %v9256_v9  ;;  %v3744_v9 = vrot.slane %v6714_v55, 6  ;;  %v1324_v55 = vadd.f32 %v7871_v50, %v7608_v32 }
 0x289   : > { %v8061_v28 = vadd.f32 %v1674_v13, %v1279_v3  ;;  %v3737_v3 = vsel %vm3728_vm8, %v3734_v39, %v3736_v33  ;;  %v3739_v20 = vsel %vm3728_vm8, %v3736_v33, %v3738_v30  ;;  %v3742_v13 = vrot.slane %v6703_v47, 6  ;;  %v9259_v39 = vld [vmem:[#allocation12_spill] sm:$0xff]  ;;  %v8098_v33 = vpop.f32.mrf.mxu0 }
 0x28a   : > { %v5863_v23 = vpop.f32.mrf.mxu1  ;;  %6180 = vmatmul.mubr.msk.f32.vlgmr.msra.gmra.mxu1 %vm765_vm4, %v3733_v22  ;;  %v1314_v41 = vadd.f32 %v7861_v61, %v9259_v39 }
 0x28b   : > { %v8073_v7 = vadd.f32 %v5863_v23, %v1294_v25  ;;  %6182 = vmatprep.mubr.msk.f32.mxu1 %vm765_vm4, %v3735_v15  ;;  %v1299_v25 = vadd.f32 %v7857_v5, %v9258_v54  ;;  %v3741_v15 = vsel %vm3728_vm8, %v3738_v30, %v3740_v16  ;;  %v3743_v5 = vsel %vm3728_vm8, %v3740_v16, %v3742_v13  ;;  %v8114_v16 = vpop.f32.mrf.mxu0 }
 0x28c   : > { %v1684_v4 = vpop.f32.mrf.mxu1  ;;  %v3752_v54 = vrot.slane %v6760_v31, 6 }
 0x28d   : > { %v8078_v53 = vadd.f32 %v1684_v4, %v1289_v62  ;;  %v3746_v62 = vrot.slane %v6725_v0, 6  ;;  %v1309_v4 = vadd.f32 %v7869_v18, %v7601_v34  ;;  %v3750_v18 = vrot.slane %v6747_v19, 6 }
 0x28e   : > { %v5866_v35 = vpop.f32.mrf.mxu1  ;;  %6183 = vmatmul.mubr.msk.f32.gmra.mxu1 %vm765_vm4, %v3737_v3  ;;  %v3748_v3 = vrot.slane %v6736_v10, 6  ;;  %v1334_v10 = vadd.f32 %v7883_v12, %v7635_v63  ;;  %v9261_v63 = vld [vmem:[#allocation16_spill] sm:$0xff] }
 0x28f   : > { %v8089_v22 = vadd.f32 %v5866_v35, %v1304_v60  ;;  %6185 = vmatprep.mubr.msk.f32.mxu1 %vm765_vm4, %v3739_v20  ;;  %v3745_v60 = vsel %vm3728_vm8, %v3742_v13, %v3744_v9  ;;  %v3747_v34 = vsel %vm3728_vm8, %v3744_v9, %v3746_v62  ;;  %v1319_v35 = vadd.f32 %v7879_v52, %v7625_v46 }
 0x290   : > { %v1694_v56 = vpop.f32.mrf.mxu1  ;;  %v3749_v13 = vsel %vm3728_vm8, %v3746_v62, %v3748_v3  ;;  %v3751_v46 = vsel %vm3728_vm8, %v3748_v3, %v3750_v18  ;;  %v3754_v52 = vrot.slane %v6771_v42, 6  ;;  %v1344_v31 = vadd.f32 %v7893_v11, %v9261_v63 }
 0x291   : > { %v8094_v23 = vadd.f32 %v1694_v56, %v1299_v25  ;;  %v8130_v25 = vpop.f32.mrf.mxu0  ;;  %v9260_v56 = vld [vmem:[#allocation14_spill] sm:$0xff]  ;;  %v3753_v9 = vsel %vm3728_vm8, %v3750_v18, %v3752_v54  ;;  %v3758_v62 = vrot.slane %v6793_v6, 6 }
 0x292   : > { %v5869_v47 = vpop.f32.mrf.mxu1  ;;  %6186 = vmatmul.mubr.msk.f32.gmra.mxu1 %vm765_vm4, %v3741_v15  ;;  %v1329_v39 = vadd.f32 %v7889_v37, %v9260_v56  ;;  %v3755_v37 = vsel %vm3728_vm8, %v3752_v54, %v3754_v52  ;;  %v9269_v54 = vld [vmem:[#allocation62_spill] sm:$0xff]  ;;  %v9271_v56 = vld [vmem:[#allocation64_spill] sm:$0xff] }
 0x293   : > { %v8105_v29 = vadd.f32 %v5869_v47, %v1314_v41  ;;  %6188 = vmatprep.mubr.msk.f32.mxu1 %vm765_vm4, %v3743_v5  ;;  %v3756_v47 = vrot.slane %v6782_v57, 6  ;;  %v8146_v5 = vpop.f32.mrf.mxu0 }
 0x294   : > { %v1704_v61 = vpop.f32.mrf.mxu1  ;;  %9262 = vst [vmem:[#allocation76_spill] sm:$0xff] %v8146_v5 }
 0x295   : > { %v8110_v30 = vadd.f32 %v1704_v61, %v1309_v4  ;;  %v9263_v4 = vld [vmem:[#allocation20_spill] sm:$0xff] }
 0x296   : > { %v5872_v0 = vpop.f32.mrf.mxu1  ;;  %6189 = vmatmul.mubr.msk.f32.gmra.mxu1 %vm765_vm4, %v3745_v60  ;;  %v1339_v61 = vadd.f32 %v7901_v43, %v9263_v4  ;;  %v9264_v60 = vld [vmem:[#allocation24_spill] sm:$0xff]  ;;  %v3759_v43 = vsel %vm3728_vm8, %v3756_v47, %v3758_v62  ;;  %v9274_v4 = vld [vmem:[#allocation19_spill] sm:$0xff] }
 0x297   : > { %v8121_v20 = vadd.f32 %v5872_v0, %v1324_v55  ;;  %6191 = vmatprep.mubr.msk.f32.mxu1 %vm765_vm4, %v3747_v34  ;;  %v1354_v57 = vadd.f32 %v7903_v49, %v9264_v60  ;;  %v3757_v0 = vsel %vm3728_vm8, %v3754_v52, %v3756_v47  ;;  %v9265_v34 = vld [vmem:[#allocation13_spill] sm:$0xff]  ;;  %v9270_v52 = vld [vmem:[#allocation32_spill] sm:$0xff] }
 0x298   : > { %v1714_v32 = vpop.f32.mrf.mxu1  ;;  %v3760_v18 = vrot.slane %v9265_v34, 6  ;;  %v9276_v60 = vld [vmem:[#allocation65_spill] sm:$0xff] }
 0x299   : > { %v8126_v50 = vadd.f32 %v1714_v32, %v1319_v35  ;;  %v8162_v35 = vpop.f32.mrf.mxu0  ;;  %v9267_v32 = vld [vmem:[#allocation15_spill] sm:$0xff] }
 0x29a   : > { %v5875_v19 = vpop.f32.mrf.mxu1  ;;  %6192 = vmatmul.mubr.msk.f32.gmra.mxu1 %vm765_vm4, %v3749_v13  ;;  %9266 = vst [vmem:[#allocation77_spill] sm:$0xff] %v8162_v35  ;;  %v9268_v13 = vld [vmem:[#allocation28_spill] sm:$0xff]  ;;  %v3761_v63 = vsel %vm3728_vm8, %v3758_v62, %v3760_v18 }
 0x29b   : > { %v8137_v41 = vadd.f32 %v5875_v19, %v1334_v10  ;;  %6194 = vmatprep.mubr.msk.f32.mxu1 %vm765_vm4, %v3751_v46  ;;  %v3762_v10 = vrot.slane %v9267_v32, 6  ;;  %v1349_v19 = vadd.f32 %v9269_v54, %v9268_v13  ;;  %v8178_v47 = vpop.f32.mrf.mxu0  ;;  %v9277_v62 = vld [vmem:[#allocation40_spill] sm:$0xff]  ;;  %v9279_v54 = vld [vmem:[#allocation21_spill] sm:$0xff] }
 0x29c   : > { %v1724_v12 = vpop.f32.mrf.mxu1  ;;  %9273 = vst [vmem:[#allocation78_spill] sm:$0xff] %v8178_v47 }
 0x29d   : > { %v8142_v15 = vadd.f32 %v1724_v12, %v1329_v39  ;;  %v1364_v39 = vadd.f32 %v9271_v56, %v9270_v52  ;;  %v9281_v56 = vld [vmem:[#allocation23_spill] sm:$0xff] }
 0x29e   : > { %v5878_v42 = vpop.f32.mrf.mxu1  ;;  %6195 = vmatmul.mubr.msk.f32.gmra.mxu1 %vm765_vm4, %v3753_v9 }
 0x29f   : > { %v8153_v55 = vadd.f32 %v5878_v42, %v1344_v31  ;;  %6197 = vmatprep.mubr.msk.f32.mxu1 %vm765_vm4, %v3755_v37  ;;  %v9272_v31 = vld [vmem:[#allocation17_spill] sm:$0xff]  ;;  %v3763_v37 = vsel %vm3728_vm8, %v3760_v18, %v3762_v10  ;;  %v8194_v18 = vpop.f32.mrf.mxu0 }
 0x2a0   : > { %v1734_v11 = vpop.f32.mrf.mxu1  ;;  %v3764_v9 = vrot.slane %v9272_v31, 6  ;;  %9280 = vst [vmem:[#allocation79_spill] sm:$0xff] %v8194_v18  ;;  %v9283_v31 = vld [vmem:[#allocation69_spill] sm:$0xff] }
 0x2a1   : > { %v8158_v3 = vadd.f32 %v1734_v11, %v1339_v61  ;;  %v3766_v61 = vrot.slane %v9274_v4, 6  ;;  %v9275_v11 = vld [vmem:[#allocation36_spill] sm:$0xff] }
 0x2a2   : > { %v5881_v6 = vpop.f32.mrf.mxu1  ;;  %6198 = vmatmul.mubr.msk.f32.gmra.mxu1 %vm765_vm4, %v3757_v0  ;;  %v3765_v13 = vsel %vm3728_vm8, %v3762_v10, %v3764_v9  ;;  %v9284_v10 = vld [vmem:[#allocation46_spill] sm:$0xff] }
 0x2a3   : > { %v8169_v46 = vadd.f32 %v5881_v6, %v1354_v57  ;;  %6200 = vmatprep.mubr.msk.f32.mxu1 %vm765_vm4, %v3759_v43  ;;  %v1359_v57 = vadd.f32 %v9276_v60, %v9275_v11  ;;  %v9278_v6 = vld [vmem:[#allocation67_spill] sm:$0xff]  ;;  %v3767_v52 = vsel %vm3728_vm8, %v3764_v9, %v3766_v61  ;;  %v9285_v11 = vld [vmem:[#allocation102_spill] sm:$0xff]  ;;  %v8210_v9 = vpop.f32.mrf.mxu0 }
 0x2a4   : > { %v1744_v49 = vpop.f32.mrf.mxu1  ;;  %v1374_v43 = vadd.f32 %v9278_v6, %v9277_v62  ;;  %v1384_v60 = vadd.f32 %v9285_v11, %v9284_v10  ;;  %v9286_v62 = vld [vmem:[#allocation25_spill] sm:$0xff]  ;;  %9287 = vst [vmem:[#allocation80_spill] sm:$0xff] %v8210_v9 }
 0x2a5   : > { %v8174_v12 = vadd.f32 %v1744_v49, %v1349_v19  ;;  %v3768_v19 = vrot.slane %v9279_v54, 6  ;;  %v3772_v6 = vrot.slane %v9286_v62, 6  ;;  %v9288_v54 = vld [vmem:[#allocation27_spill] sm:$0xff] }
 0x2a6   : > { %v5884_v42 = vpop.f32.mrf.mxu1  ;;  %6201 = vmatmul.mubr.msk.f32.gmra.mxu1 %vm765_vm4, %v3761_v63  ;;  %v9282_v63 = vld [vmem:[#allocation2_spill] sm:$0xff] }
 0x2a7   : > { %v8185_v0 = vadd.f32 %v5884_v42, %v1364_v39  ;;  %6203 = vmatprep.mubr.msk.f32.mxu1 %vm765_vm4, %v3763_v37  ;;  %v3770_v39 = vrot.slane %v9281_v56, 6  ;;  %v1369_v42 = vadd.f32 %v9283_v31, %v9282_v63  ;;  %v9290_v56 = vld [vmem:[#allocation71_spill] sm:$0xff] }
 0x2a8   : > { %v1754_v34 = vpop.f32.mrf.mxu1 }
 0x2a9   : > { %v8190_v32 = vadd.f32 %v1754_v34, %v1359_v57  ;;  %v3769_v34 = vsel %vm3728_vm8, %v3766_v61, %v3768_v19  ;;  %v9291_v61 = vld [vmem:[#allocation86_spill] sm:$0xff]  ;;  %v3773_v62 = vsel %vm3728_vm8, %v3770_v39, %v3772_v6 }
 0x2aa   : > { %v5887_v49 = vpop.f32.mrf.mxu1  ;;  %6204 = vmatmul.mubr.msk.f32.gmra.mxu1 %vm765_vm4, %v3765_v13 }
 0x2ab   : > { %v8201_v37 = vadd.f32 %v5887_v49, %v1374_v43  ;;  %6206 = vmatprep.mubr.msk.f32.mxu1 %vm765_vm4, %v3767_v52  ;;  %v3771_v43 = vsel %vm3728_vm8, %v3768_v19, %v3770_v39  ;;  %v3774_v49 = vrot.slane %v9288_v54, 6  ;;  %v9289_v52 = vld [vmem:[#allocation84_spill] sm:$0xff]  ;;  %v8226_v19 = vpop.f32.mrf.mxu0  ;;  %v9298_v39 = vld [vmem:[#allocation90_spill] sm:$0xff] }
 0x2ac   : > { %v1764_v4 = vpop.f32.mrf.mxu1  ;;  %v1379_v63 = vadd.f32 %v9290_v56, %v9289_v52  ;;  %9294 = vst [vmem:[#allocation3_spill] sm:$0xff] %v8226_v19  ;;  %v9297_v56 = vld [vmem:[#allocation72_spill] sm:$0xff] }
 0x2ad   : > { %v8206_v57 = vadd.f32 %v1764_v4, %v1369_v42  ;;  %v9292_v4 = vld [vmem:[#allocation104_spill] sm:$0xff] }
 0x2ae   : > { %v5890_v13 = vpop.f32.mrf.mxu1  ;;  %6207 = vmatmul.mubr.msk.f32.gmra.mxu1 %vm765_vm4, %v3769_v34  ;;  %v1394_v10 = vadd.f32 %v9292_v4, %v9291_v61  ;;  %v9293_v34 = vld [vmem:[#allocation29_spill] sm:$0xff] }
 0x2af   : > { %v8217_v31 = vadd.f32 %v5890_v13, %v1384_v60  ;;  %6209 = vmatprep.mubr.msk.f32.mxu1 %vm765_vm4, %v3771_v43  ;;  %v3776_v9 = vrot.slane %v9293_v34, 6  ;;  %v3775_v60 = vsel %vm3728_vm8, %v3772_v6, %v3774_v49  ;;  %v9295_v13 = vld [vmem:[#allocation31_spill] sm:$0xff]  ;;  %v9296_v43 = vld [vmem:[#allocation88_spill] sm:$0xff]  ;;  %v8242_v6 = vpop.f32.mrf.mxu0 }
 0x2b0   : > { %v1774_v42 = vpop.f32.mrf.mxu1  ;;  %v3778_v52 = vrot.slane %v9295_v13, 6  ;;  %v1389_v18 = vadd.f32 %v9297_v56, %v9296_v43  ;;  %v9303_v56 = vld [vmem:[#allocation74_spill] sm:$0xff] }
 0x2b1   : > { %v8222_v11 = vadd.f32 %v1774_v42, %v1379_v63  ;;  %v9299_v42 = vld [vmem:[#allocation105_spill] sm:$0xff]  ;;  %v3777_v34 = vsel %vm3728_vm8, %v3774_v49, %v3776_v9 }
 0x2b2   : > { %v5893_v54 = vpop.f32.mrf.mxu1  ;;  %6210 = vmatmul.mubr.msk.f32.gmra.mxu1 %vm765_vm4, %v3773_v62  ;;  %v1404_v61 = vadd.f32 %v9299_v42, %v9298_v39  ;;  %v9300_v62 = vld [vmem:[#allocation33_spill] sm:$0xff] }
 0x2b3   : > { %v8233_v47 = vadd.f32 %v5893_v54, %v1394_v10  ;;  %6212 = vmatprep.mubr.msk.f32.mxu1 %vm765_vm4, %v3775_v60  ;;  %v3780_v19 = vrot.slane %v9300_v62, 6  ;;  %v3779_v10 = vsel %vm3728_vm8, %v3776_v9, %v3778_v52  ;;  %v9301_v54 = vld [vmem:[#allocation35_spill] sm:$0xff]  ;;  %v9302_v60 = vld [vmem:[#allocation92_spill] sm:$0xff]  ;;  %v8258_v9 = vpop.f32.mrf.mxu0 }
 0x2b4   : > { %v1784_v63 = vpop.f32.mrf.mxu1  ;;  %v3782_v43 = vrot.slane %v9301_v54, 6  ;;  %v1399_v35 = vadd.f32 %v9303_v56, %v9302_v60  ;;  %9306 = vst [vmem:[#allocation47_spill] sm:$0xff] %v8258_v9 }
 0x2b5   : > { %v8238_v4 = vadd.f32 %v1784_v63, %v1389_v18  ;;  %v9304_v63 = vld [vmem:[#allocation18_spill] sm:$0xff]  ;;  %v3781_v42 = vsel %vm3728_vm8, %v3778_v52, %v3780_v19 }
 0x2b6   : > { %v5896_v13 = vpop.f32.mrf.mxu1  ;;  %6213 = vmatmul.mubr.msk.f32.gmra.mxu1 %vm765_vm4, %v3777_v34  ;;  %v2100_v39 = vadd.f32 %v9304_v63, %v7973_v48  ;;  %v9305_v34 = vld [vmem:[#allocation37_spill] sm:$0xff] }
 0x2b7   : > { %v8249_v5 = vadd.f32 %v5896_v13, %v1404_v61  ;;  %6215 = vmatprep.mubr.msk.f32.mxu1 %vm765_vm4, %v3779_v10  ;;  %v3784_v62 = vrot.slane %v9305_v34, 6  ;;  %v3783_v61 = vsel %vm3728_vm8, %v3780_v19, %v3782_v43  ;;  %v9307_v13 = vld [vmem:[#allocation39_spill] sm:$0xff]  ;;  %v8274_v19 = vpop.f32.mrf.mxu0 }
 0x2b8   : > { %v1794_v18 = vpop.f32.mrf.mxu1  ;;  %v3786_v60 = vrot.slane %v9307_v13, 6 }
 0x2b9   : > { %v8252_v49 = vadd.f32 %v1794_v18, %v1399_v35  ;;  %v9308_v35 = vld [vmem:[#allocation22_spill] sm:$0xff]  ;;  %v3785_v34 = vsel %vm3728_vm8, %v3782_v43, %v3784_v62 }
 0x2ba   : > { %v5957_v54 = vpop.f32.mrf.mxu1  ;;  %6216 = vmatmul.mubr.msk.f32.gmra.mxu1 %vm765_vm4, %v3781_v42  ;;  %v2099_v48 = vadd.f32 %v9308_v35, %v7979_v38  ;;  %v9309_v18 = vld [vmem:[#allocation26_spill] sm:$0xff]  ;;  %v9310_v42 = vld [vmem:[#allocation41_spill] sm:$0xff] }
 0x2bb   : > { %v8263_v10 = vadd.f32 %v5957_v54, %v2100_v39  ;;  %6218 = vmatprep.mubr.msk.f32.mxu1 %vm765_vm4, %v3783_v61  ;;  %v2102_v63 = vadd.f32 %v9309_v18, %v7987_v40  ;;  %v3788_v9 = vrot.slane %v9310_v42, 6  ;;  %v3787_v39 = vsel %vm3728_vm8, %v3784_v62, %v3786_v60  ;;  %v9311_v54 = vld [vmem:[#allocation43_spill] sm:$0xff]  ;;  %v9312_v35 = vld [vmem:[#allocation30_spill] sm:$0xff] }
 0x2bc   : > { %v2352_v56 = vpop.f32.mrf.mxu1  ;;  %v3790_v61 = vrot.slane %v9311_v54, 6  ;;  %v2101_v40 = vadd.f32 %v9312_v35, %v7993_v59  ;;  %v9314_v59 = vld [vmem:[#allocation38_spill] sm:$0xff] }
 0x2bd   : > { %v8268_v52 = vadd.f32 %v2352_v56, %v2099_v48  ;;  %v9313_v56 = vld [vmem:[#allocation34_spill] sm:$0xff]  ;;  %v3789_v42 = vsel %vm3728_vm8, %v3786_v60, %v3788_v9 }
 0x2be   : > { %v5960_v13 = vpop.f32.mrf.mxu1  ;;  %6219 = vmatmul.mubr.msk.f32.gmra.mxu1 %vm765_vm4, %v3785_v34  ;;  %v2104_v18 = vadd.f32 %v9313_v56, %v8001_v8  ;;  %v8289_v34 = vpop.f32.mrf.mxu0  ;;  %v9315_v8 = vld [vmem:[#allocation42_spill] sm:$0xff] }
 0x2bf   : > { %v8279_v38 = vadd.f32 %v5960_v13, %v2102_v63  ;;  %6221 = vmatprep.mubr.msk.f32.mxu1 %vm765_vm4, %v3787_v39  ;;  %v3791_v63 = vsel %vm3728_vm8, %v3788_v9, %v3790_v61  ;;  %v2103_v39 = vadd.f32 %v9314_v59, %v8007_v21  ;;  %v2106_v60 = vadd.f32 %v9315_v8, %v8015_v2  ;;  %v9319_v21 = vld [vmem:[#allocation44_spill] sm:$0xff] }
 0x2c0   : > { %v2362_v48 = vpop.f32.mrf.mxu1  ;;  %v9320_v2 = vld [vmem:[#allocation48_spill] sm:$0xff] }
 0x2c1   : > { %v8284_v43 = vadd.f32 %v2362_v48, %v2101_v40  ;;  %v9316_v40 = vld [vmem:[#allocation45_spill] sm:$0xff] }
 0x2c2   : > { %v5963_v62 = vpop.f32.mrf.mxu1  ;;  %6222 = vmatmul.mubr.msk.f32.gmra.mxu1 %vm765_vm4, %v3789_v42  ;;  %v9317_v48 = vrot.slane %v9316_v40, 6  ;;  %v8305_v42 = vpop.f32.mrf.mxu0  ;;  %v9322_v40 = vld [vmem:[#allocation82_spill] sm:$0xff] }
 0x2c3   : > { %v8293_v13 = vadd.f32 %v5963_v62, %v2104_v18  ;;  %6224 = vmatprep.mubr.msk.f32.mxu1 %vm765_vm4, %v3791_v63  ;;  %v9318_v62 = vld [vmem:[#allocation51_spill] sm:$0xff]  ;;  %v2105_v63 = vadd.f32 %v9319_v21, %v8021_v26 }
 0x2c4   : > { %v2372_v54 = vpop.f32.mrf.mxu1  ;;  %v3793_v56 = vsel %vm3728_vm8, %v3790_v61, %v9317_v48  ;;  %v8318_v61 = vpop.f32.mrf.mxu0  ;;  %v9323_v48 = vld [vmem:[#allocation83_spill] sm:$0xff] }
 0x2c5   : > { %v8298_v35 = vadd.f32 %v2372_v54, %v2103_v39  ;;  %v2108_v54 = vadd.f32 %v9320_v2, %v8035_v17  ;;  %9321 = vst [vmem:[#allocation4_spill] sm:$0xff] %v8318_v61  ;;  %v9325_v21 = vld [vmem:[#allocation87_spill] sm:$0xff]  ;;  %v9327_v2 = vld [vmem:[#allocation54_spill] sm:$0xff] }
 0x2c6   : > { %v5966_v9 = vpop.f32.mrf.mxu1  ;;  %6225 = vmatmul.mubr.msk.f32.gmra.mxu1 %vm765_vm4, %v3793_v56  ;;  %v9324_v56 = vld [vmem:[#allocation85_spill] sm:$0xff]  ;;  %v2110_v17 = vadd.f32 %v9325_v21, %v8052_v36 }
 0x2c7   : > { %v8308_v18 = vadd.f32 %v5966_v9, %v2106_v60  ;;  %6227 = vmatprep.mubr.msk.f32.mxu1 %vm765_vm4, %v9318_v62  ;;  %v2107_v26 = vadd.f32 %v9324_v56, %v8042_v51  ;;  %v9329_v51 = vld [vmem:[#allocation91_spill] sm:$0xff]  ;;  %v9331_v21 = vld [vmem:[#allocation93_spill] sm:$0xff] }
 0x2c8   : > { %v2382_v59 = vpop.f32.mrf.mxu1  ;;  %v2112_v56 = vadd.f32 %v9329_v51, %v8073_v7  ;;  %v9334_v7 = vld [vmem:[#allocation95_spill] sm:$0xff] }
 0x2c9   : > { %v8314_v39 = vadd.f32 %v2382_v59, %v2105_v63  ;;  %v8332_v63 = vpop.f32.mrf.mxu0  ;;  %v2113_v51 = vadd.f32 %v9334_v7, %v8094_v23 }
 0x2ca   : > { %v5969_v8 = vpop.f32.mrf.mxu1  ;;  %6228 = vmatmul.mubr.msk.f32.gmra.mxu1 %vm765_vm4, %v9322_v40  ;;  %9326 = vst [vmem:[#allocation81_spill] sm:$0xff] %v8332_v63  ;;  %v2111_v63 = vadd.f32 %v9331_v21, %v8078_v53 }
 0x2cb   : > { %v8322_v60 = vadd.f32 %v5969_v8, %v2108_v54  ;;  %6230 = vmatprep.mubr.msk.f32.mxu1 %vm765_vm4, %v9323_v48  ;;  %v9328_v8 = vld [vmem:[#allocation89_spill] sm:$0xff] }
 0x2cc   : > { %v2392_v9 = vpop.f32.mrf.mxu1  ;;  %v2109_v40 = vadd.f32 %v9328_v8, %v8061_v28 }
 0x2cd   : > { %v8328_v62 = vadd.f32 %v2392_v9, %v2107_v26  ;;  %v8344_v26 = vpop.f32.mrf.mxu0 }
 0x2ce   : > { %v5972_v59 = vpop.f32.mrf.mxu1  ;;  %6231 = vmatmul.mubr.msk.f32.gmra.mxu1 %vm765_vm4, %v9327_v2  ;;  %9330 = vst [vmem:[#allocation52_spill] sm:$0xff] %v8344_v26 }
 0x2cf   : > { %v8336_v54 = vadd.f32 %v5972_v59, %v2110_v17  ;;  %v9332_v59 = vld [vmem:[#allocation94_spill] sm:$0xff]  ;;  %v8354_v8 = vpop.f32.mrf.mxu0 }
 0x2d0   : > { %v2402_v48 = vpop.f32.mrf.mxu1  ;;  %v2114_v28 = vadd.f32 %v9332_v59, %v8089_v22  ;;  %9333 = vst [vmem:[#allocation50_spill] sm:$0xff] %v8354_v8  ;;  %v9337_v22 = vld [vmem:[#allocation97_spill] sm:$0xff] }
 0x2d1   : > { %v8340_v61 = vadd.f32 %v2402_v48, %v2109_v40  ;;  %v8364_v21 = vpop.f32.mrf.mxu0  ;;  %v2115_v59 = vadd.f32 %v9337_v22, %v8110_v30 }
 0x2d2   : > { %v5975_v36 = vpop.f32.mrf.mxu1  ;;  %9336 = vst [vmem:[#allocation5_spill] sm:$0xff] %v8364_v21 }
 0x2d3   : > { %v8346_v9 = vadd.f32 %v5975_v36, %v2112_v56  ;;  %v9335_v36 = vld [vmem:[#allocation96_spill] sm:$0xff]  ;;  %v8374_v7 = vpop.f32.mrf.mxu0 }
 0x2d4   : > { %v2412_v2 = vpop.f32.mrf.mxu1  ;;  %v2116_v53 = vadd.f32 %v9335_v36, %v8105_v29  ;;  %9339 = vst [vmem:[#allocation6_spill] sm:$0xff] %v8374_v7  ;;  %v9340_v29 = vld [vmem:[#allocation49_spill] sm:$0xff] }
 0x2d5   : > { %v8350_v17 = vadd.f32 %v2412_v2, %v2111_v63  ;;  %v2117_v36 = vadd.f32 %v9340_v29, %v8126_v50  ;;  %v8384_v22 = vpop.f32.mrf.mxu0 }
 0x2d6   : > { %v5978_v40 = vpop.f32.mrf.mxu1  ;;  %9342 = vst [vmem:[#allocation53_spill] sm:$0xff] %v8384_v22 }
 0x2d7   : > { %v8356_v48 = vadd.f32 %v5978_v40, %v2114_v28  ;;  %v9338_v40 = vld [vmem:[#allocation98_spill] sm:$0xff]  ;;  %v8394_v29 = vpop.f32.mrf.mxu0 }
 0x2d8   : > { %v2422_v26 = vpop.f32.mrf.mxu1  ;;  %v2118_v23 = vadd.f32 %v9338_v40, %v8121_v20  ;;  %v9343_v20 = vld [vmem:[#allocation100_spill] sm:$0xff]  ;;  %9345 = vst [vmem:[#allocation7_spill] sm:$0xff] %v8394_v29 }
 0x2d9   : > { %v8360_v56 = vadd.f32 %v2422_v26, %v2113_v51  ;;  %v2119_v40 = vadd.f32 %v9343_v20, %v8142_v15  ;;  %v8404_v20 = vpop.f32.mrf.mxu0 }
 0x2da   : > { %v5981_v63 = vpop.f32.mrf.mxu1  ;;  %9348 = vst [vmem:[#allocation8_spill] sm:$0xff] %v8404_v20 }
 0x2db   : > { %v8366_v2 = vadd.f32 %v5981_v63, %v2116_v53  ;;  %v9341_v63 = vld [vmem:[#allocation99_spill] sm:$0xff] }
 0x2dc   : > { %v2432_v8 = vpop.f32.mrf.mxu1  ;;  %v2120_v30 = vadd.f32 %v9341_v63, %v8137_v41  ;;  %v9346_v41 = vld [vmem:[#allocation55_spill] sm:$0xff] }
 0x2dd   : > { %v8370_v28 = vadd.f32 %v2432_v8, %v2115_v59  ;;  %v2121_v63 = vadd.f32 %v9346_v41, %v8158_v3  ;;  %v8414_v41 = vpop.f32.mrf.mxu0 }
 0x2de   : > { %v5984_v26 = vpop.f32.mrf.mxu1  ;;  %9351 = vst [vmem:[#allocation9_spill] sm:$0xff] %v8414_v41 }
 0x2df   : > { %v8376_v51 = vadd.f32 %v5984_v26, %v2118_v23  ;;  %v9344_v26 = vld [vmem:[#allocation101_spill] sm:$0xff] }
 0x2e0   : > { %v2442_v21 = vpop.f32.mrf.mxu1  ;;  %v2122_v50 = vadd.f32 %v9344_v26, %v8153_v55  ;;  %v9349_v55 = vld [vmem:[#allocation57_spill] sm:$0xff] }
 0x2e1   : > { %v8380_v53 = vadd.f32 %v2442_v21, %v2117_v36  ;;  %v2123_v26 = vadd.f32 %v9349_v55, %v8174_v12  ;;  %v8424_v55 = vpop.f32.mrf.mxu0 }
 0x2e2   : > { %v5987_v8 = vpop.f32.mrf.mxu1  ;;  %9354 = vst [vmem:[#allocation10_spill] sm:$0xff] %v8424_v55 }
 0x2e3   : > { %v8386_v59 = vadd.f32 %v5987_v8, %v2120_v30  ;;  %v9347_v8 = vld [vmem:[#allocation56_spill] sm:$0xff] }
 0x2e4   : > { %v2452_v7 = vpop.f32.mrf.mxu1  ;;  %v2124_v15 = vadd.f32 %v9347_v8, %v8169_v46  ;;  %v9352_v46 = vld [vmem:[#allocation59_spill] sm:$0xff] }
 0x2e5   : > { %v8390_v23 = vadd.f32 %v2452_v7, %v2119_v40  ;;  %v2125_v8 = vadd.f32 %v9352_v46, %v8190_v32  ;;  %v8434_v46 = vpop.f32.mrf.mxu0 }
 0x2e6   : > { %v5990_v21 = vpop.f32.mrf.mxu1  ;;  %9357 = vst [vmem:[#allocation11_spill] sm:$0xff] %v8434_v46 }
 0x2e7   : > { %v8396_v36 = vadd.f32 %v5990_v21, %v2122_v50  ;;  %v9350_v21 = vld [vmem:[#allocation58_spill] sm:$0xff] }
 0x2e8   : > { %v2462_v22 = vpop.f32.mrf.mxu1  ;;  %v2126_v3 = vadd.f32 %v9350_v21, %v8185_v0  ;;  %v9355_v0 = vld [vmem:[#allocation61_spill] sm:$0xff] }
 0x2e9   : > { %v8400_v30 = vadd.f32 %v2462_v22, %v2121_v63  ;;  %v2127_v21 = vadd.f32 %v9355_v0, %v8206_v57  ;;  %v8444_v0 = vpop.f32.mrf.mxu0 }
 0x2ea   : > { %v5993_v7 = vpop.f32.mrf.mxu1  ;;  %9360 = vst [vmem:[#allocation12_spill] sm:$0xff] %v8444_v0 }
 0x2eb   : > { %v8406_v40 = vadd.f32 %v5993_v7, %v2124_v15  ;;  %v9353_v7 = vld [vmem:[#allocation60_spill] sm:$0xff] }
 0x2ec   : > { %v2472_v29 = vpop.f32.mrf.mxu1  ;;  %v2128_v12 = vadd.f32 %v9353_v7, %v8201_v37  ;;  %v9358_v37 = vld [vmem:[#allocation66_spill] sm:$0xff] }
 0x2ed   : > { %v8410_v50 = vadd.f32 %v2472_v29, %v2123_v26  ;;  %v2129_v7 = vadd.f32 %v9358_v37, %v8222_v11  ;;  %v8454_v37 = vpop.f32.mrf.mxu0 }
 0x2ee   : > { %v5996_v22 = vpop.f32.mrf.mxu1 }
 0x2ef   : > { %v8416_v63 = vadd.f32 %v5996_v22, %v2126_v3  ;;  %v9356_v22 = vld [vmem:[#allocation63_spill] sm:$0xff] }
 0x2f0   : > { %v2482_v20 = vpop.f32.mrf.mxu1  ;;  %v2130_v32 = vadd.f32 %v9356_v22, %v8217_v31  ;;  %v9361_v31 = vld [vmem:[#allocation70_spill] sm:$0xff] }
 0x2f1   : > { %v8420_v15 = vadd.f32 %v2482_v20, %v2125_v8  ;;  %v2131_v22 = vadd.f32 %v9361_v31, %v8238_v4  ;;  %v8464_v31 = vpop.f32.mrf.mxu0 }
 0x2f2   : > { %v5999_v29 = vpop.f32.mrf.mxu1 }
 0x2f3   : > { %v8426_v26 = vadd.f32 %v5999_v29, %v2128_v12  ;;  %v9359_v29 = vld [vmem:[#allocation68_spill] sm:$0xff] }
 0x2f4   : > { %v2492_v41 = vpop.f32.mrf.mxu1  ;;  %v2132_v57 = vadd.f32 %v9359_v29, %v8233_v47  ;;  %v9363_v47 = vld [vmem:[#allocation73_spill] sm:$0xff] }
 0x2f5   : > { %v8430_v3 = vadd.f32 %v2492_v41, %v2127_v21  ;;  %v2133_v29 = vadd.f32 %v9363_v47, %v8252_v49  ;;  %v2965_v49 = vadd.f32 %v7995_v1, %v8279_v38  ;;  %v2966_v38 = vadd.f32 %v8044_v27, %v8298_v35 }
 0x2f6   : > { %v6002_v20 = vpop.f32.mrf.mxu1 }
 0x2f7   : > { %v8436_v8 = vadd.f32 %v6002_v20, %v2130_v32  ;;  %v9362_v20 = vld [vmem:[#allocation103_spill] sm:$0xff] }
 0x2f8   : > { %v2502_v55 = vpop.f32.mrf.mxu1  ;;  %v2134_v11 = vadd.f32 %v9362_v20, %v8249_v5  ;;  %v2962_v5 = vadd.f32 %v7981_v44, %v8268_v52  ;;  %v2967_v44 = vadd.f32 %v8023_v45, %v8293_v13  ;;  %v2968_v45 = vadd.f32 %v8082_v58, %v8314_v39  ;;  %v8501_v13 = vld [vmem:[%s6405_s24 + $0x18] sm:$0xff] }
 0x2f9   : > { %v8440_v12 = vadd.f32 %v2502_v55, %v2129_v7  ;;  %9365 = vst [vmem:[#allocation14_spill] sm:$0xff] %v8501_v13  ;;  %v2970_v58 = vadd.f32 %v8114_v16, %v8328_v62  ;;  %v9368_v16 = vld [vmem:[#allocation76_spill] sm:$0xff] }
 0x2fa   : > { %v6005_v41 = vpop.f32.mrf.mxu1  ;;  %v2972_v62 = vadd.f32 %v9368_v16, %v8340_v61 }
 0x2fb   : > { %v8446_v21 = vadd.f32 %v6005_v41, %v2132_v57  ;;  %v9364_v41 = vld [vmem:[#allocation75_spill] sm:$0xff] }
 0x2fc   : > { %v2512_v46 = vpop.f32.mrf.mxu1  ;;  %v2963_v4 = vadd.f32 %v9364_v41, %v8263_v10  ;;  %v2964_v10 = vadd.f32 %v8009_v14, %v8284_v43  ;;  %v2969_v14 = vadd.f32 %v8066_v24, %v8308_v18  ;;  %v2971_v24 = vadd.f32 %v8098_v33, %v8322_v60 }
 0x2fd   : > { %v8450_v32 = vadd.f32 %v2512_v46, %v2131_v22  ;;  %v2973_v33 = vadd.f32 %v8130_v25, %v8336_v54  ;;  %v9370_v25 = vld [vmem:[#allocation78_spill] sm:$0xff] }
 0x2fe   : > { %v6008_v55 = vpop.f32.mrf.mxu1  ;;  %v2974_v54 = vadd.f32 %v9370_v25, %v8350_v17 }
 0x2ff   : > { %v8456_v7 = vadd.f32 %v6008_v55, %v2134_v11  ;;  %v8474_v55 = vpop.f32.mrf.mxu0 }
 0x300   : > { %v2522_v0 = vpop.f32.mrf.mxu1 }
 0x301   : > { %v8460_v57 = vadd.f32 %v2522_v0, %v2133_v29  ;;  %v8484_v52 = vpop.f32.mrf.mxu0 }
 0x302   : > { %v6069_v46 = vpop.f32.mrf.mxu1 }
 0x303   : > { %v8466_v22 = vadd.f32 %v6069_v46, %v2963_v4  ;;  %v8494_v43 = vpop.f32.mrf.mxu0 }
 0x304   : > { %v3079_v20 = vpop.f32.mrf.mxu1 }
 0x305   : > { %v8470_v11 = vadd.f32 %v3079_v20, %v2962_v5  ;;  %v8512_v18 = vpop.f32.mrf.mxu0 }
 0x306   : > { %v6072_v0 = vpop.f32.mrf.mxu1 }
 0x307   : > { %v8476_v47 = vadd.f32 %v6072_v0, %v2965_v49  ;;  %v9013_v0 = vrot.slane %v8501_v13, 3  ;;  %v8529_v60 = vpop.f32.mrf.mxu0 }
 0x308   : > { %v3089_v29 = vpop.f32.mrf.mxu1 }
 0x309   : > { %v8480_v41 = vadd.f32 %v3089_v29, %v2964_v10  ;;  %v8505_v10 = vld [vmem:[%s6405_s24 + $0x20] sm:$0xff] }
 0x30a   : > { %v6075_v4 = vpop.f32.mrf.mxu1  ;;  %9366 = vst [vmem:[#allocation16_spill] sm:$0xff] %v8505_v10  ;;  %v9012_v27 = vrot.slane %v8505_v10, 3 }
 0x30b   : > { %v8486_v1 = vadd.f32 %v6075_v4, %v2967_v44 }
 0x30c   : > { %v3099_v46 = vpop.f32.mrf.mxu1 }
 0x30d   : > { %v8490_v5 = vadd.f32 %v3099_v46, %v2966_v38  ;;  %v8523_v38 = vsel %vm2137_vm6, %v9013_v0, %v9012_v27  ;;  %v8539_v27 = vpop.f32.mrf.mxu0 }
 0x30e   : > { %v6078_v20 = vpop.f32.mrf.mxu1  ;;  %9367 = vst [vmem:[#allocation20_spill] sm:$0xff] %v8523_v38 }
 0x30f   : > { %v8496_v49 = vadd.f32 %v6078_v20, %v2969_v14  ;;  %v8549_v16 = vpop.f32.mrf.mxu0 }
 0x310   : > { %v3109_v35 = vpop.f32.mrf.mxu1 }
 0x311   : > { %v8508_v29 = vadd.f32 %v3109_v35, %v2968_v45  ;;  %v8559_v25 = vpop.f32.mrf.mxu0 }
 0x312   : > { %v6081_v44 = vpop.f32.mrf.mxu1 }
 0x313   : > { %v8514_v4 = vadd.f32 %v6081_v44, %v2971_v24  ;;  %v9369_v24 = vld [vmem:[#allocation77_spill] sm:$0xff] }
 0x314   : > { %v3119_v39 = vpop.f32.mrf.mxu1  ;;  %v2975_v44 = vadd.f32 %v9369_v24, %v8346_v9  ;;  %v9372_v9 = vld [vmem:[#allocation80_spill] sm:$0xff] }
 0x315   : > { %v8525_v46 = vadd.f32 %v3119_v39, %v2970_v58  ;;  %v2976_v24 = vadd.f32 %v9372_v9, %v8360_v56  ;;  %v8569_v9 = vpop.f32.mrf.mxu0 }
 0x316   : > { %v6084_v14 = vpop.f32.mrf.mxu1 }
 0x317   : > { %v8531_v20 = vadd.f32 %v6084_v14, %v2973_v33  ;;  %v9371_v14 = vld [vmem:[#allocation79_spill] sm:$0xff] }
 0x318   : > { %v3129_v45 = vpop.f32.mrf.mxu1  ;;  %v2977_v61 = vadd.f32 %v9371_v14, %v8356_v48  ;;  %v2978_v48 = vadd.f32 %v8242_v6, %v8370_v28  ;;  %v2983_v6 = vadd.f32 %v8289_v34, %v8386_v59  ;;  %v8579_v28 = vpop.f32.mrf.mxu0  ;;  %v9376_v34 = vld [vmem:[#allocation81_spill] sm:$0xff] }
 0x319   : > { %v8535_v35 = vadd.f32 %v3129_v45, %v2972_v62  ;;  %v2984_v59 = vadd.f32 %v9376_v34, %v8400_v30 }
 0x31a   : > { %v6087_v58 = vpop.f32.mrf.mxu1 }
 0x31b   : > { %v8541_v39 = vadd.f32 %v6087_v58, %v2975_v44  ;;  %v9373_v58 = vld [vmem:[#allocation3_spill] sm:$0xff] }
 0x31c   : > { %v3139_v0 = vpop.f32.mrf.mxu1  ;;  %v2979_v17 = vadd.f32 %v9373_v58, %v8366_v2  ;;  %v2980_v2 = vadd.f32 %v8274_v19, %v8380_v53  ;;  %v8589_v53 = vpop.f32.mrf.mxu0 }
 0x31d   : > { %v8545_v33 = vadd.f32 %v3139_v0, %v2974_v54 }
 0x31e   : > { %v6090_v62 = vpop.f32.mrf.mxu1 }
 0x31f   : > { %v8551_v45 = vadd.f32 %v6090_v62, %v2977_v61  ;;  %v9374_v62 = vld [vmem:[#allocation47_spill] sm:$0xff] }
 0x320   : > { %v3149_v38 = vpop.f32.mrf.mxu1  ;;  %v2981_v56 = vadd.f32 %v9374_v62, %v8376_v51  ;;  %v2982_v51 = vadd.f32 %v8305_v42, %v8390_v23  ;;  %v8599_v23 = vpop.f32.mrf.mxu0 }
 0x321   : > { %v8555_v44 = vadd.f32 %v3149_v38, %v2976_v24 }
 0x322   : > { %v6093_v0 = vpop.f32.mrf.mxu1  ;;  %v8609_v34 = vpop.f32.mrf.mxu0 }
 0x323   : > { %v8561_v54 = vadd.f32 %v6093_v0, %v2979_v17 }
 0x324   : > { %v3159_v14 = vpop.f32.mrf.mxu1 }
 0x325   : > { %v8565_v61 = vadd.f32 %v3159_v14, %v2978_v48 }
 0x326   : > { %v6096_v38 = vpop.f32.mrf.mxu1 }
 0x327   : > { %v8571_v24 = vadd.f32 %v6096_v38, %v2981_v56  ;;  %v9375_v56 = vld [vmem:[#allocation4_spill] sm:$0xff] }
 0x328   : > { %v3169_v58 = vpop.f32.mrf.mxu1  ;;  %v2985_v19 = vadd.f32 %v9375_v56, %v8396_v36  ;;  %v9379_v36 = vld [vmem:[#allocation50_spill] sm:$0xff] }
 0x329   : > { %v8575_v17 = vadd.f32 %v3169_v58, %v2980_v2  ;;  %v2986_v56 = vadd.f32 %v9379_v36, %v8410_v50  ;;  %v8619_v36 = vpop.f32.mrf.mxu0 }
 0x32a   : > { %v6099_v0 = vpop.f32.mrf.mxu1 }
 0x32b   : > { %v8581_v48 = vadd.f32 %v6099_v0, %v2983_v6  ;;  %v9377_v0 = vld [vmem:[#allocation52_spill] sm:$0xff] }
 0x32c   : > { %v3179_v14 = vpop.f32.mrf.mxu1  ;;  %v2987_v42 = vadd.f32 %v9377_v0, %v8406_v40  ;;  %v9382_v40 = vld [vmem:[#allocation6_spill] sm:$0xff] }
 0x32d   : > { %v8585_v62 = vadd.f32 %v3179_v14, %v2982_v51  ;;  %v2988_v0 = vadd.f32 %v9382_v40, %v8420_v15  ;;  %v8629_v40 = vpop.f32.mrf.mxu0 }
 0x32e   : > { %v6102_v38 = vpop.f32.mrf.mxu1 }
 0x32f   : > { %v8591_v2 = vadd.f32 %v6102_v38, %v2985_v19  ;;  %v9380_v38 = vld [vmem:[#allocation5_spill] sm:$0xff] }
 0x330   : > { %v3189_v58 = vpop.f32.mrf.mxu1  ;;  %v2989_v30 = vadd.f32 %v9380_v38, %v8416_v63  ;;  %v9385_v63 = vld [vmem:[#allocation7_spill] sm:$0xff] }
 0x331   : > { %v8595_v6 = vadd.f32 %v3189_v58, %v2984_v59  ;;  %v2990_v38 = vadd.f32 %v9385_v63, %v8430_v3  ;;  %v8639_v63 = vpop.f32.mrf.mxu0 }
 0x332   : > { %v6105_v51 = vpop.f32.mrf.mxu1 }
 0x333   : > { %v8601_v14 = vadd.f32 %v6105_v51, %v2987_v42  ;;  %v9383_v51 = vld [vmem:[#allocation53_spill] sm:$0xff] }
 0x334   : > { %v3199_v10 = vpop.f32.mrf.mxu1  ;;  %v2991_v50 = vadd.f32 %v9383_v51, %v8426_v26  ;;  %v9387_v26 = vld [vmem:[#allocation9_spill] sm:$0xff] }
 0x335   : > { %9378 = vst [vmem:[#allocation24_spill] sm:$0xff] %v8601_v14  ;;  %v8605_v19 = vadd.f32 %v3199_v10, %v2986_v56  ;;  %v2992_v51 = vadd.f32 %v9387_v26, %v8440_v12  ;;  %v8649_v26 = vpop.f32.mrf.mxu0 }
 0x336   : > { %v6108_v59 = vpop.f32.mrf.mxu1 }
 0x337   : > { %v8611_v58 = vadd.f32 %v6108_v59, %v2989_v30  ;;  %v9386_v59 = vld [vmem:[#allocation8_spill] sm:$0xff] }
 0x338   : > { %v3209_v13 = vpop.f32.mrf.mxu1  ;;  %v2993_v15 = vadd.f32 %v9386_v59, %v8436_v8  ;;  %v9389_v8 = vld [vmem:[#allocation11_spill] sm:$0xff] }
 0x339   : > { %9381 = vst [vmem:[#allocation13_spill] sm:$0xff] %v8611_v58  ;;  %v8615_v42 = vadd.f32 %v3209_v13, %v2988_v0  ;;  %v2994_v59 = vadd.f32 %v9389_v8, %v8450_v32 }
 0x33a   : > { %v6111_v10 = vpop.f32.mrf.mxu1 }
 0x33b   : > { %v8621_v56 = vadd.f32 %v6111_v10, %v2991_v50  ;;  %v9388_v10 = vld [vmem:[#allocation10_spill] sm:$0xff] }
 0x33c   : > { %v3219_v14 = vpop.f32.mrf.mxu1  ;;  %v2995_v3 = vadd.f32 %v9388_v10, %v8446_v21  ;;  %v2996_v21 = vadd.f32 %v8454_v37, %v8460_v57  ;;  %v3692_v37 = vadd.f32 %v8494_v43, %v8480_v41  ;;  %v3693_v57 = vadd.f32 %v8484_v52, %v8476_v47 }
 0x33d   : > { %9384 = vst [vmem:[#allocation15_spill] sm:$0xff] %v8621_v56  ;;  %v8625_v30 = vadd.f32 %v3219_v14, %v2990_v38 }
 0x33e   : > { %v6114_v13 = vpop.f32.mrf.mxu1 }
 0x33f   : > { %v8631_v0 = vadd.f32 %v6114_v13, %v2993_v15  ;;  %v9390_v13 = vld [vmem:[#allocation12_spill] sm:$0xff] }
 0x340   : > { %v3229_v58 = vpop.f32.mrf.mxu1  ;;  %v2997_v12 = vadd.f32 %v9390_v13, %v8456_v7  ;;  %v3691_v7 = vadd.f32 %v8464_v31, %v8466_v22 }
 0x341   : > { %v8635_v50 = vadd.f32 %v3229_v58, %v2992_v51 }
 0x342   : > { %v6117_v14 = vpop.f32.mrf.mxu1 }
 0x343   : > { %v8641_v38 = vadd.f32 %v6117_v14, %v2995_v3  ;;  %v8657_v14 = vpop.f32.mrf.mxu0 }
 0x344   : > { %v3239_v56 = vpop.f32.mrf.mxu1 }
 0x345   : > { %v8645_v15 = vadd.f32 %v3239_v56, %v2994_v59  ;;  %v3690_v56 = vadd.f32 %v8474_v55, %v8470_v11  ;;  %v8663_v13 = vpop.f32.mrf.mxu0 }
 0x346   : > { %v6120_v58 = vpop.f32.mrf.mxu1 }
 0x347   : > { %v8651_v51 = vadd.f32 %v6120_v58, %v2997_v12  ;;  %v8671_v55 = vpop.f32.mrf.mxu0 }
 0x348   : > { %v3249_v10 = vpop.f32.mrf.mxu1 }
 0x349   : > { %v8655_v3 = vadd.f32 %v3249_v10, %v2996_v21  ;;  %v3694_v10 = vadd.f32 %v8529_v60, %v8490_v5  ;;  %v8679_v52 = vpop.f32.mrf.mxu0 }
 0x34a   : > { %v6181_v32 = vpop.f32.mrf.mxu1 }
 0x34b   : > { %v4123_v12 = vadd.f32 %v6181_v32, %v3691_v7  ;;  %v3695_v32 = vadd.f32 %v8512_v18, %v8486_v1  ;;  %v3696_v7 = vadd.f32 %v8549_v16, %v8508_v29  ;;  %v8687_v18 = vpop.f32.mrf.mxu0 }
 0x34c   : > { %v3943_v8 = vpop.f32.mrf.mxu1 }
 0x34d   : > { %v4122_v59 = vadd.f32 %v3943_v8, %v3690_v56  ;;  %v3697_v8 = vadd.f32 %v8539_v27, %v8496_v49  ;;  %v3621_v27 = vpop.f32.mrf.mxu0 }
 0x34e   : > { %v6184_v58 = vpop.f32.mrf.mxu1 }
 0x34f   : > { %6235 = vmatprep.mubr.msk.f32.mxu0 %vm765_vm4, %v4122_v59  ;;  %v4125_v31 = vadd.f32 %v6184_v58, %v3693_v57  ;;  %v3699_v58 = vadd.f32 %v8559_v25, %v8514_v4  ;;  %v3700_v57 = vadd.f32 %v8589_v53, %v8535_v35  ;;  %v6161_v4 = vpop.f32.mrf.mxu0 }
 0x350   : > { %v3953_v21 = vpop.f32.mrf.mxu1  ;;  %6236 = vmatmul.mubr.msk.f32.vlgmr.msra.gmra.mxu0 %vm765_vm4, %v4123_v12  ;;  %v3698_v12 = vadd.f32 %v8569_v9, %v8525_v46 }
 0x351   : > { %v4124_v11 = vadd.f32 %v3953_v21, %v3692_v37  ;;  %v3701_v21 = vadd.f32 %v8579_v28, %v8531_v20  ;;  %v3631_v20 = vpop.f32.mrf.mxu0 }
 0x352   : > { %v6187_v22 = vpop.f32.mrf.mxu1 }
 0x353   : > { %6238 = vmatprep.mubr.msk.f32.mxu0 %vm765_vm4, %v4124_v11  ;;  %v4127_v43 = vadd.f32 %v6187_v22, %v3695_v32  ;;  %v3703_v22 = vadd.f32 %v8599_v23, %v8541_v39  ;;  %v3704_v32 = vadd.f32 %v8629_v40, %v8555_v44  ;;  %v6164_v39 = vpop.f32.mrf.mxu0 }
 0x354   : > { %v3963_v41 = vpop.f32.mrf.mxu1  ;;  %6239 = vmatmul.mubr.msk.f32.gmra.mxu0 %vm765_vm4, %v4125_v31  ;;  %v3702_v31 = vadd.f32 %v8609_v34, %v8545_v33 }
 0x355   : > { %v4126_v47 = vadd.f32 %v3963_v41, %v3694_v10  ;;  %v3705_v41 = vadd.f32 %v8619_v36, %v8551_v45  ;;  %v3641_v45 = vpop.f32.mrf.mxu0 }
 0x356   : > { %v6190_v56 = vpop.f32.mrf.mxu1 }
 0x357   : > { %6241 = vmatprep.mubr.msk.f32.mxu0 %vm765_vm4, %v4126_v47  ;;  %v4129_v60 = vadd.f32 %v6190_v56, %v3697_v8  ;;  %v3707_v56 = vadd.f32 %v8639_v63, %v8561_v54  ;;  %v3708_v8 = vadd.f32 %v8663_v13, %v8575_v17  ;;  %v6167_v54 = vpop.f32.mrf.mxu0 }
 0x358   : > { %v3973_v5 = vpop.f32.mrf.mxu1  ;;  %6242 = vmatmul.mubr.msk.f32.gmra.mxu0 %vm765_vm4, %v4127_v43  ;;  %v3706_v43 = vadd.f32 %v8649_v26, %v8565_v61 }
 0x359   : > { %v4128_v1 = vadd.f32 %v3973_v5, %v3696_v7  ;;  %v3709_v5 = vadd.f32 %v8657_v14, %v8571_v24  ;;  %v3651_v24 = vpop.f32.mrf.mxu0 }
 0x35a   : > { %v6193_v59 = vpop.f32.mrf.mxu1 }
 0x35b   : > { %6244 = vmatprep.mubr.msk.f32.mxu0 %vm765_vm4, %v4128_v1  ;;  %v4131_v16 = vadd.f32 %v6193_v59, %v3699_v58  ;;  %v3711_v59 = vadd.f32 %v8671_v55, %v8581_v48  ;;  %v3712_v58 = vadd.f32 %v3621_v27, %v8595_v6 }
 0x35c   : > { %v3983_v29 = vpop.f32.mrf.mxu1  ;;  %6245 = vmatmul.mubr.msk.f32.gmra.mxu0 %vm765_vm4, %v4129_v60  ;;  %v3710_v60 = vadd.f32 %v8679_v52, %v8585_v62  ;;  %v6170_v52 = vpop.f32.mrf.mxu0 }
 0x35d   : > { %v4130_v49 = vadd.f32 %v3983_v29, %v3698_v12  ;;  %v3713_v29 = vadd.f32 %v8687_v18, %v8591_v2  ;;  %v3716_v18 = vadd.f32 %v3641_v45, %v8615_v42 }
 0x35e   : > { %v6196_v37 = vpop.f32.mrf.mxu1  ;;  %v3661_v27 = vpop.f32.mrf.mxu0 }
 0x35f   : > { %6247 = vmatprep.mubr.msk.f32.mxu0 %vm765_vm4, %v4130_v49  ;;  %v4133_v25 = vadd.f32 %v6196_v37, %v3701_v21  ;;  %v9391_v37 = vld [vmem:[#allocation24_spill] sm:$0xff] }
 0x360   : > { %v3993_v11 = vpop.f32.mrf.mxu1  ;;  %6248 = vmatmul.mubr.msk.f32.gmra.mxu0 %vm765_vm4, %v4131_v16  ;;  %v3714_v16 = vadd.f32 %v3631_v20, %v8605_v19  ;;  %v6173_v19 = vpop.f32.mrf.mxu0 }
 0x361   : > { %v4132_v46 = vadd.f32 %v3993_v11, %v3700_v57  ;;  %v3715_v57 = vadd.f32 %v6161_v4, %v9391_v37 }
 0x362   : > { %v6199_v9 = vpop.f32.mrf.mxu1  ;;  %v3671_v42 = vpop.f32.mrf.mxu0 }
 0x363   : > { %6250 = vmatprep.mubr.msk.f32.mxu0 %vm765_vm4, %v4132_v46  ;;  %v4135_v28 = vadd.f32 %v6199_v9, %v3703_v22  ;;  %v9392_v46 = vld [vmem:[#allocation13_spill] sm:$0xff] }
 0x364   : > { %v4003_v10 = vpop.f32.mrf.mxu1  ;;  %6251 = vmatmul.mubr.msk.f32.gmra.mxu0 %vm765_vm4, %v4133_v25  ;;  %v3717_v25 = vadd.f32 %v6164_v39, %v9392_v46 }
 0x365   : > { %v4134_v35 = vadd.f32 %v4003_v10, %v3702_v31  ;;  %v3718_v10 = vadd.f32 %v3651_v24, %v8625_v30  ;;  %v6176_v30 = vpop.f32.mrf.mxu0  ;;  %v6311_v24 = vld [vmem:[%s6405_s24 + $0x40] sm:$0xff] }
 0x366   : > { %v6202_v53 = vpop.f32.mrf.mxu1 }
 0x367   : > { %6253 = vmatprep.mubr.msk.f32.mxu0 %vm765_vm4, %v4134_v35  ;;  %v4137_v23 = vadd.f32 %v6202_v53, %v3705_v41  ;;  %v9393_v35 = vld [vmem:[#allocation15_spill] sm:$0xff] }
 0x368   : > { %v4013_v47 = vpop.f32.mrf.mxu1  ;;  %6254 = vmatmul.mubr.msk.f32.gmra.mxu0 %vm765_vm4, %v4135_v28  ;;  %v3719_v20 = vadd.f32 %v6167_v54, %v9393_v35  ;;  %v6308_v54 = vld [vmem:[%s6405_s24 + $0x28] sm:$0xff] }
 0x369   : > { %v4136_v33 = vadd.f32 %v4013_v47, %v3704_v32  ;;  %v3720_v47 = vadd.f32 %v3661_v27, %v8635_v50  ;;  %v3681_v50 = vpop.f32.mrf.mxu0 }
 0x36a   : > { %v6205_v34 = vpop.f32.mrf.mxu1 }
 0x36b   : > { %6256 = vmatprep.mubr.msk.f32.mxu0 %vm765_vm4, %v4136_v33  ;;  %v4139_v36 = vadd.f32 %v6205_v34, %v3707_v56  ;;  %v3721_v33 = vadd.f32 %v6170_v52, %v8631_v0  ;;  %v3722_v56 = vadd.f32 %v3671_v42, %v8645_v15 }
 0x36c   : > { %v4023_v7 = vpop.f32.mrf.mxu1  ;;  %6257 = vmatmul.mubr.msk.f32.gmra.mxu0 %vm765_vm4, %v4137_v23 }
 0x36d   : > { %v4138_v44 = vadd.f32 %v4023_v7, %v3706_v43  ;;  %v3723_v7 = vadd.f32 %v6173_v19, %v8641_v38  ;;  %v6307_v38 = vld [vmem:[%s6405_s24 + $0x10] sm:$0xff] }
 0x36e   : > { %v6208_v40 = vpop.f32.mrf.mxu1 }
 0x36f   : > { %6259 = vmatprep.mubr.msk.f32.mxu0 %vm765_vm4, %v4138_v44  ;;  %v4141_v63 = vadd.f32 %v6208_v40, %v3709_v5  ;;  %v3724_v40 = vadd.f32 %v3681_v50, %v8655_v3  ;;  %v4159_v5 = vrot.slane %v6307_v38, 3 }
 0x370   : > { %v4033_v1 = vpop.f32.mrf.mxu1  ;;  %6260 = vmatmul.mubr.msk.f32.gmra.mxu0 %vm765_vm4, %v4139_v36 }
 0x371   : > { %v4140_v61 = vadd.f32 %v4033_v1, %v3708_v8  ;;  %v3725_v8 = vadd.f32 %v6176_v30, %v8651_v51  ;;  %v9394_v51 = vld [vmem:[#allocation14_spill] sm:$0xff] }
 0x372   : > { %v6211_v26 = vpop.f32.mrf.mxu1  ;;  %v9395_v3 = vrot.slane %v9394_v51, 3 }
 0x373   : > { %6262 = vmatprep.mubr.msk.f32.mxu0 %vm765_vm4, %v4140_v61  ;;  %v4143_v14 = vadd.f32 %v6211_v26, %v3711_v59  ;;  %v6309_v26 = vld [vmem:[%s6405_s24 + $0x30] sm:$0xff] }
 0x374   : > { %v4043_v12 = vpop.f32.mrf.mxu1  ;;  %6263 = vmatmul.mubr.msk.f32.gmra.mxu0 %vm765_vm4, %v4141_v63  ;;  %v4164_v63 = vrot.slane %v6308_v54, 3  ;;  %v4161_v59 = vsel %vm2137_vm6, %v4159_v5, %v9395_v3 }
 0x375   : > { %v4142_v17 = vadd.f32 %v4043_v12, %v3710_v60  ;;  %v4166_v60 = vrot.slane %v6309_v26, 3  ;;  %v6310_v12 = vld [vmem:[%s6405_s24 + $0x38] sm:$0xff] }
 0x376   : > { %v6214_v13 = vpop.f32.mrf.mxu1 }
 0x377   : > { %6265 = vmatprep.mubr.msk.f32.mxu0 %vm765_vm4, %v4142_v17  ;;  %v4145_v48 = vadd.f32 %v6214_v13, %v3713_v29  ;;  %v4168_v17 = vrot.slane %v6310_v12, 3  ;;  %v4167_v13 = vsel %vm2137_vm6, %v4164_v63, %v4166_v60 }
 0x378   : > { %v4053_v49 = vpop.f32.mrf.mxu1  ;;  %6266 = vmatmul.mubr.msk.f32.gmra.mxu0 %vm765_vm4, %v4143_v14  ;;  %v4170_v14 = vrot.slane %v6311_v24, 3 }
 0x379   : > { %v4144_v62 = vadd.f32 %v4053_v49, %v3712_v58  ;;  %v9396_v58 = vld [vmem:[#allocation16_spill] sm:$0xff]  ;;  %v4169_v37 = vsel %vm2137_vm6, %v4166_v60, %v4168_v17 }
 0x37a   : > { %v6217_v55 = vpop.f32.mrf.mxu1  ;;  %v9397_v29 = vrot.slane %v9396_v58, 3 }
 0x37b   : > { %6268 = vmatprep.mubr.msk.f32.mxu0 %vm765_vm4, %v4144_v62  ;;  %v4147_v11 = vadd.f32 %v6217_v55, %v3715_v57  ;;  %v6312_v62 = vld [vmem:[%s6405_s24 + $0x48] sm:$0xff]  ;;  %v6314_v57 = vld [vmem:[%s6405_s24 + $0x58] sm:$0xff] }
 0x37c   : > { %v4063_v21 = vpop.f32.mrf.mxu1  ;;  %6269 = vmatmul.mubr.msk.f32.gmra.mxu0 %vm765_vm4, %v4145_v48  ;;  %v4165_v49 = vsel %vm2137_vm6, %v9397_v29, %v4164_v63  ;;  %v4172_v52 = vrot.slane %v6312_v62, 3  ;;  %v6313_v48 = vld [vmem:[%s6405_s24 + $0x50] sm:$0xff] }
 0x37d   : > { %v4146_v6 = vadd.f32 %v4063_v21, %v3714_v16  ;;  %v4174_v55 = vrot.slane %v6313_v48, 3  ;;  %v4171_v16 = vsel %vm2137_vm6, %v4168_v17, %v4170_v14  ;;  %v4176_v21 = vrot.slane %v6314_v57, 3  ;;  %v6321_v29 = vld [vmem:[%s6405_s24 + $0x90] sm:$0xff]  ;;  %v6322_v57 = vld [vmem:[%s6405_s24 + $0x98] sm:$0xff] }
 0x37e   : > { %v6220_v2 = vpop.f32.mrf.mxu1 }
 0x37f   : > { %6271 = vmatprep.mubr.msk.f32.mxu0 %vm765_vm4, %v4146_v6  ;;  %v4149_v22 = vadd.f32 %v6220_v2, %v3717_v25  ;;  %v6315_v6 = vld [vmem:[%s6405_s24 + $0x60] sm:$0xff]  ;;  %v4173_v2 = vsel %vm2137_vm6, %v4170_v14, %v4172_v52  ;;  %v6317_v25 = vld [vmem:[%s6405_s24 + $0x70] sm:$0xff]  ;;  %v4177_v19 = vsel %vm2137_vm6, %v4174_v55, %v4176_v21 }
 0x380   : > { %v4073_v9 = vpop.f32.mrf.mxu1  ;;  %6272 = vmatmul.mubr.msk.f32.gmra.mxu0 %vm765_vm4, %v4147_v11  ;;  %v4178_v27 = vrot.slane %v6315_v6, 3  ;;  %v4175_v11 = vsel %vm2137_vm6, %v4172_v52, %v4174_v55  ;;  %v6323_v6 = vld [vmem:[%s6405_s24 + $0xa0] sm:$0xff] }
 0x381   : > { %v4148_v31 = vadd.f32 %v4073_v9, %v3716_v18  ;;  %v6316_v18 = vld [vmem:[%s6405_s24 + $0x68] sm:$0xff]  ;;  %v4182_v9 = vrot.slane %v6317_v25, 3 }
 0x382   : > { %v6223_v4 = vpop.f32.mrf.mxu1  ;;  %v4180_v46 = vrot.slane %v6316_v18, 3 }
 0x383   : > { %6274 = vmatprep.mubr.msk.f32.mxu0 %vm765_vm4, %v4148_v31  ;;  %v4151_v32 = vadd.f32 %v6223_v4, %v3719_v20  ;;  %v4179_v31 = vsel %vm2137_vm6, %v4176_v21, %v4178_v27  ;;  %v4192_v21 = vrot.slane %v6322_v57, 3 }
 0x384   : > { %v4083_v28 = vpop.f32.mrf.mxu1  ;;  %6275 = vmatmul.mubr.msk.f32.gmra.mxu0 %vm765_vm4, %v4149_v22  ;;  %v6318_v22 = vld [vmem:[%s6405_s24 + $0x78] sm:$0xff]  ;;  %v4183_v20 = vsel %vm2137_vm6, %v4180_v46, %v4182_v9 }
 0x385   : > { %v4150_v53 = vadd.f32 %v4083_v28, %v3718_v10  ;;  %v4184_v4 = vrot.slane %v6318_v22, 3  ;;  %v6319_v10 = vld [vmem:[%s6405_s24 + $0x80] sm:$0xff]  ;;  %v4181_v28 = vsel %vm2137_vm6, %v4178_v27, %v4180_v46  ;;  %v4194_v27 = vrot.slane %v6323_v6, 3 }
 0x386   : > { %v6226_v41 = vpop.f32.mrf.mxu1  ;;  %v4186_v35 = vrot.slane %v6319_v10, 3 }
 0x387   : > { %6277 = vmatprep.mubr.msk.f32.mxu0 %vm765_vm4, %v4150_v53  ;;  %v4153_v34 = vadd.f32 %v6226_v41, %v3721_v33  ;;  %v8792_v42 = vsel %vm2137_vm6, %v4182_v9, %v4184_v4 }
 0x388   : > { %v4093_v39 = vpop.f32.mrf.mxu1  ;;  %6278 = vmatmul.mubr.msk.f32.gmra.mxu0 %vm765_vm4, %v4151_v32  ;;  %v4187_v53 = vsel %vm2137_vm6, %v4184_v4, %v4186_v35  ;;  %v8795_v32 = vld [vmem:[%s6405_s24 + $0x88] sm:$0xff]  ;;  %v6325_v4 = vld [vmem:[%s6405_s24 + $0xb0] sm:$0xff] }
 0x389   : > { %v4152_v23 = vadd.f32 %v4093_v39, %v3720_v47  ;;  %v4188_v41 = vrot.slane %v8795_v32, 3  ;;  %v9398_v39 = vld [vmem:[#allocation20_spill] sm:$0xff]  ;;  %v4198_v10 = vrot.slane %v6325_v4, 3 }
 0x38a   : > { %v6229_v43 = vpop.f32.mrf.mxu1 }
 0x38b   : > { %6280 = vmatprep.mubr.msk.f32.mxu0 %vm765_vm4, %v4152_v23  ;;  %v4155_v45 = vadd.f32 %v6229_v43, %v3723_v7  ;;  %v8799_v47 = vsel %vm2137_vm6, %v4186_v35, %v4188_v41 }
 0x38c   : > { %v4103_v44 = vpop.f32.mrf.mxu1  ;;  %6281 = vmatmul.mubr.msk.f32.gmra.mxu0 %vm765_vm4, %v4153_v34 }
 0x38d   : > { %v4154_v0 = vadd.f32 %v4103_v44, %v3722_v56 }
 0x38e   : > { %v6232_v36 = vpop.f32.mrf.mxu1 }
 0x38f   : > { %6283 = vmatprep.mubr.msk.f32.mxu0 %vm765_vm4, %v4154_v0  ;;  %v4157_v61 = vadd.f32 %v6232_v36, %v3725_v8 }
 0x390   : > { %v4113_v15 = vpop.f32.mrf.mxu1  ;;  %6284 = vmatmul.mubr.msk.f32.gmra.mxu0 %vm765_vm4, %v4155_v45 }
 0x391   : > { %v4156_v1 = vadd.f32 %v4113_v15, %v3724_v40 }
 0x393   : > { %6286 = vmatprep.mubr.msk.f32.mxu0 %vm765_vm4, %v4156_v1 }
 0x394   : > { %6287 = vmatmul.mubr.msk.f32.gmra.mxu0 %vm765_vm4, %v4157_v61 }
 0x410   : > { %v6237_v33 = vpop.f32.mrf.mxu0 }
 0x411   : > { %v4451_v23 = vadd.f32 %v6237_v33, %v9398_v39  ;;  %v6326_v39 = vld [vmem:[%s6405_s24 + $0xb8] sm:$0xff] }
 0x412   : > { %v4445_v30 = vpop.f32.mrf.mxu0 }
 0x413   : > { %v4625_v34 = vmax.f32 %v4451_v23, 0.0  ;;  %v4446_v43 = vadd.f32 %v4445_v30, %v4161_v59  ;;  %v4200_v23 = vrot.slane %v6326_v39, 3  ;;  %v6327_v30 = vld [vmem:[%s6405_s24 + $0xc0] sm:$0xff] }
 0x414   : > { %v6240_v56 = vpop.f32.mrf.mxu0 }
 0x415   : > { %4661 = vst.msk [vmem:[%s8806_s25 + $0x8] sm:$0xff] %vm243_vm1, %v4625_v34  ;;  %v4624_v7 = vmax.f32 %v4446_v43, 0.0  ;;  %v4461_v44 = vadd.f32 %v6240_v56, %v4167_v13  ;;  %v4202_v34 = vrot.slane %v6327_v30, 3 }
 0x416   : > { %v4455_v0 = vpop.f32.mrf.mxu0 }
 0x417   : > { %4660 = vst.msk [vmem:[%s8806_s25] sm:$0xff] %vm243_vm1, %v4624_v7  ;;  %v4627_v50 = vmax.f32 %v4461_v44, 0.0  ;;  %v4456_v45 = vadd.f32 %v4455_v0, %v4165_v49  ;;  %v4190_v49 = vrot.slane %v6321_v29, 3 }
 0x418   : > { %v6243_v36 = vpop.f32.mrf.mxu0 }
 0x419   : > { %4663 = vst.msk [vmem:[%s8806_s25 + $0x18] sm:$0xff] %vm243_vm1, %v4627_v50  ;;  %v4626_v40 = vmax.f32 %v4456_v45, 0.0  ;;  %v4471_v8 = vadd.f32 %v6243_v36, %v4171_v16  ;;  %v4193_v32 = vsel %vm2137_vm6, %v4190_v49, %v4192_v21  ;;  %v6328_v36 = vld [vmem:[%s6405_s24 + $0xc8] sm:$0xff] }
 0x41a   : > { %v4465_v15 = vpop.f32.mrf.mxu0 }
 0x41b   : > { %4662 = vst.msk [vmem:[%s8806_s25 + $0x10] sm:$0xff] %vm243_vm1, %v4626_v40  ;;  %v4629_v38 = vmax.f32 %v4471_v8, 0.0  ;;  %v4466_v5 = vadd.f32 %v4465_v15, %v4169_v37  ;;  %v4204_v40 = vrot.slane %v6328_v36, 3  ;;  %v6329_v8 = vld [vmem:[%s6405_s24 + $0xd0] sm:$0xff] }
 0x41c   : > { %v6246_v1 = vpop.f32.mrf.mxu0  ;;  %v4206_v15 = vrot.slane %v6329_v8, 3 }
 0x41d   : > { %4665 = vst.msk [vmem:[%s8806_s25 + $0x28] sm:$0xff] %vm243_vm1, %v4629_v38  ;;  %v4628_v61 = vmax.f32 %v4466_v5, 0.0  ;;  %v4481_v54 = vadd.f32 %v6246_v1, %v4175_v11  ;;  %v4203_v5 = vsel %vm2137_vm6, %v4200_v23, %v4202_v34  ;;  %v4205_v29 = vsel %vm2137_vm6, %v4202_v34, %v4204_v40 }
 0x41e   : > { %v4475_v63 = vpop.f32.mrf.mxu0 }
 0x41f   : > { %4664 = vst.msk [vmem:[%s8806_s25 + $0x20] sm:$0xff] %vm243_vm1, %v4628_v61  ;;  %v4631_v26 = vmax.f32 %v4481_v54, 0.0  ;;  %v4476_v60 = vadd.f32 %v4475_v63, %v4173_v2  ;;  %v4191_v2 = vsel %vm2137_vm6, %v4188_v41, %v4190_v49  ;;  %v4201_v63 = vsel %vm2137_vm6, %v4198_v10, %v4200_v23 }
 0x420   : > { %v6249_v51 = vpop.f32.mrf.mxu0 }
 0x421   : > { %4667 = vst.msk [vmem:[%s8806_s25 + $0x38] sm:$0xff] %vm243_vm1, %v4631_v26  ;;  %v4630_v3 = vmax.f32 %v4476_v60, 0.0  ;;  %v4491_v59 = vadd.f32 %v6249_v51, %v4179_v31  ;;  %v6330_v51 = vld [vmem:[%s6405_s24 + $0xd8] sm:$0xff] }
 0x422   : > { %v4485_v12 = vpop.f32.mrf.mxu0 }
 0x423   : > { %4666 = vst.msk [vmem:[%s8806_s25 + $0x30] sm:$0xff] %vm243_vm1, %v4630_v3  ;;  %v4633_v17 = vmax.f32 %v4491_v59, 0.0  ;;  %v4486_v24 = vadd.f32 %v4485_v12, %v4177_v19  ;;  %v6324_v19 = vld [vmem:[%s6405_s24 + $0xa8] sm:$0xff]  ;;  %v4208_v3 = vrot.slane %v6330_v51, 3  ;;  %v6331_v59 = vld [vmem:[%s6405_s24 + $0xe0] sm:$0xff] }
 0x424   : > { %v6252_v14 = vpop.f32.mrf.mxu0  ;;  %v4196_v22 = vrot.slane %v6324_v19, 3  ;;  %v4210_v12 = vrot.slane %v6331_v59, 3 }
 0x425   : > { %4669 = vst.msk [vmem:[%s8806_s25 + $0x48] sm:$0xff] %vm243_vm1, %v4633_v17  ;;  %v4632_v13 = vmax.f32 %v4486_v24, 0.0  ;;  %v4501_v58 = vadd.f32 %v6252_v14, %v4183_v20  ;;  %v4195_v20 = vsel %vm2137_vm6, %v4192_v21, %v4194_v27  ;;  %v4207_v24 = vsel %vm2137_vm6, %v4204_v40, %v4206_v15 }
 0x426   : > { %v4495_v62 = vpop.f32.mrf.mxu0  ;;  %v4199_v56 = vsel %vm2137_vm6, %v4196_v22, %v4198_v10  ;;  %v4197_v0 = vsel %vm2137_vm6, %v4194_v27, %v4196_v22  ;;  %v4211_v57 = vsel %vm2137_vm6, %v4208_v3, %v4210_v12 }
 0x427   : > { %4668 = vst.msk [vmem:[%s8806_s25 + $0x40] sm:$0xff] %vm243_vm1, %v4632_v13  ;;  %v4635_v52 = vmax.f32 %v4501_v58, 0.0  ;;  %v4496_v48 = vadd.f32 %v4495_v62, %v4181_v28 }
 0x428   : > { %v6255_v55 = vpop.f32.mrf.mxu0 }
 0x429   : > { %4671 = vst.msk [vmem:[%s8806_s25 + $0x58] sm:$0xff] %vm243_vm1, %v4635_v52  ;;  %v4634_v16 = vmax.f32 %v4496_v48, 0.0  ;;  %v4511_v37 = vadd.f32 %v6255_v55, %v4187_v53  ;;  %v6332_v52 = vld [vmem:[%s6405_s24 + $0xe8] sm:$0xff]  ;;  %v6333_v55 = vld [vmem:[%s6405_s24 + $0xf0] sm:$0xff] }
 0x42a   : > { %v4505_v11 = vpop.f32.mrf.mxu0  ;;  %v4212_v48 = vrot.slane %v6332_v52, 3 }
 0x42b   : > { %4670 = vst.msk [vmem:[%s8806_s25 + $0x50] sm:$0xff] %vm243_vm1, %v4634_v16  ;;  %v4637_v18 = vmax.f32 %v4511_v37, 0.0  ;;  %v4506_v46 = vadd.f32 %v4505_v11, %v8792_v42  ;;  %v4214_v16 = vrot.slane %v6333_v55, 3  ;;  %v4209_v11 = vsel %vm2137_vm6, %v4206_v15, %v4208_v3 }
 0x42c   : > { %v6258_v25 = vpop.f32.mrf.mxu0 }
 0x42d   : > { %4673 = vst.msk [vmem:[%s8806_s25 + $0x68] sm:$0xff] %vm243_vm1, %v4637_v18  ;;  %v4636_v9 = vmax.f32 %v4506_v46, 0.0  ;;  %v4521_v31 = vadd.f32 %v6258_v25, %v4191_v2  ;;  %v6334_v46 = vld [vmem:[%s6405_s24 + $0xf8] sm:$0xff]  ;;  %v4215_v22 = vsel %vm2137_vm6, %v4212_v48, %v4214_v16 }
 0x42e   : > { %v4515_v35 = vpop.f32.mrf.mxu0  ;;  %v4216_v25 = vrot.slane %v6334_v46, 3 }
 0x42f   : > { %4672 = vst.msk [vmem:[%s8806_s25 + $0x60] sm:$0xff] %vm243_vm1, %v4636_v9  ;;  %v4639_v28 = vmax.f32 %v4521_v31, 0.0  ;;  %v4516_v53 = vadd.f32 %v4515_v35, %v8799_v47  ;;  %v6335_v9 = vld [vmem:[%s6405_s24 + $0x100] sm:$0xff] }
 0x430   : > { %v6261_v42 = vpop.f32.mrf.mxu0  ;;  %v4218_v31 = vrot.slane %v6335_v9, 3 }
 0x431   : > { %4675 = vst.msk [vmem:[%s8806_s25 + $0x78] sm:$0xff] %vm243_vm1, %v4639_v28  ;;  %v4638_v41 = vmax.f32 %v4516_v53, 0.0  ;;  %v4531_v33 = vadd.f32 %v6261_v42, %v4195_v20  ;;  %v4213_v20 = vsel %vm2137_vm6, %v4210_v12, %v4212_v48  ;;  %v6336_v42 = vld [vmem:[%s6405_s24 + $0x108] sm:$0xff] }
 0x432   : > { %v4525_v43 = vpop.f32.mrf.mxu0  ;;  %v4219_v23 = vsel %vm2137_vm6, %v4216_v25, %v4218_v31 }
 0x433   : > { %4674 = vst.msk [vmem:[%s8806_s25 + $0x70] sm:$0xff] %vm243_vm1, %v4638_v41  ;;  %v4641_v47 = vmax.f32 %v4531_v33, 0.0  ;;  %v4526_v7 = vadd.f32 %v4525_v43, %v4193_v32  ;;  %v4220_v32 = vrot.slane %v6336_v42, 3  ;;  %v6337_v41 = vld [vmem:[%s6405_s24 + $0x110] sm:$0xff] }
 0x434   : > { %v6264_v44 = vpop.f32.mrf.mxu0  ;;  %v4222_v33 = vrot.slane %v6337_v41, 3 }
 0x435   : > { %4677 = vst.msk [vmem:[%s8806_s25 + $0x88] sm:$0xff] %vm243_vm1, %v4641_v47  ;;  %v4640_v50 = vmax.f32 %v4526_v7, 0.0  ;;  %v4541_v45 = vadd.f32 %v6264_v44, %v4199_v56  ;;  %v4217_v56 = vsel %vm2137_vm6, %v4214_v16, %v4216_v25  ;;  %v6338_v44 = vld [vmem:[%s6405_s24 + $0x118] sm:$0xff] }
 0x436   : > { %v4535_v38 = vpop.f32.mrf.mxu0  ;;  %v4223_v40 = vsel %vm2137_vm6, %v4220_v32, %v4222_v33 }
 0x437   : > { %4676 = vst.msk [vmem:[%s8806_s25 + $0x80] sm:$0xff] %vm243_vm1, %v4640_v50  ;;  %v4643_v1 = vmax.f32 %v4541_v45, 0.0  ;;  %v4536_v61 = vadd.f32 %v4535_v38, %v4197_v0  ;;  %v4224_v0 = vrot.slane %v6338_v44, 3  ;;  %v6339_v50 = vld [vmem:[%s6405_s24 + $0x120] sm:$0xff] }
 0x438   : > { %v6267_v54 = vpop.f32.mrf.mxu0  ;;  %v4226_v45 = vrot.slane %v6339_v50, 3 }
 0x439   : > { %4679 = vst.msk [vmem:[%s8806_s25 + $0x98] sm:$0xff] %vm243_vm1, %v4643_v1  ;;  %v4642_v26 = vmax.f32 %v4536_v61, 0.0  ;;  %v4551_v60 = vadd.f32 %v6267_v54, %v4203_v5  ;;  %v4221_v5 = vsel %vm2137_vm6, %v4218_v31, %v4220_v32  ;;  %v6340_v54 = vld [vmem:[%s6405_s24 + $0x128] sm:$0xff] }
 0x43a   : > { %v4545_v17 = vpop.f32.mrf.mxu0  ;;  %v4227_v3 = vsel %vm2137_vm6, %v4224_v0, %v4226_v45 }
 0x43b   : > { %4678 = vst.msk [vmem:[%s8806_s25 + $0x90] sm:$0xff] %vm243_vm1, %v4642_v26  ;;  %v4645_v14 = vmax.f32 %v4551_v60, 0.0  ;;  %v4546_v13 = vadd.f32 %v4545_v17, %v4201_v63  ;;  %v4228_v63 = vrot.slane %v6340_v54, 3  ;;  %v6341_v26 = vld [vmem:[%s6405_s24 + $0x130] sm:$0xff] }
 0x43c   : > { %v6270_v58 = vpop.f32.mrf.mxu0  ;;  %v4230_v60 = vrot.slane %v6341_v26, 3 }
 0x43d   : > { %4681 = vst.msk [vmem:[%s8806_s25 + $0xa8] sm:$0xff] %vm243_vm1, %v4645_v14  ;;  %v4644_v49 = vmax.f32 %v4546_v13, 0.0  ;;  %v4561_v62 = vadd.f32 %v6270_v58, %v4207_v24  ;;  %v4225_v24 = vsel %vm2137_vm6, %v4222_v33, %v4224_v0  ;;  %v4229_v48 = vsel %vm2137_vm6, %v4226_v45, %v4228_v63 }
 0x43e   : > { %v4555_v37 = vpop.f32.mrf.mxu0 }
 0x43f   : > { %4680 = vst.msk [vmem:[%s8806_s25 + $0xa0] sm:$0xff] %vm243_vm1, %v4644_v49  ;;  %v4647_v21 = vmax.f32 %v4561_v62, 0.0  ;;  %v4556_v6 = vadd.f32 %v4555_v37, %v4205_v29  ;;  %v4231_v29 = vsel %vm2137_vm6, %v4228_v63, %v4230_v60 }
 0x440   : > { %v6273_v27 = vpop.f32.mrf.mxu0 }
 0x441   : > { %4683 = vst.msk [vmem:[%s8806_s25 + $0xb8] sm:$0xff] %vm243_vm1, %v4647_v21  ;;  %v4646_v2 = vmax.f32 %v4556_v6, 0.0  ;;  %v4571_v18 = vadd.f32 %v6273_v27, %v4211_v57 }
 0x442   : > { %v4565_v19 = vpop.f32.mrf.mxu0 }
 0x443   : > { %4682 = vst.msk [vmem:[%s8806_s25 + $0xb0] sm:$0xff] %vm243_vm1, %v4646_v2  ;;  %v4649_v4 = vmax.f32 %v4571_v18, 0.0  ;;  %v4566_v10 = vadd.f32 %v4565_v19, %v4209_v11 }
 0x444   : > { %v6276_v35 = vpop.f32.mrf.mxu0 }
 0x445   : > { %4685 = vst.msk [vmem:[%s8806_s25 + $0xc8] sm:$0xff] %vm243_vm1, %v4649_v4  ;;  %v4648_v28 = vmax.f32 %v4566_v10, 0.0  ;;  %v4581_v53 = vadd.f32 %v6276_v35, %v4215_v22 }
 0x446   : > { %v4575_v39 = vpop.f32.mrf.mxu0 }
 0x447   : > { %4684 = vst.msk [vmem:[%s8806_s25 + $0xc0] sm:$0xff] %vm243_vm1, %v4648_v28  ;;  %v4651_v30 = vmax.f32 %v4581_v53, 0.0  ;;  %v4576_v34 = vadd.f32 %v4575_v39, %v4213_v20 }
 0x448   : > { %v6279_v43 = vpop.f32.mrf.mxu0 }
 0x449   : > { %4687 = vst.msk [vmem:[%s8806_s25 + $0xd8] sm:$0xff] %vm243_vm1, %v4651_v30  ;;  %v4650_v47 = vmax.f32 %v4576_v34, 0.0  ;;  %v4591_v7 = vadd.f32 %v6279_v43, %v4219_v23 }
 0x44a   : > { %v4585_v36 = vpop.f32.mrf.mxu0 }
 0x44b   : > { %4686 = vst.msk [vmem:[%s8806_s25 + $0xd0] sm:$0xff] %vm243_vm1, %v4650_v47  ;;  %v4653_v8 = vmax.f32 %v4591_v7, 0.0  ;;  %v4586_v15 = vadd.f32 %v4585_v36, %v4217_v56 }
 0x44c   : > { %v6282_v38 = vpop.f32.mrf.mxu0 }
 0x44d   : > { %4689 = vst.msk [vmem:[%s8806_s25 + $0xe8] sm:$0xff] %vm243_vm1, %v4653_v8  ;;  %v4652_v1 = vmax.f32 %v4586_v15, 0.0  ;;  %v4601_v61 = vadd.f32 %v6282_v38, %v4223_v40 }
 0x44e   : > { %v4595_v51 = vpop.f32.mrf.mxu0 }
 0x44f   : > { %4688 = vst.msk [vmem:[%s8806_s25 + $0xe0] sm:$0xff] %vm243_vm1, %v4652_v1  ;;  %v4655_v59 = vmax.f32 %v4601_v61, 0.0  ;;  %v4596_v12 = vadd.f32 %v4595_v51, %v4221_v5 }
 0x450   : > { %v6285_v17 = vpop.f32.mrf.mxu0 }
 0x451   : > { %4691 = vst.msk [vmem:[%s8806_s25 + $0xf8] sm:$0xff] %vm243_vm1, %v4655_v59  ;;  %v4654_v14 = vmax.f32 %v4596_v12, 0.0  ;;  %v4611_v13 = vadd.f32 %v6285_v17, %v4227_v3 }
 0x452   : > { %v4605_v58 = vpop.f32.mrf.mxu0 }
 0x453   : > { %4690 = vst.msk [vmem:[%s8806_s25 + $0xf0] sm:$0xff] %vm243_vm1, %v4654_v14  ;;  %v4657_v49 = vmax.f32 %v4611_v13, 0.0  ;;  %v4606_v62 = vadd.f32 %v4605_v58, %v4225_v24 }
 0x454   : > { %v6288_v52 = vpop.f32.mrf.mxu0 }
 0x455   : > { %4693 = vst.msk [vmem:[%s8806_s25 + $0x108] sm:$0xff] %vm243_vm1, %v4657_v49  ;;  %v4656_v55 = vmax.f32 %v4606_v62, 0.0  ;;  %v4621_v16 = vadd.f32 %v6288_v52, %v4231_v29 }
 0x456   : > { %v4615_v37 = vpop.f32.mrf.mxu0 }
 0x457   : > { %4692 = vst.msk [vmem:[%s8806_s25 + $0x100] sm:$0xff] %vm243_vm1, %v4656_v55  ;;  %v4659_v57 = vmax.f32 %v4621_v16, 0.0  ;;  %v4616_v21 = vadd.f32 %v4615_v37, %v4229_v48 }
 0x459   : > { %4695 = vst.msk [vmem:[%s8806_s25 + $0x118] sm:$0xff] %vm243_vm1, %v4659_v57  ;;  %v4658_v6 = vmax.f32 %v4616_v21, 0.0 }
 0x45b   : > { %4694 = vst.msk [vmem:[%s8806_s25 + $0x110] sm:$0xff] %vm243_vm1, %v4658_v6 }
 0x45c PF: > { %s14_s15 = sadd.s32 1, %s6348_s15  }
 0x45d   : > { %p11_p4 = scmp.ge.s32.totalorder %s14_s15, 4  }
 0x45f   :  { %13 = sbr.rel (!%p11_p4) target bundleno = 1 (0x1), region = 74 }

</bundles_post_ra>
